<compile_context>
chip_gen: v6e
topology: v6e:2x2x1
jax: 0.10.0
libtpu: 0.0.40
codegen_flags: <defaults>
</compile_context>

<pallas_src>
import functools

import jax
import jax.numpy as jnp
from jax.experimental import pallas as pl

# ----------------------------- problem sizes --------------------------------
B = 2          # batch
T = 8          # sequence length
A = 3          # n_agents
F = 16         # input_size
H = 32         # hidden_size
L = 2          # n_layers
G = A * H                                   # folded hidden width (96 valid lanes)
PAD = ((G + 127) // 128) * 128              # gate-group width padded to full vregs


# ------------------------------ Pallas kernel -------------------------------
def _gru_kernel(x_ref, keep_ref, *rest, n_layers, seq_len, batch, pad):
    """Whole MultiAgentGRU recurrence, all agents folded, one invocation.

    x_ref    : (T*B, A*F)  bf16, time-major rows
    keep_ref : (T, B, PAD) f32, (1 - is_init) pre-broadcast
    rest     : (W_in_l, W_h_l, b_l) * n_layers, then out_ref, hn_ref.
               W_* are block-diagonal over agents with gate-grouped columns
               [r | z | n_in | n_h], each group padded to PAD lanes.
    out_ref  : (T, B, PAD) f32
    hn_ref   : (L, B, PAD) f32
    """
    P = pad
    w_refs = rest[:3 * n_layers]
    out_ref, hn_ref = rest[3 * n_layers], rest[3 * n_layers + 1]

    win = [w_refs[3 * l] for l in range(n_layers)]
    wh = [w_refs[3 * l + 1] for l in range(n_layers)]
    b = [w_refs[3 * l + 2] for l in range(n_layers)]

    keep = keep_ref[...]                                    # (T, B, P)

    # Layer-0 input path for every timestep in a single MXU call (+ bias),
    # off the recurrent critical path. Rows are (t, b), t-major.
    gi0 = jnp.dot(x_ref[...], win[0][...],
                  preferred_element_type=jnp.float32) + b[0][...]   # (T*B, 4P)

    # Per-step biases for the deeper layers, broadcast once (not per step).
    bias = [None] + [jnp.broadcast_to(b[l][...], (batch, 4 * P))
                     for l in range(1, n_layers)]

    # Training mode: h_0 == 0. Pad lanes G..P-1 stay exactly 0 forever.
    hs = [jnp.zeros((batch, P), jnp.float32) for _ in range(n_layers)]

    def cell(g, hm):
        # g columns: [r_sum | z_sum | n_in | n_h], each P lanes (vreg aligned).
        rz = jax.nn.sigmoid(g[:, :2 * P])                   # one fused sigmoid
        r, z = rz[:, :P], rz[:, P:]
        n = jnp.tanh(g[:, 2 * P:3 * P] + r * g[:, 3 * P:])
        return n + z * (hm - n)                             # == (1-z)*n + z*hm

    for t in range(seq_len):                                # static unroll, T small
        keep_t = keep[t]                                    # (B, P) float mask
        # ---- layer 0: only the recurrent dot is on the critical path
        hm = hs[0] * keep_t                                 # torch.where(init, 0, h)
        g = gi0[t * batch:(t + 1) * batch] + jnp.dot(
            hm.astype(jnp.bfloat16), wh[0][...],
            preferred_element_type=jnp.float32)
        hs[0] = cell(g, hm)
        in_t = hs[0]
        # ---- layers 1..L-1 (dropout == 0.0 -> passthrough)
        for l in range(1, n_layers):
            hm = hs[l] * keep_t
            g = (jnp.dot(in_t.astype(jnp.bfloat16), win[l][...],
                         preferred_element_type=jnp.float32)
                 + jnp.dot(hm.astype(jnp.bfloat16), wh[l][...],
                           preferred_element_type=jnp.float32)
                 + bias[l])
            hs[l] = cell(g, hm)
            in_t = hs[l]
        out_ref[t] = in_t                                   # (B, 128) lane-dense write

    for l in range(n_layers):
        hn_ref[l] = hs[l]


# --------------------------- weight pre-packing ------------------------------
def pack_params(params):
    """Pack per-agent PyTorch-layout GRUCell weights (gate order [r; z; n]) into
    block-diagonal, gate-grouped, 128-lane-padded fused matrices:
      W_in_l : (in_rows_l, 4*PAD) bf16   columns [r | z | n_in |  0  ]
      W_h_l  : (PAD,       4*PAD) bf16   columns [r | z |  0   | n_h ]
      b_l    : (1,         4*PAD) f32    [bi_r+bh_r | bi_z+bh_z | bi_n | bh_n]
    Done ONCE at parameter-init time, not on every forward call."""
    packed = []
    for layer, (w_ih, w_hh, b_ih, b_hh) in enumerate(params):
        in_dim = F if layer == 0 else H
        in_rows = A * in_dim if layer == 0 else PAD   # layer>0 lhs is padded hidden
        w_in = jnp.zeros((in_rows, 4 * PAD), jnp.float32)
        w_h = jnp.zeros((PAD, 4 * PAD), jnp.float32)
        bias = jnp.zeros((1, 4 * PAD), jnp.float32)
        for ag in range(A):
            ri = slice(ag * in_dim, (ag + 1) * in_dim)      # lhs rows of agent ag
            rh = slice(ag * H, (ag + 1) * H)
            col = [slice(gr * PAD + ag * H, gr * PAD + (ag + 1) * H)
                   for gr in range(4)]
            w_in = w_in.at[ri, col[0]].set(w_ih[ag, :, :H])
            w_in = w_in.at[ri, col[1]].set(w_ih[ag, :, H:2 * H])
            w_in = w_in.at[ri, col[2]].set(w_ih[ag, :, 2 * H:])
            w_h = w_h.at[rh, col[0]].set(w_hh[ag, :, :H])
            w_h = w_h.at[rh, col[1]].set(w_hh[ag, :, H:2 * H])
            w_h = w_h.at[rh, col[3]].set(w_hh[ag, :, 2 * H:])
            bias = bias.at[0, col[0]].set(b_ih[ag, 0, :H] + b_hh[ag, 0, :H])
            bias = bias.at[0, col[1]].set(b_ih[ag, 0, H:2 * H] + b_hh[ag, 0, H:2 * H])
            bias = bias.at[0, col[2]].set(b_ih[ag, 0, 2 * H:])
            bias = bias.at[0, col[3]].set(b_hh[ag, 0, 2 * H:])
        packed += [w_in.astype(jnp.bfloat16), w_h.astype(jnp.bfloat16), bias]
    return packed


# --------------------------------- wrapper ------------------------------------
@jax.jit
def multi_agent_gru(x, is_init, packed):
    """x: (B, T, A, F) f32; is_init: (B, T, 1) f32 mask; packed: pack_params(...).
    Returns output (B, T, A, H), h_n (B, A, L, H)   [training mode, h_0 = 0]."""
    b, t, a, f = x.shape
    # time-major, agent-flattened rows for the single layer-0 input matmul
    x_k = jnp.transpose(x, (1, 0, 2, 3)).reshape(t * b, a * f).astype(jnp.bfloat16)
    # float "keep" mask, pre-broadcast so the kernel does one mul per layer/step
    keep = jnp.broadcast_to(1.0 - jnp.transpose(is_init, (1, 0, 2)),
                            (t, b, PAD)).astype(jnp.float32)

    kernel = functools.partial(_gru_kernel, n_layers=L, seq_len=t, batch=b, pad=PAD)
    out_k, hn_k = pl.pallas_call(
        kernel,
        # grid-less call: every operand is one whole-array VMEM block
        out_shape=(jax.ShapeDtypeStruct((t, b, PAD), jnp.float32),
                   jax.ShapeDtypeStruct((L, b, PAD), jnp.float32)),
    )(x_k, keep, *packed)

    output = jnp.transpose(out_k[:, :, :G], (1, 0, 2)).reshape(b, t, a, H)
    h_n = jnp.transpose(hn_k[:, :, :G].reshape(L, b, a, H), (1, 2, 0, 3))
    return output, h_n


# ---------------------------- pure-JAX reference -----------------------------
def reference_gru(x, is_init, params):
    b, t, a, f = x.shape
    h_layers = [jnp.zeros((b, a, H), jnp.float32) for _ in range(L)]
    outs = []
    for ti in range(t):
        init_t = is_init[:, ti, :][:, None, :]        # (B, 1, 1)
        in_t = x[:, ti]                               # (B, A, F)
        for layer in range(L):
            w_ih, w_hh, b_ih, b_hh = params[layer]
            h = jnp.where(init_t > 0.5, 0.0, h_layers[layer])
            gi = jnp.einsum('baf,afh->bah', in_t, w_ih) + b_ih[None, :, 0, :]
            gh = jnp.einsum('bah,ahk->bak', h, w_hh) + b_hh[None, :, 0, :]
            i_r, i_z, i_n = jnp.split(gi, 3, axis=-1)
            h_r, h_z, h_n = jnp.split(gh, 3, axis=-1)
            r = jax.nn.sigmoid(i_r + h_r)
            z = jax.nn.sigmoid(i_z + h_z)
            n = jnp.tanh(i_n + r * h_n)
            h_new = (1.0 - z) * n + z * h
            h_layers[layer] = h_new
            in_t = h_new
        outs.append(in_t)
    output = jnp.stack(outs, axis=1)                  # (B, T, A, H)
    h_n = jnp.stack(h_layers, axis=2)                 # (B, A, L, H)
    return output, h_n


# --------------------------------- driver ------------------------------------
if __name__ == "__main__":
    key = jax.random.PRNGKey(0)
    k_x, k_init, k_w = jax.random.split(key, 3)

    x = jax.random.normal(k_x, (B, T, A, F), jnp.float32)
    is_init = jax.random.bernoulli(k_init, 0.2, (B, T, 1)).astype(jnp.float32)

    # deterministic per-agent GRUCell params (uniform(-1/sqrt(H), 1/sqrt(H)))
    bound = 1.0 / (H ** 0.5)
    params = []
    wkeys = jax.random.split(k_w, 4 * L)
    for layer in range(L):
        in_dim = F if layer == 0 else H
        w_ih = jax.random.uniform(wkeys[4 * layer + 0], (A, in_dim, 3 * H),
                                  jnp.float32, -bound, bound)
        w_hh = jax.random.uniform(wkeys[4 * layer + 1], (A, H, 3 * H),
                                  jnp.float32, -bound, bound)
        b_ih = jax.random.uniform(wkeys[4 * layer + 2], (A, 1, 3 * H),
                                  jnp.float32, -bound, bound)
        b_hh = jax.random.uniform(wkeys[4 * layer + 3], (A, 1, 3 * H),
                                  jnp.float32, -bound, bound)
        params.append((w_ih, w_hh, b_ih, b_hh))

    # weight packing hoisted out of the forward path (done once)
    packed = pack_params(params)

    out, h_n = multi_agent_gru(x, is_init, packed)
    out = jax.block_until_ready(out)
    h_n = jax.block_until_ready(h_n)

    ref_out, ref_hn = reference_gru(x, is_init, params)

    assert out.shape == (B, T, A, H), out.shape
    assert h_n.shape == (B, A, L, H), h_n.shape
    # Tolerance relaxed vs the f32 version: matmul operands are bf16 (f32
    # accumulation / carried state) through a 16-step recurrence.
    assert jnp.allclose(out, ref_out, atol=2e-2, rtol=2e-2), "output mismatch"
    assert jnp.allclose(h_n, ref_hn, atol=2e-2, rtol=2e-2), "h_n mismatch"

    print("KERNEL_OK")
</pallas_src>

<mosaic_0001>
module attributes {stable_mosaic.version = 11 : i64} {
  func.func @_gru_kernel(%arg0: memref<16x48xbf16, #tpu.memory_space<vmem>>, %arg1: memref<8x2x128xf32, #tpu.memory_space<vmem>>, %arg2: memref<48x512xbf16, #tpu.memory_space<vmem>>, %arg3: memref<128x512xbf16, #tpu.memory_space<vmem>>, %arg4: memref<1x512xf32, #tpu.memory_space<vmem>>, %arg5: memref<128x512xbf16, #tpu.memory_space<vmem>>, %arg6: memref<128x512xbf16, #tpu.memory_space<vmem>>, %arg7: memref<1x512xf32, #tpu.memory_space<vmem>>, %arg8: memref<8x2x128xf32, #tpu.memory_space<vmem>>, %arg9: memref<2x2x128xf32, #tpu.memory_space<vmem>>) attributes {dimension_semantics = [], scalar_prefetch = 0 : i64, scratch_operands = 0 : i64, tpu.core_type = #tpu.core_type<tc>} {
    %c0 = arith.constant 0 : index
    %c0_0 = arith.constant 0 : index
    %c0_1 = arith.constant 0 : index
    %0 = vector.load %arg1[%c0, %c0_0, %c0_1] : memref<8x2x128xf32, #tpu.memory_space<vmem>>, vector<8x2x128xf32>
    %c0_2 = arith.constant 0 : index
    %c0_3 = arith.constant 0 : index
    %1 = vector.load %arg0[%c0_2, %c0_3] : memref<16x48xbf16, #tpu.memory_space<vmem>>, vector<16x48xbf16>
    %c0_4 = arith.constant 0 : index
    %c0_5 = arith.constant 0 : index
    %2 = vector.load %arg2[%c0_4, %c0_5] : memref<48x512xbf16, #tpu.memory_space<vmem>>, vector<48x512xbf16>
    %cst = arith.constant dense<0.000000e+00> : vector<16x512xf32>
    %3 = tpu.matmul %1, %2, %cst {dimension_numbers = #tpu.dot_dimension_numbers<[1], [0], [0], [1], [0, 0, 1, 1], [], []>} : vector<16x48xbf16>, vector<48x512xbf16>, vector<16x512xf32> -> vector<16x512xf32>
    %c0_6 = arith.constant 0 : index
    %c0_7 = arith.constant 0 : index
    %4 = vector.load %arg4[%c0_6, %c0_7] : memref<1x512xf32, #tpu.memory_space<vmem>>, vector<1x512xf32>
    %5 = vector.broadcast %4 : vector<1x512xf32> to vector<16x512xf32>
    %6 = arith.addf %3, %5 : vector<16x512xf32>
    %c0_8 = arith.constant 0 : index
    %c0_9 = arith.constant 0 : index
    %7 = vector.load %arg7[%c0_8, %c0_9] : memref<1x512xf32, #tpu.memory_space<vmem>>, vector<1x512xf32>
    %8 = vector.shape_cast %7 : vector<1x512xf32> to vector<1x512xf32>
    %9 = vector.broadcast %8 : vector<1x512xf32> to vector<2x512xf32>
    %cst_10 = arith.constant 0.000000e+00 : f32
    %10 = vector.broadcast %cst_10 : f32 to vector<2x128xf32>
    %cst_11 = arith.constant 0.000000e+00 : f32
    %11 = vector.broadcast %cst_11 : f32 to vector<2x128xf32>
    %12 = vector.extract_strided_slice %0 {offsets = [0, 0, 0], sizes = [1, 2, 128], strides = [1, 1, 1]} : vector<8x2x128xf32> to vector<1x2x128xf32>
    %13 = vector.shape_cast %12 : vector<1x2x128xf32> to vector<2x128xf32>
    %14 = arith.mulf %10, %13 : vector<2x128xf32>
    %15 = vector.extract_strided_slice %6 {offsets = [0, 0], sizes = [2, 512], strides = [1, 1]} : vector<16x512xf32> to vector<2x512xf32>
    %16 = arith.truncf %14 : vector<2x128xf32> to vector<2x128xbf16>
    %c0_12 = arith.constant 0 : index
    %c0_13 = arith.constant 0 : index
    %17 = vector.load %arg3[%c0_12, %c0_13] : memref<128x512xbf16, #tpu.memory_space<vmem>>, vector<128x512xbf16>
    %cst_14 = arith.constant dense<0.000000e+00> : vector<2x512xf32>
    %18 = tpu.matmul %16, %17, %cst_14 {dimension_numbers = #tpu.dot_dimension_numbers<[1], [0], [0], [1], [0, 0, 1, 1], [], []>} : vector<2x128xbf16>, vector<128x512xbf16>, vector<2x512xf32> -> vector<2x512xf32>
    %19 = arith.addf %15, %18 : vector<2x512xf32>
    %20 = vector.extract_strided_slice %19 {offsets = [0, 0], sizes = [2, 256], strides = [1, 1]} : vector<2x512xf32> to vector<2x256xf32>
    %21 = arith.negf %20 : vector<2x256xf32>
    %22 = math.exp %21 : vector<2x256xf32>
    %cst_15 = arith.constant 1.000000e+00 : f32
    %23 = vector.broadcast %cst_15 : f32 to vector<2x256xf32>
    %24 = arith.addf %23, %22 : vector<2x256xf32>
    %25 = arith.divf %23, %24 : vector<2x256xf32>
    %26 = vector.extract_strided_slice %25 {offsets = [0, 0], sizes = [2, 128], strides = [1, 1]} : vector<2x256xf32> to vector<2x128xf32>
    %27 = vector.extract_strided_slice %25 {offsets = [0, 128], sizes = [2, 128], strides = [1, 1]} : vector<2x256xf32> to vector<2x128xf32>
    %28 = vector.extract_strided_slice %19 {offsets = [0, 256], sizes = [2, 128], strides = [1, 1]} : vector<2x512xf32> to vector<2x128xf32>
    %29 = vector.extract_strided_slice %19 {offsets = [0, 384], sizes = [2, 128], strides = [1, 1]} : vector<2x512xf32> to vector<2x128xf32>
    %30 = arith.mulf %26, %29 : vector<2x128xf32>
    %31 = arith.addf %28, %30 : vector<2x128xf32>
    %32 = math.tanh %31 : vector<2x128xf32>
    %33 = arith.subf %14, %32 : vector<2x128xf32>
    %34 = arith.mulf %27, %33 : vector<2x128xf32>
    %35 = arith.addf %32, %34 : vector<2x128xf32>
    %36 = arith.mulf %11, %13 : vector<2x128xf32>
    %37 = arith.truncf %35 : vector<2x128xf32> to vector<2x128xbf16>
    %c0_16 = arith.constant 0 : index
    %c0_17 = arith.constant 0 : index
    %38 = vector.load %arg5[%c0_16, %c0_17] : memref<128x512xbf16, #tpu.memory_space<vmem>>, vector<128x512xbf16>
    %cst_18 = arith.constant dense<0.000000e+00> : vector<2x512xf32>
    %39 = tpu.matmul %37, %38, %cst_18 {dimension_numbers = #tpu.dot_dimension_numbers<[1], [0], [0], [1], [0, 0, 1, 1], [], []>} : vector<2x128xbf16>, vector<128x512xbf16>, vector<2x512xf32> -> vector<2x512xf32>
    %40 = arith.truncf %36 : vector<2x128xf32> to vector<2x128xbf16>
    %c0_19 = arith.constant 0 : index
    %c0_20 = arith.constant 0 : index
    %41 = vector.load %arg6[%c0_19, %c0_20] : memref<128x512xbf16, #tpu.memory_space<vmem>>, vector<128x512xbf16>
    %cst_21 = arith.constant dense<0.000000e+00> : vector<2x512xf32>
    %42 = tpu.matmul %40, %41, %cst_21 {dimension_numbers = #tpu.dot_dimension_numbers<[1], [0], [0], [1], [0, 0, 1, 1], [], []>} : vector<2x128xbf16>, vector<128x512xbf16>, vector<2x512xf32> -> vector<2x512xf32>
    %43 = arith.addf %39, %42 : vector<2x512xf32>
    %44 = arith.addf %43, %9 : vector<2x512xf32>
    %45 = vector.extract_strided_slice %44 {offsets = [0, 0], sizes = [2, 256], strides = [1, 1]} : vector<2x512xf32> to vector<2x256xf32>
    %46 = arith.negf %45 : vector<2x256xf32>
    %47 = math.exp %46 : vector<2x256xf32>
    %cst_22 = arith.constant 1.000000e+00 : f32
    %48 = vector.broadcast %cst_22 : f32 to vector<2x256xf32>
    %49 = arith.addf %48, %47 : vector<2x256xf32>
    %50 = arith.divf %48, %49 : vector<2x256xf32>
    %51 = vector.extract_strided_slice %50 {offsets = [0, 0], sizes = [2, 128], strides = [1, 1]} : vector<2x256xf32> to vector<2x128xf32>
    %52 = vector.extract_strided_slice %50 {offsets = [0, 128], sizes = [2, 128], strides = [1, 1]} : vector<2x256xf32> to vector<2x128xf32>
    %53 = vector.extract_strided_slice %44 {offsets = [0, 256], sizes = [2, 128], strides = [1, 1]} : vector<2x512xf32> to vector<2x128xf32>
    %54 = vector.extract_strided_slice %44 {offsets = [0, 384], sizes = [2, 128], strides = [1, 1]} : vector<2x512xf32> to vector<2x128xf32>
    %55 = arith.mulf %51, %54 : vector<2x128xf32>
    %56 = arith.addf %53, %55 : vector<2x128xf32>
    %57 = math.tanh %56 : vector<2x128xf32>
    %58 = arith.subf %36, %57 : vector<2x128xf32>
    %59 = arith.mulf %52, %58 : vector<2x128xf32>
    %60 = arith.addf %57, %59 : vector<2x128xf32>
    %c0_23 = arith.constant 0 : index
    %c0_24 = arith.constant 0 : index
    %c0_25 = arith.constant 0 : index
    %61 = vector.load %arg8[%c0_23, %c0_24, %c0_25] : memref<8x2x128xf32, #tpu.memory_space<vmem>>, vector<1x2x128xf32>
    %62 = vector.shape_cast %61 : vector<1x2x128xf32> to vector<2x128xf32>
    %63 = vector.shape_cast %60 : vector<2x128xf32> to vector<1x2x128xf32>
    tpu.vector_store %arg8[%c0_23, %c0_24, %c0_25], %63 {strides = array<i32>} : memref<8x2x128xf32, #tpu.memory_space<vmem>>, vector<1x2x128xf32>,
    %64 = vector.extract_strided_slice %0 {offsets = [1, 0, 0], sizes = [1, 2, 128], strides = [1, 1, 1]} : vector<8x2x128xf32> to vector<1x2x128xf32>
    %65 = vector.shape_cast %64 : vector<1x2x128xf32> to vector<2x128xf32>
    %66 = arith.mulf %35, %65 : vector<2x128xf32>
    %67 = vector.extract_strided_slice %6 {offsets = [2, 0], sizes = [2, 512], strides = [1, 1]} : vector<16x512xf32> to vector<2x512xf32>
    %68 = arith.truncf %66 : vector<2x128xf32> to vector<2x128xbf16>
    %c0_26 = arith.constant 0 : index
    %c0_27 = arith.constant 0 : index
    %69 = vector.load %arg3[%c0_26, %c0_27] : memref<128x512xbf16, #tpu.memory_space<vmem>>, vector<128x512xbf16>
    %cst_28 = arith.constant dense<0.000000e+00> : vector<2x512xf32>
    %70 = tpu.matmul %68, %69, %cst_28 {dimension_numbers = #tpu.dot_dimension_numbers<[1], [0], [0], [1], [0, 0, 1, 1], [], []>} : vector<2x128xbf16>, vector<128x512xbf16>, vector<2x512xf32> -> vector<2x512xf32>
    %71 = arith.addf %67, %70 : vector<2x512xf32>
    %72 = vector.extract_strided_slice %71 {offsets = [0, 0], sizes = [2, 256], strides = [1, 1]} : vector<2x512xf32> to vector<2x256xf32>
    %73 = arith.negf %72 : vector<2x256xf32>
    %74 = math.exp %73 : vector<2x256xf32>
    %cst_29 = arith.constant 1.000000e+00 : f32
    %75 = vector.broadcast %cst_29 : f32 to vector<2x256xf32>
    %76 = arith.addf %75, %74 : vector<2x256xf32>
    %77 = arith.divf %75, %76 : vector<2x256xf32>
    %78 = vector.extract_strided_slice %77 {offsets = [0, 0], sizes = [2, 128], strides = [1, 1]} : vector<2x256xf32> to vector<2x128xf32>
    %79 = vector.extract_strided_slice %77 {offsets = [0, 128], sizes = [2, 128], strides = [1, 1]} : vector<2x256xf32> to vector<2x128xf32>
    %80 = vector.extract_strided_slice %71 {offsets = [0, 256], sizes = [2, 128], strides = [1, 1]} : vector<2x512xf32> to vector<2x128xf32>
    %81 = vector.extract_strided_slice %71 {offsets = [0, 384], sizes = [2, 128], strides = [1, 1]} : vector<2x512xf32> to vector<2x128xf32>
    %82 = arith.mulf %78, %81 : vector<2x128xf32>
    %83 = arith.addf %80, %82 : vector<2x128xf32>
    %84 = math.tanh %83 : vector<2x128xf32>
    %85 = arith.subf %66, %84 : vector<2x128xf32>
    %86 = arith.mulf %79, %85 : vector<2x128xf32>
    %87 = arith.addf %84, %86 : vector<2x128xf32>
    %88 = arith.mulf %60, %65 : vector<2x128xf32>
    %89 = arith.truncf %87 : vector<2x128xf32> to vector<2x128xbf16>
    %c0_30 = arith.constant 0 : index
    %c0_31 = arith.constant 0 : index
    %90 = vector.load %arg5[%c0_30, %c0_31] : memref<128x512xbf16, #tpu.memory_space<vmem>>, vector<128x512xbf16>
    %cst_32 = arith.constant dense<0.000000e+00> : vector<2x512xf32>
    %91 = tpu.matmul %89, %90, %cst_32 {dimension_numbers = #tpu.dot_dimension_numbers<[1], [0], [0], [1], [0, 0, 1, 1], [], []>} : vector<2x128xbf16>, vector<128x512xbf16>, vector<2x512xf32> -> vector<2x512xf32>
    %92 = arith.truncf %88 : vector<2x128xf32> to vector<2x128xbf16>
    %c0_33 = arith.constant 0 : index
    %c0_34 = arith.constant 0 : index
    %93 = vector.load %arg6[%c0_33, %c0_34] : memref<128x512xbf16, #tpu.memory_space<vmem>>, vector<128x512xbf16>
    %cst_35 = arith.constant dense<0.000000e+00> : vector<2x512xf32>
    %94 = tpu.matmul %92, %93, %cst_35 {dimension_numbers = #tpu.dot_dimension_numbers<[1], [0], [0], [1], [0, 0, 1, 1], [], []>} : vector<2x128xbf16>, vector<128x512xbf16>, vector<2x512xf32> -> vector<2x512xf32>
    %95 = arith.addf %91, %94 : vector<2x512xf32>
    %96 = arith.addf %95, %9 : vector<2x512xf32>
    %97 = vector.extract_strided_slice %96 {offsets = [0, 0], sizes = [2, 256], strides = [1, 1]} : vector<2x512xf32> to vector<2x256xf32>
    %98 = arith.negf %97 : vector<2x256xf32>
    %99 = math.exp %98 : vector<2x256xf32>
    %cst_36 = arith.constant 1.000000e+00 : f32
    %100 = vector.broadcast %cst_36 : f32 to vector<2x256xf32>
    %101 = arith.addf %100, %99 : vector<2x256xf32>
    %102 = arith.divf %100, %101 : vector<2x256xf32>
    %103 = vector.extract_strided_slice %102 {offsets = [0, 0], sizes = [2, 128], strides = [1, 1]} : vector<2x256xf32> to vector<2x128xf32>
    %104 = vector.extract_strided_slice %102 {offsets = [0, 128], sizes = [2, 128], strides = [1, 1]} : vector<2x256xf32> to vector<2x128xf32>
    %105 = vector.extract_strided_slice %96 {offsets = [0, 256], sizes = [2, 128], strides = [1, 1]} : vector<2x512xf32> to vector<2x128xf32>
    %106 = vector.extract_strided_slice %96 {offsets = [0, 384], sizes = [2, 128], strides = [1, 1]} : vector<2x512xf32> to vector<2x128xf32>
    %107 = arith.mulf %103, %106 : vector<2x128xf32>
    %108 = arith.addf %105, %107 : vector<2x128xf32>
    %109 = math.tanh %108 : vector<2x128xf32>
    %110 = arith.subf %88, %109 : vector<2x128xf32>
    %111 = arith.mulf %104, %110 : vector<2x128xf32>
    %112 = arith.addf %109, %111 : vector<2x128xf32>
    %c1 = arith.constant 1 : index
    %c0_37 = arith.constant 0 : index
    %c0_38 = arith.constant 0 : index
    %113 = vector.load %arg8[%c1, %c0_37, %c0_38] : memref<8x2x128xf32, #tpu.memory_space<vmem>>, vector<1x2x128xf32>
    %114 = vector.shape_cast %113 : vector<1x2x128xf32> to vector<2x128xf32>
    %115 = vector.shape_cast %112 : vector<2x128xf32> to vector<1x2x128xf32>
    tpu.vector_store %arg8[%c1, %c0_37, %c0_38], %115 {strides = array<i32>} : memref<8x2x128xf32, #tpu.memory_space<vmem>>, vector<1x2x128xf32>,
    %116 = vector.extract_strided_slice %0 {offsets = [2, 0, 0], sizes = [1, 2, 128], strides = [1, 1, 1]} : vector<8x2x128xf32> to vector<1x2x128xf32>
    %117 = vector.shape_cast %116 : vector<1x2x128xf32> to vector<2x128xf32>
    %118 = arith.mulf %87, %117 : vector<2x128xf32>
    %119 = vector.extract_strided_slice %6 {offsets = [4, 0], sizes = [2, 512], strides = [1, 1]} : vector<16x512xf32> to vector<2x512xf32>
    %120 = arith.truncf %118 : vector<2x128xf32> to vector<2x128xbf16>
    %c0_39 = arith.constant 0 : index
    %c0_40 = arith.constant 0 : index
    %121 = vector.load %arg3[%c0_39, %c0_40] : memref<128x512xbf16, #tpu.memory_space<vmem>>, vector<128x512xbf16>
    %cst_41 = arith.constant dense<0.000000e+00> : vector<2x512xf32>
    %122 = tpu.matmul %120, %121, %cst_41 {dimension_numbers = #tpu.dot_dimension_numbers<[1], [0], [0], [1], [0, 0, 1, 1], [], []>} : vector<2x128xbf16>, vector<128x512xbf16>, vector<2x512xf32> -> vector<2x512xf32>
    %123 = arith.addf %119, %122 : vector<2x512xf32>
    %124 = vector.extract_strided_slice %123 {offsets = [0, 0], sizes = [2, 256], strides = [1, 1]} : vector<2x512xf32> to vector<2x256xf32>
    %125 = arith.negf %124 : vector<2x256xf32>
    %126 = math.exp %125 : vector<2x256xf32>
    %cst_42 = arith.constant 1.000000e+00 : f32
    %127 = vector.broadcast %cst_42 : f32 to vector<2x256xf32>
    %128 = arith.addf %127, %126 : vector<2x256xf32>
    %129 = arith.divf %127, %128 : vector<2x256xf32>
    %130 = vector.extract_strided_slice %129 {offsets = [0, 0], sizes = [2, 128], strides = [1, 1]} : vector<2x256xf32> to vector<2x128xf32>
    %131 = vector.extract_strided_slice %129 {offsets = [0, 128], sizes = [2, 128], strides = [1, 1]} : vector<2x256xf32> to vector<2x128xf32>
    %132 = vector.extract_strided_slice %123 {offsets = [0, 256], sizes = [2, 128], strides = [1, 1]} : vector<2x512xf32> to vector<2x128xf32>
    %133 = vector.extract_strided_slice %123 {offsets = [0, 384], sizes = [2, 128], strides = [1, 1]} : vector<2x512xf32> to vector<2x128xf32>
    %134 = arith.mulf %130, %133 : vector<2x128xf32>
    %135 = arith.addf %132, %134 : vector<2x128xf32>
    %136 = math.tanh %135 : vector<2x128xf32>
    %137 = arith.subf %118, %136 : vector<2x128xf32>
    %138 = arith.mulf %131, %137 : vector<2x128xf32>
    %139 = arith.addf %136, %138 : vector<2x128xf32>
    %140 = arith.mulf %112, %117 : vector<2x128xf32>
    %141 = arith.truncf %139 : vector<2x128xf32> to vector<2x128xbf16>
    %c0_43 = arith.constant 0 : index
    %c0_44 = arith.constant 0 : index
    %142 = vector.load %arg5[%c0_43, %c0_44] : memref<128x512xbf16, #tpu.memory_space<vmem>>, vector<128x512xbf16>
    %cst_45 = arith.constant dense<0.000000e+00> : vector<2x512xf32>
    %143 = tpu.matmul %141, %142, %cst_45 {dimension_numbers = #tpu.dot_dimension_numbers<[1], [0], [0], [1], [0, 0, 1, 1], [], []>} : vector<2x128xbf16>, vector<128x512xbf16>, vector<2x512xf32> -> vector<2x512xf32>
    %144 = arith.truncf %140 : vector<2x128xf32> to vector<2x128xbf16>
    %c0_46 = arith.constant 0 : index
    %c0_47 = arith.constant 0 : index
    %145 = vector.load %arg6[%c0_46, %c0_47] : memref<128x512xbf16, #tpu.memory_space<vmem>>, vector<128x512xbf16>
    %cst_48 = arith.constant dense<0.000000e+00> : vector<2x512xf32>
    %146 = tpu.matmul %144, %145, %cst_48 {dimension_numbers = #tpu.dot_dimension_numbers<[1], [0], [0], [1], [0, 0, 1, 1], [], []>} : vector<2x128xbf16>, vector<128x512xbf16>, vector<2x512xf32> -> vector<2x512xf32>
    %147 = arith.addf %143, %146 : vector<2x512xf32>
    %148 = arith.addf %147, %9 : vector<2x512xf32>
    %149 = vector.extract_strided_slice %148 {offsets = [0, 0], sizes = [2, 256], strides = [1, 1]} : vector<2x512xf32> to vector<2x256xf32>
    %150 = arith.negf %149 : vector<2x256xf32>
    %151 = math.exp %150 : vector<2x256xf32>
    %cst_49 = arith.constant 1.000000e+00 : f32
    %152 = vector.broadcast %cst_49 : f32 to vector<2x256xf32>
    %153 = arith.addf %152, %151 : vector<2x256xf32>
    %154 = arith.divf %152, %153 : vector<2x256xf32>
    %155 = vector.extract_strided_slice %154 {offsets = [0, 0], sizes = [2, 128], strides = [1, 1]} : vector<2x256xf32> to vector<2x128xf32>
    %156 = vector.extract_strided_slice %154 {offsets = [0, 128], sizes = [2, 128], strides = [1, 1]} : vector<2x256xf32> to vector<2x128xf32>
    %157 = vector.extract_strided_slice %148 {offsets = [0, 256], sizes = [2, 128], strides = [1, 1]} : vector<2x512xf32> to vector<2x128xf32>
    %158 = vector.extract_strided_slice %148 {offsets = [0, 384], sizes = [2, 128], strides = [1, 1]} : vector<2x512xf32> to vector<2x128xf32>
    %159 = arith.mulf %155, %158 : vector<2x128xf32>
    %160 = arith.addf %157, %159 : vector<2x128xf32>
    %161 = math.tanh %160 : vector<2x128xf32>
    %162 = arith.subf %140, %161 : vector<2x128xf32>
    %163 = arith.mulf %156, %162 : vector<2x128xf32>
    %164 = arith.addf %161, %163 : vector<2x128xf32>
    %c2 = arith.constant 2 : index
    %c0_50 = arith.constant 0 : index
    %c0_51 = arith.constant 0 : index
    %165 = vector.load %arg8[%c2, %c0_50, %c0_51] : memref<8x2x128xf32, #tpu.memory_space<vmem>>, vector<1x2x128xf32>
    %166 = vector.shape_cast %165 : vector<1x2x128xf32> to vector<2x128xf32>
    %167 = vector.shape_cast %164 : vector<2x128xf32> to vector<1x2x128xf32>
    tpu.vector_store %arg8[%c2, %c0_50, %c0_51], %167 {strides = array<i32>} : memref<8x2x128xf32, #tpu.memory_space<vmem>>, vector<1x2x128xf32>,
    %168 = vector.extract_strided_slice %0 {offsets = [3, 0, 0], sizes = [1, 2, 128], strides = [1, 1, 1]} : vector<8x2x128xf32> to vector<1x2x128xf32>
    %169 = vector.shape_cast %168 : vector<1x2x128xf32> to vector<2x128xf32>
    %170 = arith.mulf %139, %169 : vector<2x128xf32>
    %171 = vector.extract_strided_slice %6 {offsets = [6, 0], sizes = [2, 512], strides = [1, 1]} : vector<16x512xf32> to vector<2x512xf32>
    %172 = arith.truncf %170 : vector<2x128xf32> to vector<2x128xbf16>
    %c0_52 = arith.constant 0 : index
    %c0_53 = arith.constant 0 : index
    %173 = vector.load %arg3[%c0_52, %c0_53] : memref<128x512xbf16, #tpu.memory_space<vmem>>, vector<128x512xbf16>
    %cst_54 = arith.constant dense<0.000000e+00> : vector<2x512xf32>
    %174 = tpu.matmul %172, %173, %cst_54 {dimension_numbers = #tpu.dot_dimension_numbers<[1], [0], [0], [1], [0, 0, 1, 1], [], []>} : vector<2x128xbf16>, vector<128x512xbf16>, vector<2x512xf32> -> vector<2x512xf32>
    %175 = arith.addf %171, %174 : vector<2x512xf32>
    %176 = vector.extract_strided_slice %175 {offsets = [0, 0], sizes = [2, 256], strides = [1, 1]} : vector<2x512xf32> to vector<2x256xf32>
    %177 = arith.negf %176 : vector<2x256xf32>
    %178 = math.exp %177 : vector<2x256xf32>
    %cst_55 = arith.constant 1.000000e+00 : f32
    %179 = vector.broadcast %cst_55 : f32 to vector<2x256xf32>
    %180 = arith.addf %179, %178 : vector<2x256xf32>
    %181 = arith.divf %179, %180 : vector<2x256xf32>
    %182 = vector.extract_strided_slice %181 {offsets = [0, 0], sizes = [2, 128], strides = [1, 1]} : vector<2x256xf32> to vector<2x128xf32>
    %183 = vector.extract_strided_slice %181 {offsets = [0, 128], sizes = [2, 128], strides = [1, 1]} : vector<2x256xf32> to vector<2x128xf32>
    %184 = vector.extract_strided_slice %175 {offsets = [0, 256], sizes = [2, 128], strides = [1, 1]} : vector<2x512xf32> to vector<2x128xf32>
    %185 = vector.extract_strided_slice %175 {offsets = [0, 384], sizes = [2, 128], strides = [1, 1]} : vector<2x512xf32> to vector<2x128xf32>
    %186 = arith.mulf %182, %185 : vector<2x128xf32>
    %187 = arith.addf %184, %186 : vector<2x128xf32>
    %188 = math.tanh %187 : vector<2x128xf32>
    %189 = arith.subf %170, %188 : vector<2x128xf32>
    %190 = arith.mulf %183, %189 : vector<2x128xf32>
    %191 = arith.addf %188, %190 : vector<2x128xf32>
    %192 = arith.mulf %164, %169 : vector<2x128xf32>
    %193 = arith.truncf %191 : vector<2x128xf32> to vector<2x128xbf16>
    %c0_56 = arith.constant 0 : index
    %c0_57 = arith.constant 0 : index
    %194 = vector.load %arg5[%c0_56, %c0_57] : memref<128x512xbf16, #tpu.memory_space<vmem>>, vector<128x512xbf16>
    %cst_58 = arith.constant dense<0.000000e+00> : vector<2x512xf32>
    %195 = tpu.matmul %193, %194, %cst_58 {dimension_numbers = #tpu.dot_dimension_numbers<[1], [0], [0], [1], [0, 0, 1, 1], [], []>} : vector<2x128xbf16>, vector<128x512xbf16>, vector<2x512xf32> -> vector<2x512xf32>
    %196 = arith.truncf %192 : vector<2x128xf32> to vector<2x128xbf16>
    %c0_59 = arith.constant 0 : index
    %c0_60 = arith.constant 0 : index
    %197 = vector.load %arg6[%c0_59, %c0_60] : memref<128x512xbf16, #tpu.memory_space<vmem>>, vector<128x512xbf16>
    %cst_61 = arith.constant dense<0.000000e+00> : vector<2x512xf32>
    %198 = tpu.matmul %196, %197, %cst_61 {dimension_numbers = #tpu.dot_dimension_numbers<[1], [0], [0], [1], [0, 0, 1, 1], [], []>} : vector<2x128xbf16>, vector<128x512xbf16>, vector<2x512xf32> -> vector<2x512xf32>
    %199 = arith.addf %195, %198 : vector<2x512xf32>
    %200 = arith.addf %199, %9 : vector<2x512xf32>
    %201 = vector.extract_strided_slice %200 {offsets = [0, 0], sizes = [2, 256], strides = [1, 1]} : vector<2x512xf32> to vector<2x256xf32>
    %202 = arith.negf %201 : vector<2x256xf32>
    %203 = math.exp %202 : vector<2x256xf32>
    %cst_62 = arith.constant 1.000000e+00 : f32
    %204 = vector.broadcast %cst_62 : f32 to vector<2x256xf32>
    %205 = arith.addf %204, %203 : vector<2x256xf32>
    %206 = arith.divf %204, %205 : vector<2x256xf32>
    %207 = vector.extract_strided_slice %206 {offsets = [0, 0], sizes = [2, 128], strides = [1, 1]} : vector<2x256xf32> to vector<2x128xf32>
    %208 = vector.extract_strided_slice %206 {offsets = [0, 128], sizes = [2, 128], strides = [1, 1]} : vector<2x256xf32> to vector<2x128xf32>
    %209 = vector.extract_strided_slice %200 {offsets = [0, 256], sizes = [2, 128], strides = [1, 1]} : vector<2x512xf32> to vector<2x128xf32>
    %210 = vector.extract_strided_slice %200 {offsets = [0, 384], sizes = [2, 128], strides = [1, 1]} : vector<2x512xf32> to vector<2x128xf32>
    %211 = arith.mulf %207, %210 : vector<2x128xf32>
    %212 = arith.addf %209, %211 : vector<2x128xf32>
    %213 = math.tanh %212 : vector<2x128xf32>
    %214 = arith.subf %192, %213 : vector<2x128xf32>
    %215 = arith.mulf %208, %214 : vector<2x128xf32>
    %216 = arith.addf %213, %215 : vector<2x128xf32>
    %c3 = arith.constant 3 : index
    %c0_63 = arith.constant 0 : index
    %c0_64 = arith.constant 0 : index
    %217 = vector.load %arg8[%c3, %c0_63, %c0_64] : memref<8x2x128xf32, #tpu.memory_space<vmem>>, vector<1x2x128xf32>
    %218 = vector.shape_cast %217 : vector<1x2x128xf32> to vector<2x128xf32>
    %219 = vector.shape_cast %216 : vector<2x128xf32> to vector<1x2x128xf32>
    tpu.vector_store %arg8[%c3, %c0_63, %c0_64], %219 {strides = array<i32>} : memref<8x2x128xf32, #tpu.memory_space<vmem>>, vector<1x2x128xf32>,
    %220 = vector.extract_strided_slice %0 {offsets = [4, 0, 0], sizes = [1, 2, 128], strides = [1, 1, 1]} : vector<8x2x128xf32> to vector<1x2x128xf32>
    %221 = vector.shape_cast %220 : vector<1x2x128xf32> to vector<2x128xf32>
    %222 = arith.mulf %191, %221 : vector<2x128xf32>
    %223 = vector.extract_strided_slice %6 {offsets = [8, 0], sizes = [2, 512], strides = [1, 1]} : vector<16x512xf32> to vector<2x512xf32>
    %224 = arith.truncf %222 : vector<2x128xf32> to vector<2x128xbf16>
    %c0_65 = arith.constant 0 : index
    %c0_66 = arith.constant 0 : index
    %225 = vector.load %arg3[%c0_65, %c0_66] : memref<128x512xbf16, #tpu.memory_space<vmem>>, vector<128x512xbf16>
    %cst_67 = arith.constant dense<0.000000e+00> : vector<2x512xf32>
    %226 = tpu.matmul %224, %225, %cst_67 {dimension_numbers = #tpu.dot_dimension_numbers<[1], [0], [0], [1], [0, 0, 1, 1], [], []>} : vector<2x128xbf16>, vector<128x512xbf16>, vector<2x512xf32> -> vector<2x512xf32>
    %227 = arith.addf %223, %226 : vector<2x512xf32>
    %228 = vector.extract_strided_slice %227 {offsets = [0, 0], sizes = [2, 256], strides = [1, 1]} : vector<2x512xf32> to vector<2x256xf32>
    %229 = arith.negf %228 : vector<2x256xf32>
    %230 = math.exp %229 : vector<2x256xf32>
    %cst_68 = arith.constant 1.000000e+00 : f32
    %231 = vector.broadcast %cst_68 : f32 to vector<2x256xf32>
    %232 = arith.addf %231, %230 : vector<2x256xf32>
    %233 = arith.divf %231, %232 : vector<2x256xf32>
    %234 = vector.extract_strided_slice %233 {offsets = [0, 0], sizes = [2, 128], strides = [1, 1]} : vector<2x256xf32> to vector<2x128xf32>
    %235 = vector.extract_strided_slice %233 {offsets = [0, 128], sizes = [2, 128], strides = [1, 1]} : vector<2x256xf32> to vector<2x128xf32>
    %236 = vector.extract_strided_slice %227 {offsets = [0, 256], sizes = [2, 128], strides = [1, 1]} : vector<2x512xf32> to vector<2x128xf32>
    %237 = vector.extract_strided_slice %227 {offsets = [0, 384], sizes = [2, 128], strides = [1, 1]} : vector<2x512xf32> to vector<2x128xf32>
    %238 = arith.mulf %234, %237 : vector<2x128xf32>
    %239 = arith.addf %236, %238 : vector<2x128xf32>
    %240 = math.tanh %239 : vector<2x128xf32>
    %241 = arith.subf %222, %240 : vector<2x128xf32>
    %242 = arith.mulf %235, %241 : vector<2x128xf32>
    %243 = arith.addf %240, %242 : vector<2x128xf32>
    %244 = arith.mulf %216, %221 : vector<2x128xf32>
    %245 = arith.truncf %243 : vector<2x128xf32> to vector<2x128xbf16>
    %c0_69 = arith.constant 0 : index
    %c0_70 = arith.constant 0 : index
    %246 = vector.load %arg5[%c0_69, %c0_70] : memref<128x512xbf16, #tpu.memory_space<vmem>>, vector<128x512xbf16>
    %cst_71 = arith.constant dense<0.000000e+00> : vector<2x512xf32>
    %247 = tpu.matmul %245, %246, %cst_71 {dimension_numbers = #tpu.dot_dimension_numbers<[1], [0], [0], [1], [0, 0, 1, 1], [], []>} : vector<2x128xbf16>, vector<128x512xbf16>, vector<2x512xf32> -> vector<2x512xf32>
    %248 = arith.truncf %244 : vector<2x128xf32> to vector<2x128xbf16>
    %c0_72 = arith.constant 0 : index
    %c0_73 = arith.constant 0 : index
    %249 = vector.load %arg6[%c0_72, %c0_73] : memref<128x512xbf16, #tpu.memory_space<vmem>>, vector<128x512xbf16>
    %cst_74 = arith.constant dense<0.000000e+00> : vector<2x512xf32>
    %250 = tpu.matmul %248, %249, %cst_74 {dimension_numbers = #tpu.dot_dimension_numbers<[1], [0], [0], [1], [0, 0, 1, 1], [], []>} : vector<2x128xbf16>, vector<128x512xbf16>, vector<2x512xf32> -> vector<2x512xf32>
    %251 = arith.addf %247, %250 : vector<2x512xf32>
    %252 = arith.addf %251, %9 : vector<2x512xf32>
    %253 = vector.extract_strided_slice %252 {offsets = [0, 0], sizes = [2, 256], strides = [1, 1]} : vector<2x512xf32> to vector<2x256xf32>
    %254 = arith.negf %253 : vector<2x256xf32>
    %255 = math.exp %254 : vector<2x256xf32>
    %cst_75 = arith.constant 1.000000e+00 : f32
    %256 = vector.broadcast %cst_75 : f32 to vector<2x256xf32>
    %257 = arith.addf %256, %255 : vector<2x256xf32>
    %258 = arith.divf %256, %257 : vector<2x256xf32>
    %259 = vector.extract_strided_slice %258 {offsets = [0, 0], sizes = [2, 128], strides = [1, 1]} : vector<2x256xf32> to vector<2x128xf32>
    %260 = vector.extract_strided_slice %258 {offsets = [0, 128], sizes = [2, 128], strides = [1, 1]} : vector<2x256xf32> to vector<2x128xf32>
    %261 = vector.extract_strided_slice %252 {offsets = [0, 256], sizes = [2, 128], strides = [1, 1]} : vector<2x512xf32> to vector<2x128xf32>
    %262 = vector.extract_strided_slice %252 {offsets = [0, 384], sizes = [2, 128], strides = [1, 1]} : vector<2x512xf32> to vector<2x128xf32>
    %263 = arith.mulf %259, %262 : vector<2x128xf32>
    %264 = arith.addf %261, %263 : vector<2x128xf32>
    %265 = math.tanh %264 : vector<2x128xf32>
    %266 = arith.subf %244, %265 : vector<2x128xf32>
    %267 = arith.mulf %260, %266 : vector<2x128xf32>
    %268 = arith.addf %265, %267 : vector<2x128xf32>
    %c4 = arith.constant 4 : index
    %c0_76 = arith.constant 0 : index
    %c0_77 = arith.constant 0 : index
    %269 = vector.load %arg8[%c4, %c0_76, %c0_77] : memref<8x2x128xf32, #tpu.memory_space<vmem>>, vector<1x2x128xf32>
    %270 = vector.shape_cast %269 : vector<1x2x128xf32> to vector<2x128xf32>
    %271 = vector.shape_cast %268 : vector<2x128xf32> to vector<1x2x128xf32>
    tpu.vector_store %arg8[%c4, %c0_76, %c0_77], %271 {strides = array<i32>} : memref<8x2x128xf32, #tpu.memory_space<vmem>>, vector<1x2x128xf32>,
    %272 = vector.extract_strided_slice %0 {offsets = [5, 0, 0], sizes = [1, 2, 128], strides = [1, 1, 1]} : vector<8x2x128xf32> to vector<1x2x128xf32>
    %273 = vector.shape_cast %272 : vector<1x2x128xf32> to vector<2x128xf32>
    %274 = arith.mulf %243, %273 : vector<2x128xf32>
    %275 = vector.extract_strided_slice %6 {offsets = [10, 0], sizes = [2, 512], strides = [1, 1]} : vector<16x512xf32> to vector<2x512xf32>
    %276 = arith.truncf %274 : vector<2x128xf32> to vector<2x128xbf16>
    %c0_78 = arith.constant 0 : index
    %c0_79 = arith.constant 0 : index
    %277 = vector.load %arg3[%c0_78, %c0_79] : memref<128x512xbf16, #tpu.memory_space<vmem>>, vector<128x512xbf16>
    %cst_80 = arith.constant dense<0.000000e+00> : vector<2x512xf32>
    %278 = tpu.matmul %276, %277, %cst_80 {dimension_numbers = #tpu.dot_dimension_numbers<[1], [0], [0], [1], [0, 0, 1, 1], [], []>} : vector<2x128xbf16>, vector<128x512xbf16>, vector<2x512xf32> -> vector<2x512xf32>
    %279 = arith.addf %275, %278 : vector<2x512xf32>
    %280 = vector.extract_strided_slice %279 {offsets = [0, 0], sizes = [2, 256], strides = [1, 1]} : vector<2x512xf32> to vector<2x256xf32>
    %281 = arith.negf %280 : vector<2x256xf32>
    %282 = math.exp %281 : vector<2x256xf32>
    %cst_81 = arith.constant 1.000000e+00 : f32
    %283 = vector.broadcast %cst_81 : f32 to vector<2x256xf32>
    %284 = arith.addf %283, %282 : vector<2x256xf32>
    %285 = arith.divf %283, %284 : vector<2x256xf32>
    %286 = vector.extract_strided_slice %285 {offsets = [0, 0], sizes = [2, 128], strides = [1, 1]} : vector<2x256xf32> to vector<2x128xf32>
    %287 = vector.extract_strided_slice %285 {offsets = [0, 128], sizes = [2, 128], strides = [1, 1]} : vector<2x256xf32> to vector<2x128xf32>
    %288 = vector.extract_strided_slice %279 {offsets = [0, 256], sizes = [2, 128], strides = [1, 1]} : vector<2x512xf32> to vector<2x128xf32>
    %289 = vector.extract_strided_slice %279 {offsets = [0, 384], sizes = [2, 128], strides = [1, 1]} : vector<2x512xf32> to vector<2x128xf32>
    %290 = arith.mulf %286, %289 : vector<2x128xf32>
    %291 = arith.addf %288, %290 : vector<2x128xf32>
    %292 = math.tanh %291 : vector<2x128xf32>
    %293 = arith.subf %274, %292 : vector<2x128xf32>
    %294 = arith.mulf %287, %293 : vector<2x128xf32>
    %295 = arith.addf %292, %294 : vector<2x128xf32>
    %296 = arith.mulf %268, %273 : vector<2x128xf32>
    %297 = arith.truncf %295 : vector<2x128xf32> to vector<2x128xbf16>
    %c0_82 = arith.constant 0 : index
    %c0_83 = arith.constant 0 : index
    %298 = vector.load %arg5[%c0_82, %c0_83] : memref<128x512xbf16, #tpu.memory_space<vmem>>, vector<128x512xbf16>
    %cst_84 = arith.constant dense<0.000000e+00> : vector<2x512xf32>
    %299 = tpu.matmul %297, %298, %cst_84 {dimension_numbers = #tpu.dot_dimension_numbers<[1], [0], [0], [1], [0, 0, 1, 1], [], []>} : vector<2x128xbf16>, vector<128x512xbf16>, vector<2x512xf32> -> vector<2x512xf32>
    %300 = arith.truncf %296 : vector<2x128xf32> to vector<2x128xbf16>
    %c0_85 = arith.constant 0 : index
    %c0_86 = arith.constant 0 : index
    %301 = vector.load %arg6[%c0_85, %c0_86] : memref<128x512xbf16, #tpu.memory_space<vmem>>, vector<128x512xbf16>
    %cst_87 = arith.constant dense<0.000000e+00> : vector<2x512xf32>
    %302 = tpu.matmul %300, %301, %cst_87 {dimension_numbers = #tpu.dot_dimension_numbers<[1], [0], [0], [1], [0, 0, 1, 1], [], []>} : vector<2x128xbf16>, vector<128x512xbf16>, vector<2x512xf32> -> vector<2x512xf32>
    %303 = arith.addf %299, %302 : vector<2x512xf32>
    %304 = arith.addf %303, %9 : vector<2x512xf32>
    %305 = vector.extract_strided_slice %304 {offsets = [0, 0], sizes = [2, 256], strides = [1, 1]} : vector<2x512xf32> to vector<2x256xf32>
    %306 = arith.negf %305 : vector<2x256xf32>
    %307 = math.exp %306 : vector<2x256xf32>
    %cst_88 = arith.constant 1.000000e+00 : f32
    %308 = vector.broadcast %cst_88 : f32 to vector<2x256xf32>
    %309 = arith.addf %308, %307 : vector<2x256xf32>
    %310 = arith.divf %308, %309 : vector<2x256xf32>
    %311 = vector.extract_strided_slice %310 {offsets = [0, 0], sizes = [2, 128], strides = [1, 1]} : vector<2x256xf32> to vector<2x128xf32>
    %312 = vector.extract_strided_slice %310 {offsets = [0, 128], sizes = [2, 128], strides = [1, 1]} : vector<2x256xf32> to vector<2x128xf32>
    %313 = vector.extract_strided_slice %304 {offsets = [0, 256], sizes = [2, 128], strides = [1, 1]} : vector<2x512xf32> to vector<2x128xf32>
    %314 = vector.extract_strided_slice %304 {offsets = [0, 384], sizes = [2, 128], strides = [1, 1]} : vector<2x512xf32> to vector<2x128xf32>
    %315 = arith.mulf %311, %314 : vector<2x128xf32>
    %316 = arith.addf %313, %315 : vector<2x128xf32>
    %317 = math.tanh %316 : vector<2x128xf32>
    %318 = arith.subf %296, %317 : vector<2x128xf32>
    %319 = arith.mulf %312, %318 : vector<2x128xf32>
    %320 = arith.addf %317, %319 : vector<2x128xf32>
    %c5 = arith.constant 5 : index
    %c0_89 = arith.constant 0 : index
    %c0_90 = arith.constant 0 : index
    %321 = vector.load %arg8[%c5, %c0_89, %c0_90] : memref<8x2x128xf32, #tpu.memory_space<vmem>>, vector<1x2x128xf32>
    %322 = vector.shape_cast %321 : vector<1x2x128xf32> to vector<2x128xf32>
    %323 = vector.shape_cast %320 : vector<2x128xf32> to vector<1x2x128xf32>
    tpu.vector_store %arg8[%c5, %c0_89, %c0_90], %323 {strides = array<i32>} : memref<8x2x128xf32, #tpu.memory_space<vmem>>, vector<1x2x128xf32>,
    %324 = vector.extract_strided_slice %0 {offsets = [6, 0, 0], sizes = [1, 2, 128], strides = [1, 1, 1]} : vector<8x2x128xf32> to vector<1x2x128xf32>
    %325 = vector.shape_cast %324 : vector<1x2x128xf32> to vector<2x128xf32>
    %326 = arith.mulf %295, %325 : vector<2x128xf32>
    %327 = vector.extract_strided_slice %6 {offsets = [12, 0], sizes = [2, 512], strides = [1, 1]} : vector<16x512xf32> to vector<2x512xf32>
    %328 = arith.truncf %326 : vector<2x128xf32> to vector<2x128xbf16>
    %c0_91 = arith.constant 0 : index
    %c0_92 = arith.constant 0 : index
    %329 = vector.load %arg3[%c0_91, %c0_92] : memref<128x512xbf16, #tpu.memory_space<vmem>>, vector<128x512xbf16>
    %cst_93 = arith.constant dense<0.000000e+00> : vector<2x512xf32>
    %330 = tpu.matmul %328, %329, %cst_93 {dimension_numbers = #tpu.dot_dimension_numbers<[1], [0], [0], [1], [0, 0, 1, 1], [], []>} : vector<2x128xbf16>, vector<128x512xbf16>, vector<2x512xf32> -> vector<2x512xf32>
    %331 = arith.addf %327, %330 : vector<2x512xf32>
    %332 = vector.extract_strided_slice %331 {offsets = [0, 0], sizes = [2, 256], strides = [1, 1]} : vector<2x512xf32> to vector<2x256xf32>
    %333 = arith.negf %332 : vector<2x256xf32>
    %334 = math.exp %333 : vector<2x256xf32>
    %cst_94 = arith.constant 1.000000e+00 : f32
    %335 = vector.broadcast %cst_94 : f32 to vector<2x256xf32>
    %336 = arith.addf %335, %334 : vector<2x256xf32>
    %337 = arith.divf %335, %336 : vector<2x256xf32>
    %338 = vector.extract_strided_slice %337 {offsets = [0, 0], sizes = [2, 128], strides = [1, 1]} : vector<2x256xf32> to vector<2x128xf32>
    %339 = vector.extract_strided_slice %337 {offsets = [0, 128], sizes = [2, 128], strides = [1, 1]} : vector<2x256xf32> to vector<2x128xf32>
    %340 = vector.extract_strided_slice %331 {offsets = [0, 256], sizes = [2, 128], strides = [1, 1]} : vector<2x512xf32> to vector<2x128xf32>
    %341 = vector.extract_strided_slice %331 {offsets = [0, 384], sizes = [2, 128], strides = [1, 1]} : vector<2x512xf32> to vector<2x128xf32>
    %342 = arith.mulf %338, %341 : vector<2x128xf32>
    %343 = arith.addf %340, %342 : vector<2x128xf32>
    %344 = math.tanh %343 : vector<2x128xf32>
    %345 = arith.subf %326, %344 : vector<2x128xf32>
    %346 = arith.mulf %339, %345 : vector<2x128xf32>
    %347 = arith.addf %344, %346 : vector<2x128xf32>
    %348 = arith.mulf %320, %325 : vector<2x128xf32>
    %349 = arith.truncf %347 : vector<2x128xf32> to vector<2x128xbf16>
    %c0_95 = arith.constant 0 : index
    %c0_96 = arith.constant 0 : index
    %350 = vector.load %arg5[%c0_95, %c0_96] : memref<128x512xbf16, #tpu.memory_space<vmem>>, vector<128x512xbf16>
    %cst_97 = arith.constant dense<0.000000e+00> : vector<2x512xf32>
    %351 = tpu.matmul %349, %350, %cst_97 {dimension_numbers = #tpu.dot_dimension_numbers<[1], [0], [0], [1], [0, 0, 1, 1], [], []>} : vector<2x128xbf16>, vector<128x512xbf16>, vector<2x512xf32> -> vector<2x512xf32>
    %352 = arith.truncf %348 : vector<2x128xf32> to vector<2x128xbf16>
    %c0_98 = arith.constant 0 : index
    %c0_99 = arith.constant 0 : index
    %353 = vector.load %arg6[%c0_98, %c0_99] : memref<128x512xbf16, #tpu.memory_space<vmem>>, vector<128x512xbf16>
    %cst_100 = arith.constant dense<0.000000e+00> : vector<2x512xf32>
    %354 = tpu.matmul %352, %353, %cst_100 {dimension_numbers = #tpu.dot_dimension_numbers<[1], [0], [0], [1], [0, 0, 1, 1], [], []>} : vector<2x128xbf16>, vector<128x512xbf16>, vector<2x512xf32> -> vector<2x512xf32>
    %355 = arith.addf %351, %354 : vector<2x512xf32>
    %356 = arith.addf %355, %9 : vector<2x512xf32>
    %357 = vector.extract_strided_slice %356 {offsets = [0, 0], sizes = [2, 256], strides = [1, 1]} : vector<2x512xf32> to vector<2x256xf32>
    %358 = arith.negf %357 : vector<2x256xf32>
    %359 = math.exp %358 : vector<2x256xf32>
    %cst_101 = arith.constant 1.000000e+00 : f32
    %360 = vector.broadcast %cst_101 : f32 to vector<2x256xf32>
    %361 = arith.addf %360, %359 : vector<2x256xf32>
    %362 = arith.divf %360, %361 : vector<2x256xf32>
    %363 = vector.extract_strided_slice %362 {offsets = [0, 0], sizes = [2, 128], strides = [1, 1]} : vector<2x256xf32> to vector<2x128xf32>
    %364 = vector.extract_strided_slice %362 {offsets = [0, 128], sizes = [2, 128], strides = [1, 1]} : vector<2x256xf32> to vector<2x128xf32>
    %365 = vector.extract_strided_slice %356 {offsets = [0, 256], sizes = [2, 128], strides = [1, 1]} : vector<2x512xf32> to vector<2x128xf32>
    %366 = vector.extract_strided_slice %356 {offsets = [0, 384], sizes = [2, 128], strides = [1, 1]} : vector<2x512xf32> to vector<2x128xf32>
    %367 = arith.mulf %363, %366 : vector<2x128xf32>
    %368 = arith.addf %365, %367 : vector<2x128xf32>
    %369 = math.tanh %368 : vector<2x128xf32>
    %370 = arith.subf %348, %369 : vector<2x128xf32>
    %371 = arith.mulf %364, %370 : vector<2x128xf32>
    %372 = arith.addf %369, %371 : vector<2x128xf32>
    %c6 = arith.constant 6 : index
    %c0_102 = arith.constant 0 : index
    %c0_103 = arith.constant 0 : index
    %373 = vector.load %arg8[%c6, %c0_102, %c0_103] : memref<8x2x128xf32, #tpu.memory_space<vmem>>, vector<1x2x128xf32>
    %374 = vector.shape_cast %373 : vector<1x2x128xf32> to vector<2x128xf32>
    %375 = vector.shape_cast %372 : vector<2x128xf32> to vector<1x2x128xf32>
    tpu.vector_store %arg8[%c6, %c0_102, %c0_103], %375 {strides = array<i32>} : memref<8x2x128xf32, #tpu.memory_space<vmem>>, vector<1x2x128xf32>,
    %376 = vector.extract_strided_slice %0 {offsets = [7, 0, 0], sizes = [1, 2, 128], strides = [1, 1, 1]} : vector<8x2x128xf32> to vector<1x2x128xf32>
    %377 = vector.shape_cast %376 : vector<1x2x128xf32> to vector<2x128xf32>
    %378 = arith.mulf %347, %377 : vector<2x128xf32>
    %379 = vector.extract_strided_slice %6 {offsets = [14, 0], sizes = [2, 512], strides = [1, 1]} : vector<16x512xf32> to vector<2x512xf32>
    %380 = arith.truncf %378 : vector<2x128xf32> to vector<2x128xbf16>
    %c0_104 = arith.constant 0 : index
    %c0_105 = arith.constant 0 : index
    %381 = vector.load %arg3[%c0_104, %c0_105] : memref<128x512xbf16, #tpu.memory_space<vmem>>, vector<128x512xbf16>
    %cst_106 = arith.constant dense<0.000000e+00> : vector<2x512xf32>
    %382 = tpu.matmul %380, %381, %cst_106 {dimension_numbers = #tpu.dot_dimension_numbers<[1], [0], [0], [1], [0, 0, 1, 1], [], []>} : vector<2x128xbf16>, vector<128x512xbf16>, vector<2x512xf32> -> vector<2x512xf32>
    %383 = arith.addf %379, %382 : vector<2x512xf32>
    %384 = vector.extract_strided_slice %383 {offsets = [0, 0], sizes = [2, 256], strides = [1, 1]} : vector<2x512xf32> to vector<2x256xf32>
    %385 = arith.negf %384 : vector<2x256xf32>
    %386 = math.exp %385 : vector<2x256xf32>
    %cst_107 = arith.constant 1.000000e+00 : f32
    %387 = vector.broadcast %cst_107 : f32 to vector<2x256xf32>
    %388 = arith.addf %387, %386 : vector<2x256xf32>
    %389 = arith.divf %387, %388 : vector<2x256xf32>
    %390 = vector.extract_strided_slice %389 {offsets = [0, 0], sizes = [2, 128], strides = [1, 1]} : vector<2x256xf32> to vector<2x128xf32>
    %391 = vector.extract_strided_slice %389 {offsets = [0, 128], sizes = [2, 128], strides = [1, 1]} : vector<2x256xf32> to vector<2x128xf32>
    %392 = vector.extract_strided_slice %383 {offsets = [0, 256], sizes = [2, 128], strides = [1, 1]} : vector<2x512xf32> to vector<2x128xf32>
    %393 = vector.extract_strided_slice %383 {offsets = [0, 384], sizes = [2, 128], strides = [1, 1]} : vector<2x512xf32> to vector<2x128xf32>
    %394 = arith.mulf %390, %393 : vector<2x128xf32>
    %395 = arith.addf %392, %394 : vector<2x128xf32>
    %396 = math.tanh %395 : vector<2x128xf32>
    %397 = arith.subf %378, %396 : vector<2x128xf32>
    %398 = arith.mulf %391, %397 : vector<2x128xf32>
    %399 = arith.addf %396, %398 : vector<2x128xf32>
    %400 = arith.mulf %372, %377 : vector<2x128xf32>
    %401 = arith.truncf %399 : vector<2x128xf32> to vector<2x128xbf16>
    %c0_108 = arith.constant 0 : index
    %c0_109 = arith.constant 0 : index
    %402 = vector.load %arg5[%c0_108, %c0_109] : memref<128x512xbf16, #tpu.memory_space<vmem>>, vector<128x512xbf16>
    %cst_110 = arith.constant dense<0.000000e+00> : vector<2x512xf32>
    %403 = tpu.matmul %401, %402, %cst_110 {dimension_numbers = #tpu.dot_dimension_numbers<[1], [0], [0], [1], [0, 0, 1, 1], [], []>} : vector<2x128xbf16>, vector<128x512xbf16>, vector<2x512xf32> -> vector<2x512xf32>
    %404 = arith.truncf %400 : vector<2x128xf32> to vector<2x128xbf16>
    %c0_111 = arith.constant 0 : index
    %c0_112 = arith.constant 0 : index
    %405 = vector.load %arg6[%c0_111, %c0_112] : memref<128x512xbf16, #tpu.memory_space<vmem>>, vector<128x512xbf16>
    %cst_113 = arith.constant dense<0.000000e+00> : vector<2x512xf32>
    %406 = tpu.matmul %404, %405, %cst_113 {dimension_numbers = #tpu.dot_dimension_numbers<[1], [0], [0], [1], [0, 0, 1, 1], [], []>} : vector<2x128xbf16>, vector<128x512xbf16>, vector<2x512xf32> -> vector<2x512xf32>
    %407 = arith.addf %403, %406 : vector<2x512xf32>
    %408 = arith.addf %407, %9 : vector<2x512xf32>
    %409 = vector.extract_strided_slice %408 {offsets = [0, 0], sizes = [2, 256], strides = [1, 1]} : vector<2x512xf32> to vector<2x256xf32>
    %410 = arith.negf %409 : vector<2x256xf32>
    %411 = math.exp %410 : vector<2x256xf32>
    %cst_114 = arith.constant 1.000000e+00 : f32
    %412 = vector.broadcast %cst_114 : f32 to vector<2x256xf32>
    %413 = arith.addf %412, %411 : vector<2x256xf32>
    %414 = arith.divf %412, %413 : vector<2x256xf32>
    %415 = vector.extract_strided_slice %414 {offsets = [0, 0], sizes = [2, 128], strides = [1, 1]} : vector<2x256xf32> to vector<2x128xf32>
    %416 = vector.extract_strided_slice %414 {offsets = [0, 128], sizes = [2, 128], strides = [1, 1]} : vector<2x256xf32> to vector<2x128xf32>
    %417 = vector.extract_strided_slice %408 {offsets = [0, 256], sizes = [2, 128], strides = [1, 1]} : vector<2x512xf32> to vector<2x128xf32>
    %418 = vector.extract_strided_slice %408 {offsets = [0, 384], sizes = [2, 128], strides = [1, 1]} : vector<2x512xf32> to vector<2x128xf32>
    %419 = arith.mulf %415, %418 : vector<2x128xf32>
    %420 = arith.addf %417, %419 : vector<2x128xf32>
    %421 = math.tanh %420 : vector<2x128xf32>
    %422 = arith.subf %400, %421 : vector<2x128xf32>
    %423 = arith.mulf %416, %422 : vector<2x128xf32>
    %424 = arith.addf %421, %423 : vector<2x128xf32>
    %c7 = arith.constant 7 : index
    %c0_115 = arith.constant 0 : index
    %c0_116 = arith.constant 0 : index
    %425 = vector.load %arg8[%c7, %c0_115, %c0_116] : memref<8x2x128xf32, #tpu.memory_space<vmem>>, vector<1x2x128xf32>
    %426 = vector.shape_cast %425 : vector<1x2x128xf32> to vector<2x128xf32>
    %427 = vector.shape_cast %424 : vector<2x128xf32> to vector<1x2x128xf32>
    tpu.vector_store %arg8[%c7, %c0_115, %c0_116], %427 {strides = array<i32>} : memref<8x2x128xf32, #tpu.memory_space<vmem>>, vector<1x2x128xf32>,
    %c0_117 = arith.constant 0 : index
    %c0_118 = arith.constant 0 : index
    %c0_119 = arith.constant 0 : index
    %428 = vector.load %arg9[%c0_117, %c0_118, %c0_119] : memref<2x2x128xf32, #tpu.memory_space<vmem>>, vector<1x2x128xf32>
    %429 = vector.shape_cast %428 : vector<1x2x128xf32> to vector<2x128xf32>
    %430 = vector.shape_cast %399 : vector<2x128xf32> to vector<1x2x128xf32>
    tpu.vector_store %arg9[%c0_117, %c0_118, %c0_119], %430 {strides = array<i32>} : memref<2x2x128xf32, #tpu.memory_space<vmem>>, vector<1x2x128xf32>,
    %c1_120 = arith.constant 1 : index
    %c0_121 = arith.constant 0 : index
    %c0_122 = arith.constant 0 : index
    %431 = vector.load %arg9[%c1_120, %c0_121, %c0_122] : memref<2x2x128xf32, #tpu.memory_space<vmem>>, vector<1x2x128xf32>
    %432 = vector.shape_cast %431 : vector<1x2x128xf32> to vector<2x128xf32>
    %433 = vector.shape_cast %424 : vector<2x128xf32> to vector<1x2x128xf32>
    tpu.vector_store %arg9[%c1_120, %c0_121, %c0_122], %433 {strides = array<i32>} : memref<2x2x128xf32, #tpu.memory_space<vmem>>, vector<1x2x128xf32>,
    return
  }
}

</mosaic_0001>

<bundles_post_ra>
// kernel: multi_agent_gru.1
= control target key start
LH: loop header
LB: loop body
LE: loop exit
PB: predicated region body
PF: predicated region fallthrough
CT: control target
= control target key end

     0   :  { %15 = vsyncpa [#allocation3], 0  ;;  %s10983_s0 = inlined_call_operand.vmem [shape: bf16[16,48], index: 0, kind: input, shape index: {}]   ;;  %s10984_s1 = inlined_call_operand.vmem [shape: f32[8,2,128], index: 1, kind: input, shape index: {}]   ;;  %s10985_s2 = inlined_call_operand.vmem [shape: bf16[48,512], index: 2, kind: input, shape index: {}]   ;;  %s10986_s3 = inlined_call_operand.hbm [shape: bf16[128,512], index: 3, kind: input, shape index: {}]   ;;  %s10987_s4 = inlined_call_operand.vmem [shape: f32[1,512], index: 4, kind: input, shape index: {}]   ;;  %s10988_s5 = inlined_call_operand.hbm [shape: bf16[128,512], index: 5, kind: input, shape index: {}]   ;;  %s10989_s6 = inlined_call_operand.hbm [shape: bf16[128,512], index: 6, kind: input, shape index: {}]   ;;  %s10990_s7 = inlined_call_operand.vmem [shape: f32[1,512], index: 7, kind: input, shape index: {}]   ;;  %s10991_s8 = inlined_call_operand.vmem [shape: f32[8,2,128], index: 8, kind: output, shape index: {0}]   ;;  %s10992_s9 = inlined_call_operand.vmem [shape: f32[2,2,128], index: 9, kind: output, shape index: {1}]  }
   0x1   :  { %16 = vsyncpa [#allocation5], 0  ;;  %s9130_s30 = smov [#allocation4]   ;;  %s9131_s11 = smov [#allocation2]  }
   0x2   :  { %s42_s10 = sshll.u32 %s9130_s30, 4  ;;  %s28_s12 = sshll.u32 %s9131_s11, 4  ;;  %s43_s10 = int_to_ptr.vmem [resolvable:$true] %s42_s10  ;;  %s29_s12 = int_to_ptr.vmem [resolvable:$true] %s28_s12 }
   0x3   :  { %s9074_s13 = scalar_lea.vmem %s43_s10, 4096  ;;  %p9079_p1 = scmp.lt.s32.totalorder %s43_s10, %s43_s10 }
   0x4   :  { %p9075_p0 = scmp.ne.s32.totalorder %s43_s10, %s9074_s13  ;;  %p9080_p2 = scmp.lt.s32.totalorder %s9074_s13, %s9074_s13 }
   0x6   :  { %p9081_p3 = por %p9080_p2, %p9079_p1 }
   0x8   :  { %p9082_p4 = pnand %p9081_p3, %p9075_p0 }
   0xa   :  { %9085 = shalt.err (!%p9082_p4)
}
   0xb   :  { %s9132_s14 = smov 256   ;;  %s9133_s15 = smov 16  }
   0xc   :  { %48 = dma.hbm_to_vmem [thread:$0]  %s10988_s5, 4096, %s43_s10, [#allocation5], %s9132_s14, %s9132_s14, %s9133_s15  }
   0xd   :  { %s9094_s18 = scalar_lea.vmem %s29_s12, 4096  ;;  %p9099_p6 = scmp.lt.s32.totalorder %s29_s12, %s29_s12 }
   0xe   :  { %p9095_p5 = scmp.ne.s32.totalorder %s29_s12, %s9094_s18  ;;  %p9100_p7 = scmp.lt.s32.totalorder %s9094_s18, %s9094_s18 }
  0x10   :  { %p9101_p8 = por %p9100_p7, %p9099_p6 }
  0x12   :  { %p9102_p9 = pnand %p9101_p8, %p9095_p5 }
  0x14   :  { %9105 = shalt.err (!%p9102_p9)
}
  0x15   :  { %34 = dma.hbm_to_vmem [thread:$0]  %s10986_s3, 4096, %s29_s12, [#allocation3], %s9132_s14, %s9132_s14, %s9133_s15  }
  0x16   :  { %s9134_s21 = smov [#allocation6]  }
  0x17   :  { %s54_s22 = sshll.u32 %s9134_s21, 4  ;;  %s55_s22 = int_to_ptr.vmem [resolvable:$true] %s54_s22 }
  0x18   :  { %s9114_s23 = scalar_lea.vmem %s55_s22, 4096  ;;  %p9119_p11 = scmp.lt.s32.totalorder %s55_s22, %s55_s22 }
  0x19   :  { %p9115_p10 = scmp.ne.s32.totalorder %s55_s22, %s9114_s23  ;;  %p9120_p12 = scmp.lt.s32.totalorder %s9114_s23, %s9114_s23 }
  0x1b   :  { %p9121_p13 = por %p9120_p12, %p9119_p11 }
  0x1d   :  { %p9122_p0 = pnand %p9121_p13, %p9115_p10 }
  0x1f   :  { %9125 = shalt.err (!%p9122_p0)
}
  0x20   :  { %60 = dma.hbm_to_vmem [thread:$0]  %s10989_s6, 4096, %s55_s22, [#allocation5], %s9132_s14, %s9132_s14, %s9133_s15  }
  0x21   :  { %9126 = dma.done.wait [#allocation3], 4096  }
  0x22   :  { %9127 = vsyncadd [#allocation3], 4294963200 }
  0x23   :  { %9128 = dma.done.wait [#allocation5], 8192  }
  0x24   :  { %9129 = vsyncadd [#allocation5], 4294959104  ;;  %v10993_v0 = vmov 0   ;;  %v8279_v1 = vld [vmem:[%s10985_s2 + $0x44] ss:$16 sps:$4 sm:$0xff]   ;;  %vm182_vm0 = vcmask 392192  }
  0x25   :  { %218 = vmatprep.mubr.bf16.mxu0 %v10993_v0  ;;  %261 = vmatprep.mubr.bf16.mxu1 %v10993_v0  ;;  %v8281_v2 = vld [vmem:[%s10985_s2 + $0x4c] ss:$16 sps:$4 sm:$0xff]   ;;  %v8283_v3 = vld [vmem:[%s10985_s2 + $0x40] ss:$16 sps:$4 sm:$0xff]   ;;  %v8284_v4 = vld [vmem:[%s10985_s2 + $0x48] ss:$16 sps:$4 sm:$0xff]  }
  0x26   :  { %196 = vmatprep.subr.bf16.mxu0 %v8279_v1  ;;  %239 = vmatprep.subr.bf16.mxu1 %v8281_v2  ;;  %v8285_v5 = vld [vmem:[%s10985_s2 + $0x24] ss:$16 sps:$4 sm:$0xff]   ;;  %v8287_v6 = vld [vmem:[%s10985_s2 + $0x2c] ss:$16 sps:$4 sm:$0xff]   ;;  %v8289_v7 = vld [vmem:[%s10985_s2 + $0x20] ss:$16 sps:$4 sm:$0xff]  }
  0x27   :  { %197 = vmatpush1.bf16.msra.mxu0 %v8283_v3  ;;  %240 = vmatpush1.bf16.msra.mxu1 %v8284_v4  ;;  %v8290_v8 = vld [vmem:[%s10985_s2 + $0x28] ss:$16 sps:$4 sm:$0xff]   ;;  %v8291_v9 = vld [vmem:[%s10985_s2 + $0x4] ss:$16 sps:$4 sm:$0xff]   ;;  %v8293_v10 = vld [vmem:[%s10985_s2 + $0xc] ss:$16 sps:$4 sm:$0xff]  }
  0x28   :  { %198 = vmatprep.subr.bf16.mxu0 %v8285_v5  ;;  %241 = vmatprep.subr.bf16.mxu1 %v8287_v6  ;;  %v8295_v11 = vld [vmem:[%s10985_s2] ss:$16 sps:$4 sm:$0xff]   ;;  %v8296_v12 = vld [vmem:[%s10985_s2 + $0x8] ss:$16 sps:$4 sm:$0xff]   ;;  %v8300_v13 = vld [vmem:[#allocation2 + $0xe4] ss:$16 sps:$4 sm:$0xff]  }
  0x29   :  { %v8297_v14 = vld [vmem:[%s10983_s0] sm:$0xff]   ;;  %v8303_v15 = vld [vmem:[#allocation2 + $0xec] ss:$16 sps:$4 sm:$0xff]   ;;  %v8301_v17 = vld [vmem:[#allocation2 + $0xe8] ss:$16 sps:$4 sm:$0xff]  }
  0x2a   :  { %v8298_v16 = vld [vmem:[#allocation2 + $0xe0] ss:$16 sps:$4 sm:$0xff]   ;;  %v8306_v18 = vld [vmem:[#allocation2 + $0xc4] ss:$16 sps:$4 sm:$0xff]   ;;  %v8309_v19 = vld [vmem:[#allocation2 + $0xcc] ss:$16 sps:$4 sm:$0xff]  }
  0x2b   :  { %199 = vmatpush1.bf16.msra.mxu0 %v8289_v7  ;;  %242 = vmatpush1.bf16.msra.mxu1 %v8290_v8  ;;  %v8304_v20 = vld [vmem:[#allocation2 + $0xc0] ss:$16 sps:$4 sm:$0xff]   ;;  %v8307_v21 = vld [vmem:[#allocation2 + $0xc8] ss:$16 sps:$4 sm:$0xff]   ;;  %v8312_v22 = vld [vmem:[#allocation2 + $0xa4] ss:$16 sps:$4 sm:$0xff]  }
  0x2c   :  { %200 = vmatprep.subr.bf16.mxu0 %v8291_v9  ;;  %243 = vmatprep.subr.bf16.mxu1 %v8293_v10  ;;  %v8315_v23 = vld [vmem:[#allocation2 + $0xac] ss:$16 sps:$4 sm:$0xff]   ;;  %v8310_v24 = vld [vmem:[#allocation2 + $0xa0] ss:$16 sps:$4 sm:$0xff]   ;;  %v8313_v25 = vld [vmem:[#allocation2 + $0xa8] ss:$16 sps:$4 sm:$0xff]  }
  0x2d   :  { %v8318_v26 = vld [vmem:[#allocation2 + $0x84] ss:$16 sps:$4 sm:$0xff]   ;;  %v8321_v27 = vld [vmem:[#allocation2 + $0x8c] ss:$16 sps:$4 sm:$0xff]   ;;  %v8316_v28 = vld [vmem:[#allocation2 + $0x80] ss:$16 sps:$4 sm:$0xff]  }
  0x2e   :  { %v8319_v29 = vld [vmem:[#allocation2 + $0x88] ss:$16 sps:$4 sm:$0xff]   ;;  %v8324_v30 = vld [vmem:[#allocation2 + $0x64] ss:$16 sps:$4 sm:$0xff]   ;;  %v8327_v31 = vld [vmem:[#allocation2 + $0x6c] ss:$16 sps:$4 sm:$0xff]  }
  0x2f   :  { %201 = vmatpush1.bf16.msra.mxu0 %v8295_v11  ;;  %244 = vmatpush1.bf16.msra.mxu1 %v8296_v12  ;;  %v8322_v32 = vld [vmem:[#allocation2 + $0x60] ss:$16 sps:$4 sm:$0xff]   ;;  %v8325_v33 = vld [vmem:[#allocation2 + $0x68] ss:$16 sps:$4 sm:$0xff]   ;;  %v8330_v34 = vld [vmem:[#allocation2 + $0x44] ss:$16 sps:$4 sm:$0xff]  }
  0x30   :  { %488 = vmatprep.subr.bf16.mxu0 %v8300_v13  ;;  %529 = vmatprep.subr.bf16.mxu1 %v8303_v15  ;;  %v8333_v35 = vld [vmem:[#allocation2 + $0x4c] ss:$16 sps:$4 sm:$0xff]   ;;  %v8328_v36 = vld [vmem:[#allocation2 + $0x40] ss:$16 sps:$4 sm:$0xff]   ;;  %v8331_v37 = vld [vmem:[#allocation2 + $0x48] ss:$16 sps:$4 sm:$0xff]  }
  0x31   :  { %v8336_v38 = vld [vmem:[#allocation2 + $0x24] ss:$16 sps:$4 sm:$0xff]   ;;  %v8339_v39 = vld [vmem:[#allocation2 + $0x2c] ss:$16 sps:$4 sm:$0xff]   ;;  %v8334_v40 = vld [vmem:[#allocation2 + $0x20] ss:$16 sps:$4 sm:$0xff]  }
  0x32   :  { %7463 = vmatmul.mubr.msk.bf16.vlgmr.msra.gmra.mxu0 %vm182_vm0, %v8297_v14  ;;  %7464 = vmatmul.mubr.msk.bf16.vlgmr.msra.gmra.mxu1 %vm182_vm0, %v8297_v14  ;;  %v8337_v41 = vld [vmem:[#allocation2 + $0x28] ss:$16 sps:$4 sm:$0xff]   ;;  %v73_v42 = vld [vmem:[%s10984_s1] sm:$0x3]  ;;  %v8342_v43 = vld [vmem:[#allocation2 + $0x4] ss:$16 sps:$4 sm:$0xff]  }
  0x33   :  { %489 = vmatpush1.bf16.msra.mxu0 %v8298_v16  ;;  %530 = vmatpush1.bf16.msra.mxu1 %v8301_v17  ;;  %v8345_v44 = vld [vmem:[#allocation2 + $0xc] ss:$16 sps:$4 sm:$0xff]   ;;  %v8340_v45 = vld [vmem:[#allocation2] ss:$16 sps:$4 sm:$0xff]   ;;  %v8343_v46 = vld [vmem:[#allocation2 + $0x8] ss:$16 sps:$4 sm:$0xff]  }
  0x34   :  { %490 = vmatprep.subr.bf16.mxu0 %v8306_v18  ;;  %531 = vmatprep.subr.bf16.mxu1 %v8309_v19  ;;  %v9241_v47 = vmul.f32 0.0, %v73_v42  ;;  %v9251_v49 = vld [vmem:[#allocation6 + $0xe0] ss:$16 sps:$4 sm:$0xff]   ;;  %v9253_v50 = vld [vmem:[#allocation6 + $0xe4] ss:$16 sps:$4 sm:$0xff]  }
  0x35   :  { %520 = vmatprep.mubr.bf16.mxu0 %v10993_v0  ;;  %561 = vmatprep.mubr.bf16.mxu1 %v10993_v0  ;;  %v9255_v51 = vld [vmem:[#allocation6 + $0xc4] ss:$16 sps:$4 sm:$0xff]   ;;  %v9257_v52 = vld [vmem:[#allocation6 + $0xe8] ss:$16 sps:$4 sm:$0xff]   ;;  %v9260_v53 = vld [vmem:[#allocation6 + $0xc0] ss:$16 sps:$4 sm:$0xff]  }
  0x36   :  { %v9245_v48 = vpack.c.bf16 %v9241_v47, %v9241_v47  ;;  %v9262_v54 = vld [vmem:[#allocation6 + $0xec] ss:$16 sps:$4 sm:$0xff]   ;;  %v9264_v55 = vld [vmem:[#allocation6 + $0xa4] ss:$16 sps:$4 sm:$0xff]   ;;  %v9270_v56 = vld [vmem:[#allocation6 + $0xa0] ss:$16 sps:$4 sm:$0xff]  }
  0x37   :  { %491 = vmatpush1.bf16.msra.mxu0 %v8304_v20  ;;  %532 = vmatpush1.bf16.msra.mxu1 %v8307_v21  ;;  %v9275_v57 = vld [vmem:[#allocation6 + $0xcc] ss:$16 sps:$4 sm:$0xff]   ;;  %v9277_v58 = vld [vmem:[#allocation6 + $0xc8] ss:$16 sps:$4 sm:$0xff]   ;;  %v9281_v59 = vld [vmem:[#allocation6 + $0x84] ss:$16 sps:$4 sm:$0xff]  }
  0x38   :  { %492 = vmatprep.subr.bf16.mxu0 %v8312_v22  ;;  %533 = vmatprep.subr.bf16.mxu1 %v8315_v23  ;;  %v9283_v60 = vld [vmem:[#allocation6 + $0x80] ss:$16 sps:$4 sm:$0xff]   ;;  %v9285_v61 = vld [vmem:[#allocation6 + $0xac] ss:$16 sps:$4 sm:$0xff]   ;;  %v9288_v62 = vld [vmem:[#allocation6 + $0xa8] ss:$16 sps:$4 sm:$0xff]  }
  0x39   :  { %v9293_v63 = vld [vmem:[#allocation6 + $0x64] ss:$16 sps:$4 sm:$0xff]   ;;  %v9295_v1 = vld [vmem:[#allocation6 + $0x60] ss:$16 sps:$4 sm:$0xff]   ;;  %v9297_v2 = vld [vmem:[#allocation6 + $0x8c] ss:$16 sps:$4 sm:$0xff]  }
  0x3a   :  { %v9300_v3 = vld [vmem:[#allocation6 + $0x88] ss:$16 sps:$4 sm:$0xff]   ;;  %v9305_v4 = vld [vmem:[#allocation6 + $0x44] ss:$16 sps:$4 sm:$0xff]   ;;  %v9307_v5 = vld [vmem:[#allocation6 + $0x40] ss:$16 sps:$4 sm:$0xff]  }
  0x3b   :  { %493 = vmatpush1.bf16.msra.mxu0 %v8310_v24  ;;  %534 = vmatpush1.bf16.msra.mxu1 %v8313_v25  ;;  %v9309_v6 = vld [vmem:[#allocation6 + $0x6c] ss:$16 sps:$4 sm:$0xff]   ;;  %v9312_v7 = vld [vmem:[#allocation6 + $0x68] ss:$16 sps:$4 sm:$0xff]   ;;  %v9317_v8 = vld [vmem:[#allocation6 + $0x24] ss:$16 sps:$4 sm:$0xff]  }
  0x3c   :  { %494 = vmatprep.subr.bf16.mxu0 %v8318_v26  ;;  %535 = vmatprep.subr.bf16.mxu1 %v8321_v27  ;;  %v9319_v9 = vld [vmem:[#allocation6 + $0x20] ss:$16 sps:$4 sm:$0xff]   ;;  %v9321_v10 = vld [vmem:[#allocation6 + $0x4c] ss:$16 sps:$4 sm:$0xff]   ;;  %v9324_v11 = vld [vmem:[#allocation6 + $0x48] ss:$16 sps:$4 sm:$0xff]  }
  0x3d   :  { %v9329_v12 = vld [vmem:[#allocation6 + $0x4] ss:$16 sps:$4 sm:$0xff]   ;;  %v9331_v13 = vld [vmem:[#allocation6] ss:$16 sps:$4 sm:$0xff]   ;;  %v9333_v14 = vld [vmem:[#allocation6 + $0x2c] ss:$16 sps:$4 sm:$0xff]  }
  0x3e   :  { %v9336_v15 = vld [vmem:[#allocation6 + $0x28] ss:$16 sps:$4 sm:$0xff]   ;;  %v9341_v16 = vld [vmem:[#allocation6 + $0xc] ss:$16 sps:$4 sm:$0xff]   ;;  %v9349_v18 = vld [vmem:[#allocation4 + $0xe4] ss:$16 sps:$4 sm:$0xff]  }
  0x3f   :  { %495 = vmatpush1.bf16.msra.mxu0 %v8316_v28  ;;  %536 = vmatpush1.bf16.msra.mxu1 %v8319_v29  ;;  %v9344_v17 = vld [vmem:[#allocation6 + $0x8] ss:$16 sps:$4 sm:$0xff]   ;;  %v9351_v19 = vld [vmem:[#allocation4 + $0xec] ss:$16 sps:$4 sm:$0xff]   ;;  %v9353_v20 = vld [vmem:[#allocation4 + $0xe0] ss:$16 sps:$4 sm:$0xff]  }
  0x40   :  { %496 = vmatprep.subr.bf16.mxu0 %v8324_v30  ;;  %537 = vmatprep.subr.bf16.mxu1 %v8327_v31  ;;  %v9355_v21 = vld [vmem:[#allocation4 + $0xe8] ss:$16 sps:$4 sm:$0xff]   ;;  %v9362_v22 = vld [vmem:[#allocation4 + $0xc4] ss:$16 sps:$4 sm:$0xff]   ;;  %v9364_v23 = vld [vmem:[#allocation4 + $0xcc] ss:$16 sps:$4 sm:$0xff]  }
  0x41   :  { %11180 = vst [vmem:[#allocation9_spill] sm:$0xff] %v9364_v23  ;;  %v9367_v24 = vld [vmem:[#allocation4 + $0xc0] ss:$16 sps:$4 sm:$0xff]   ;;  %v9369_v25 = vld [vmem:[#allocation4 + $0xc8] ss:$16 sps:$4 sm:$0xff]  }
  0x42   :  { %11181 = vst [vmem:[#allocation10_spill] sm:$0xff] %v9367_v24  ;;  %11182 = vst [vmem:[#allocation11_spill] sm:$0xff] %v9369_v25  ;;  %v9375_v26 = vld [vmem:[#allocation4 + $0xa4] ss:$16 sps:$4 sm:$0xff]   ;;  %v9377_v27 = vld [vmem:[#allocation4 + $0xac] ss:$16 sps:$4 sm:$0xff]  }
  0x43   :  { %497 = vmatpush1.bf16.msra.mxu0 %v8322_v32  ;;  %538 = vmatpush1.bf16.msra.mxu1 %v8325_v33  ;;  %11183 = vst [vmem:[#allocation12_spill] sm:$0xff] %v9375_v26  ;;  %11184 = vst [vmem:[#allocation13_spill] sm:$0xff] %v9377_v27  ;;  %v9379_v28 = vld [vmem:[#allocation4 + $0xa0] ss:$16 sps:$4 sm:$0xff]   ;;  %v9381_v29 = vld [vmem:[#allocation4 + $0xa8] ss:$16 sps:$4 sm:$0xff]  }
  0x44   :  { %498 = vmatprep.subr.bf16.mxu0 %v8330_v34  ;;  %539 = vmatprep.subr.bf16.mxu1 %v8333_v35  ;;  %11185 = vst [vmem:[#allocation14_spill] sm:$0xff] %v9379_v28  ;;  %11186 = vst [vmem:[#allocation15_spill] sm:$0xff] %v9381_v29  ;;  %v9387_v30 = vld [vmem:[#allocation4 + $0x84] ss:$16 sps:$4 sm:$0xff]   ;;  %v9389_v31 = vld [vmem:[#allocation4 + $0x8c] ss:$16 sps:$4 sm:$0xff]  }
  0x45   :  { %11187 = vst [vmem:[#allocation16_spill] sm:$0xff] %v9387_v30  ;;  %11188 = vst [vmem:[#allocation17_spill] sm:$0xff] %v9389_v31  ;;  %v9391_v32 = vld [vmem:[#allocation4 + $0x80] ss:$16 sps:$4 sm:$0xff]   ;;  %v9393_v33 = vld [vmem:[#allocation4 + $0x88] ss:$16 sps:$4 sm:$0xff]  }
  0x46   :  { %11189 = vst [vmem:[#allocation18_spill] sm:$0xff] %v9391_v32  ;;  %11190 = vst [vmem:[#allocation19_spill] sm:$0xff] %v9393_v33  ;;  %v9397_v34 = vld [vmem:[#allocation4 + $0x64] ss:$16 sps:$4 sm:$0xff]   ;;  %v9399_v35 = vld [vmem:[#allocation4 + $0x6c] ss:$16 sps:$4 sm:$0xff]  }
  0x47   :  { %499 = vmatpush1.bf16.msra.mxu0 %v8328_v36  ;;  %540 = vmatpush1.bf16.msra.mxu1 %v8331_v37  ;;  %11191 = vst [vmem:[#allocation20_spill] sm:$0xff] %v9397_v34  ;;  %11192 = vst [vmem:[#allocation21_spill] sm:$0xff] %v9399_v35  ;;  %v9402_v36 = vld [vmem:[#allocation4 + $0x60] ss:$16 sps:$4 sm:$0xff]   ;;  %v9406_v37 = vld [vmem:[#allocation4 + $0x68] ss:$16 sps:$4 sm:$0xff]  }
  0x48   :  { %500 = vmatprep.subr.bf16.mxu0 %v8336_v38  ;;  %541 = vmatprep.subr.bf16.mxu1 %v8339_v39  ;;  %11193 = vst [vmem:[#allocation22_spill] sm:$0xff] %v9402_v36  ;;  %11194 = vst [vmem:[#allocation23_spill] sm:$0xff] %v9406_v37  ;;  %v9408_v38 = vld [vmem:[#allocation4 + $0x44] ss:$16 sps:$4 sm:$0xff]   ;;  %v9411_v39 = vld [vmem:[#allocation4 + $0x4c] ss:$16 sps:$4 sm:$0xff]  }
  0x49   :  { %11195 = vst [vmem:[#allocation24_spill] sm:$0xff] %v9408_v38  ;;  %11196 = vst [vmem:[#allocation25_spill] sm:$0xff] %v9411_v39  ;;  %v9417_v42 = vld [vmem:[#allocation4 + $0x24] ss:$16 sps:$4 sm:$0xff]  }
  0x4a   :  { %11199 = vst [vmem:[#allocation28_spill] sm:$0xff] %v9417_v42 }
  0x4b   :  { %501 = vmatpush1.bf16.msra.mxu0 %v8334_v40  ;;  %542 = vmatpush1.bf16.msra.mxu1 %v8337_v41  ;;  %v9413_v40 = vld [vmem:[#allocation4 + $0x40] ss:$16 sps:$4 sm:$0xff]   ;;  %v9415_v41 = vld [vmem:[#allocation4 + $0x48] ss:$16 sps:$4 sm:$0xff]  }
  0x4c   :  { %502 = vmatprep.subr.bf16.mxu0 %v8342_v43  ;;  %543 = vmatprep.subr.bf16.mxu1 %v8345_v44  ;;  %11197 = vst [vmem:[#allocation26_spill] sm:$0xff] %v9413_v40  ;;  %11198 = vst [vmem:[#allocation27_spill] sm:$0xff] %v9415_v41  ;;  %v9420_v43 = vld [vmem:[#allocation4 + $0x2c] ss:$16 sps:$4 sm:$0xff]   ;;  %v9425_v44 = vld [vmem:[#allocation4 + $0x20] ss:$16 sps:$4 sm:$0xff]  }
  0x4d   :  { %11200 = vst [vmem:[#allocation29_spill] sm:$0xff] %v9420_v43  ;;  %11201 = vst [vmem:[#allocation30_spill] sm:$0xff] %v9425_v44 }
  0x4f   :  { %503 = vmatpush1.bf16.msra.mxu0 %v8340_v45  ;;  %544 = vmatpush1.bf16.msra.mxu1 %v8343_v46  ;;  %v9427_v45 = vld [vmem:[#allocation4 + $0x28] ss:$16 sps:$4 sm:$0xff]   ;;  %v9429_v46 = vld [vmem:[#allocation4 + $0x4] ss:$16 sps:$4 sm:$0xff]  }
  0x50   :  { %817 = vmatprep.subr.bf16.mxu0 %v9253_v50  ;;  %858 = vmatprep.subr.bf16.mxu1 %v9262_v54  ;;  %11202 = vst [vmem:[#allocation31_spill] sm:$0xff] %v9427_v45  ;;  %11203 = vst [vmem:[#allocation32_spill] sm:$0xff] %v9429_v46 }
  0x52   :  { %521 = vmatmul.mubr.bf16.vlgmr.msra.gmra.mxu0 %v9245_v48  ;;  %562 = vmatmul.mubr.bf16.vlgmr.msra.gmra.mxu1 %v9245_v48 }
  0x53   :  { %849 = vmatprep.mubr.bf16.mxu0 %v10993_v0  ;;  %890 = vmatprep.mubr.bf16.mxu1 %v10993_v0 }
  0x54   :  { %818 = vmatpush1.bf16.msra.mxu0 %v9251_v49  ;;  %859 = vmatpush1.bf16.msra.mxu1 %v9257_v52 }
  0x55   :  { %819 = vmatprep.subr.bf16.mxu0 %v9255_v51  ;;  %860 = vmatprep.subr.bf16.mxu1 %v9275_v57 }
  0x58   :  { %820 = vmatpush1.bf16.msra.mxu0 %v9260_v53  ;;  %861 = vmatpush1.bf16.msra.mxu1 %v9277_v58 }
  0x59   :  { %821 = vmatprep.subr.bf16.mxu0 %v9264_v55  ;;  %862 = vmatprep.subr.bf16.mxu1 %v9285_v61 }
  0x5c   :  { %822 = vmatpush1.bf16.msra.mxu0 %v9270_v56  ;;  %863 = vmatpush1.bf16.msra.mxu1 %v9288_v62 }
  0x5d   :  { %823 = vmatprep.subr.bf16.mxu0 %v9281_v59  ;;  %864 = vmatprep.subr.bf16.mxu1 %v9297_v2 }
  0x60   :  { %824 = vmatpush1.bf16.msra.mxu0 %v9283_v60  ;;  %865 = vmatpush1.bf16.msra.mxu1 %v9300_v3 }
  0x61   :  { %825 = vmatprep.subr.bf16.mxu0 %v9293_v63  ;;  %866 = vmatprep.subr.bf16.mxu1 %v9309_v6 }
  0x64   :  { %826 = vmatpush1.bf16.msra.mxu0 %v9295_v1  ;;  %867 = vmatpush1.bf16.msra.mxu1 %v9312_v7 }
  0x65   :  { %827 = vmatprep.subr.bf16.mxu0 %v9305_v4  ;;  %868 = vmatprep.subr.bf16.mxu1 %v9321_v10 }
  0x68   :  { %828 = vmatpush1.bf16.msra.mxu0 %v9307_v5  ;;  %869 = vmatpush1.bf16.msra.mxu1 %v9324_v11 }
  0x69   :  { %829 = vmatprep.subr.bf16.mxu0 %v9317_v8  ;;  %870 = vmatprep.subr.bf16.mxu1 %v9333_v14 }
  0x6c   :  { %830 = vmatpush1.bf16.msra.mxu0 %v9319_v9  ;;  %871 = vmatpush1.bf16.msra.mxu1 %v9336_v15 }
  0x6d   :  { %831 = vmatprep.subr.bf16.mxu0 %v9329_v12  ;;  %872 = vmatprep.subr.bf16.mxu1 %v9341_v16 }
  0x70   :  { %832 = vmatpush1.bf16.msra.mxu0 %v9331_v13  ;;  %873 = vmatpush1.bf16.msra.mxu1 %v9344_v17 }
  0x71   :  { %1059 = vmatprep.subr.bf16.mxu0 %v9349_v18  ;;  %1100 = vmatprep.subr.bf16.mxu1 %v9351_v19 }
  0x73   :  { %850 = vmatmul.mubr.bf16.vlgmr.msra.gmra.mxu0 %v9245_v48  ;;  %891 = vmatmul.mubr.bf16.vlgmr.msra.gmra.mxu1 %v9245_v48  ;;  %v9432_v48 = vld [vmem:[#allocation4 + $0xc] ss:$16 sps:$4 sm:$0xff]  }
  0x74   :  { %1091 = vmatprep.mubr.bf16.mxu0 %v10993_v0  ;;  %1060 = vmatpush1.bf16.msra.mxu0 %v9353_v20  ;;  %11204 = vst [vmem:[#allocation33_spill] sm:$0xff] %v9432_v48 }
  0x75   :  { %1101 = vmatpush1.bf16.msra.mxu1 %v9355_v21  ;;  %1132 = vmatprep.mubr.bf16.mxu1 %v10993_v0  ;;  %v9437_v0 = vld [vmem:[#allocation4] ss:$16 sps:$4 sm:$0xff]  }
  0x76   :  { %1061 = vmatprep.subr.bf16.mxu0 %v9362_v22  ;;  %1102 = vmatprep.subr.bf16.mxu1 %v9364_v23  ;;  %11205 = vst [vmem:[#allocation34_spill] sm:$0xff] %v9437_v0 }
  0x78   :  { %1062 = vmatpush1.bf16.msra.mxu0 %v9367_v24 }
  0x79   :  { %1103 = vmatpush1.bf16.msra.mxu1 %v9369_v25  ;;  %1063 = vmatprep.subr.bf16.mxu0 %v9375_v26 }
  0x7a   :  { %1104 = vmatprep.subr.bf16.mxu1 %v9377_v27 }
  0x7c   :  { %1064 = vmatpush1.bf16.msra.mxu0 %v9379_v28 }
  0x7d   :  { %1105 = vmatpush1.bf16.msra.mxu1 %v9381_v29  ;;  %1065 = vmatprep.subr.bf16.mxu0 %v9387_v30 }
  0x7e   :  { %1106 = vmatprep.subr.bf16.mxu1 %v9389_v31 }
  0x80   :  { %1066 = vmatpush1.bf16.msra.mxu0 %v9391_v32 }
  0x81   :  { %1107 = vmatpush1.bf16.msra.mxu1 %v9393_v33  ;;  %1067 = vmatprep.subr.bf16.mxu0 %v9397_v34 }
  0x82   :  { %1108 = vmatprep.subr.bf16.mxu1 %v9399_v35 }
  0x84   :  { %1068 = vmatpush1.bf16.msra.mxu0 %v9402_v36 }
  0x85   :  { %1109 = vmatpush1.bf16.msra.mxu1 %v9406_v37  ;;  %1069 = vmatprep.subr.bf16.mxu0 %v9408_v38  ;;  %v9439_v38 = vld [vmem:[#allocation4 + $0x8] ss:$16 sps:$4 sm:$0xff]  }
  0x86   :  { %1110 = vmatprep.subr.bf16.mxu1 %v9411_v39  ;;  %11206 = vst [vmem:[#allocation35_spill] sm:$0xff] %v9439_v38 }
  0x88   :  { %1070 = vmatpush1.bf16.msra.mxu0 %v9413_v40 }
  0x89   :  { %1111 = vmatpush1.bf16.msra.mxu1 %v9415_v41  ;;  %1071 = vmatprep.subr.bf16.mxu0 %v9417_v42  ;;  %v9034_v41 = vld [vmem:[#allocation2 + $0xe4] ss:$16 sps:$4 sm:$0xff]   ;;  %v9035_v42 = vld [vmem:[#allocation2 + $0xec] ss:$16 sps:$4 sm:$0xff]  }
  0x8a   :  { %1112 = vmatprep.subr.bf16.mxu1 %v9420_v43  ;;  %v97_v43 = vlaneseq }
  0x8c   :  { %1072 = vmatpush1.bf16.msra.mxu0 %v9425_v44  ;;  %v9447_v40 = vshrl.u32 %v97_v43, 7 }
  0x8d   :  { %1113 = vmatpush1.bf16.msra.mxu1 %v9427_v45  ;;  %1073 = vmatprep.subr.bf16.mxu0 %v9429_v46 }
  0x8e   :  { %1114 = vmatprep.subr.bf16.mxu1 %v9432_v48  ;;  %v11016_v39 = vsub.s32 2, %v9447_v40  ;;  %v11019_v44 = vsub.s32 0, %v9447_v40  ;;  %v11021_v45 = vsub.s32 3, %v9447_v40  ;;  %v95_v48 = vld [vmem:[%s10987_s4] sm:$0xf] }
  0x90   :  { %1074 = vmatpush1.bf16.msra.mxu0 %v9437_v0  ;;  %v100_v37 = vrot.slane %v95_v48, %v11019_v44  ;;  %v112_v36 = vrot.slane %v95_v48, %v11021_v45 }
  0x91   :  { %1115 = vmatpush1.bf16.msra.mxu1 %v9439_v38  ;;  %1358 = vmatprep.subr.bf16.mxu0 %v9034_v41  ;;  %v11025_v38 = vsub.s32 1, %v9447_v40  ;;  %v108_v41 = vrot.slane %v95_v48, %v11016_v39 }
  0x92   :  { %1399 = vmatprep.subr.bf16.mxu1 %v9035_v42 }
  0x93   :  { %v104_v33 = vrot.slane %v95_v48, %v11025_v38 }
  0xf2   :  { %v220_v0 = vpop.f32.mrf.mxu0  ;;  %v263_v46 = vpop.f32.mrf.mxu1 }
  0xf3   :  { %v9472_v27 = vadd.f32 %v220_v0, %v100_v37 }
  0xf4   :  { %v222_v42 = vpop.f32.mrf.mxu0  ;;  %v265_v43 = vpop.f32.mrf.mxu1 }
  0xf6   :  { %v224_v35 = vpop.f32.mrf.mxu0  ;;  %v267_v34 = vpop.f32.mrf.mxu1 }
  0xf7   :  { %v9464_v32 = vadd.f32 %v224_v35, %v100_v37  ;;  %v9466_v31 = vadd.f32 %v267_v34, %v108_v41  ;;  %v9478_v37 = vadd.f32 %v265_v43, %v112_v36  ;;  %v11211_v43 = vmov 0  }
  0xf8   :  { %v226_v30 = vpop.f32.mrf.mxu0  ;;  %v269_v29 = vpop.f32.mrf.mxu1 }
  0xf9   :  { %11207 = vst [vmem:[#allocation36_spill] sm:$0xff] %v9464_v32  ;;  %11208 = vst [vmem:[#allocation37_spill] sm:$0xff] %v9466_v31  ;;  %v9468_v39 = vadd.f32 %v226_v30, %v104_v33  ;;  %v9470_v28 = vadd.f32 %v269_v29, %v112_v36  ;;  %v9475_v31 = vadd.f32 %v222_v42, %v104_v33  ;;  %v9777_v32 = vld [vmem:[#allocation6 + $0x68] ss:$16 sps:$4 sm:$0xff]  }
  0xfb   :  { %11209 = vst [vmem:[#allocation38_spill] sm:$0xff] %v9468_v39  ;;  %11210 = vst [vmem:[#allocation39_spill] sm:$0xff] %v9470_v28 }
 0x112   :  { %v522_v44 = vpop.f32.mrf.mxu0  ;;  %v563_v26 = vpop.f32.mrf.mxu1 }
 0x113   :  { %v570_v45 = vadd.f32 %v522_v44, %v9472_v27  ;;  %v9480_v44 = vadd.f32 %v263_v46, %v108_v41  ;;  %v9039_v41 = vld [vmem:[#allocation2 + $0xcc] ss:$16 sps:$4 sm:$0xff]  }
 0x114   :  { %v524_v25 = vpop.f32.mrf.mxu0  ;;  %v565_v24 = vpop.f32.mrf.mxu1 }
 0x115   :  { %v7497_v23 = vmul.f32 -1.442695, %v570_v45  ;;  %v571_v30 = vadd.f32 %v524_v25, %v9475_v31  ;;  %v573_v45 = vadd.f32 %v565_v24, %v9478_v37  ;;  %v9036_v24 = vld [vmem:[#allocation2 + $0xe0] ss:$16 sps:$4 sm:$0xff]  }
 0x116   :  { %v526_v48 = vpop.f32.mrf.mxu0  ;;  %v567_v35 = vpop.f32.mrf.mxu1 }
 0x117   :  { %8874 = vpow2.f32 %v7497_v23  ;;  %v7498_v29 = vmul.f32 -1.442695, %v571_v30  ;;  %v572_v23 = vadd.f32 %v563_v26, %v9480_v44  ;;  %v9037_v26 = vld [vmem:[#allocation2 + $0xe8] ss:$16 sps:$4 sm:$0xff]   ;;  %v9040_v30 = vld [vmem:[#allocation2 + $0xc0] ss:$16 sps:$4 sm:$0xff]  }
 0x118   :  { %v527_v34 = vpop.f32.mrf.mxu0  ;;  %v568_v38 = vpop.f32.mrf.mxu1 }
 0x119   :  { %8876 = vpow2.f32 %v7498_v29  ;;  %v9041_v29 = vld [vmem:[#allocation2 + $0xc8] ss:$16 sps:$4 sm:$0xff]  }
 0x124   :  { %v8875_v28 = vpop.eup %8874 }
 0x125   :  { %v580_v0 = vadd.f32 1.0, %v8875_v28 }
 0x126   :  { %v8877_v39 = vpop.eup %8876 }
 0x127   :  { %8878 = vrcp.f32 %v580_v0  ;;  %v581_v33 = vadd.f32 1.0, %v8877_v39  ;;  %v9038_v39 = vld [vmem:[#allocation2 + $0xc4] ss:$16 sps:$4 sm:$0xff]  }
 0x128   :  { %v9042_v0 = vld [vmem:[#allocation2 + $0xa4] ss:$16 sps:$4 sm:$0xff]  }
 0x134   :  { %v8879_v48 = vpop.eup %8878 }
 0x135   :  { %v586_v38 = vmul.f32 %v8879_v48, %v573_v45  ;;  %v9043_v45 = vld [vmem:[#allocation2 + $0xac] ss:$16 sps:$4 sm:$0xff]   ;;  %v9044_v48 = vld [vmem:[#allocation2 + $0xa0] ss:$16 sps:$4 sm:$0xff]  }
 0x137   :  { %v587_v42 = vadd.f32 %v586_v38, %v572_v23  ;;  %v9045_v23 = vld [vmem:[#allocation2 + $0xa8] ss:$16 sps:$4 sm:$0xff]   ;;  %v9046_v38 = vld [vmem:[#allocation2 + $0x84] ss:$16 sps:$4 sm:$0xff]  }
 0x139   :  { %8880 = vtanh.f32 %v587_v42  ;;  %v9048_v42 = vld [vmem:[#allocation2 + $0x80] ss:$16 sps:$4 sm:$0xff]  }
 0x13a   :  { %8882 = vrcp.f32 %v581_v33  ;;  %v9047_v33 = vld [vmem:[#allocation2 + $0x8c] ss:$16 sps:$4 sm:$0xff]  }
 0x146   :  { %v8881_v25 = vpop.eup %8880 }
 0x147   :  { %v589_v28 = vsub.f32 %v9241_v47, %v8881_v25  ;;  %v8883_v35 = vpop.eup %8882 }
 0x149   :  { %v590_v34 = vmul.f32 %v8883_v35, %v589_v28  ;;  %v9050_v28 = vld [vmem:[#allocation2 + $0x64] ss:$16 sps:$4 sm:$0xff]   ;;  %v9051_v35 = vld [vmem:[#allocation2 + $0x6c] ss:$16 sps:$4 sm:$0xff]  }
 0x14b   :  { %v9485_v36 = vadd.f32 %v8881_v25, %v590_v34  ;;  %v9049_v25 = vld [vmem:[#allocation2 + $0x88] ss:$16 sps:$4 sm:$0xff]   ;;  %v9052_v34 = vld [vmem:[#allocation2 + $0x60] ss:$16 sps:$4 sm:$0xff]  }
 0x14d   :  { %v592_v46 = vpack.c.bf16 %v9485_v36, %v9485_v36 }
 0x14f   :  { %1092 = vmatmul.mubr.bf16.vlgmr.msra.gmra.mxu0 %v592_v46  ;;  %1133 = vmatmul.mubr.bf16.vlgmr.msra.gmra.mxu1 %v592_v46  ;;  %v9053_v46 = vld [vmem:[#allocation2 + $0x68] ss:$16 sps:$4 sm:$0xff]  }
 0x150   :  { %1359 = vmatpush1.bf16.msra.mxu0 %v9036_v24  ;;  %1400 = vmatpush1.bf16.msra.mxu1 %v9037_v26  ;;  %v9054_v24 = vld [vmem:[#allocation2 + $0x44] ss:$16 sps:$4 sm:$0xff]   ;;  %v9055_v26 = vld [vmem:[#allocation2 + $0x4c] ss:$16 sps:$4 sm:$0xff]  }
 0x151   :  { %1360 = vmatprep.subr.bf16.mxu0 %v9038_v39  ;;  %1401 = vmatprep.subr.bf16.mxu1 %v9039_v41  ;;  %v9056_v39 = vld [vmem:[#allocation2 + $0x40] ss:$16 sps:$4 sm:$0xff]   ;;  %v9057_v41 = vld [vmem:[#allocation2 + $0x48] ss:$16 sps:$4 sm:$0xff]  }
 0x152   :  { %1390 = vmatprep.mubr.bf16.mxu0 %v11211_v43  ;;  %1431 = vmatprep.mubr.bf16.mxu1 %v11211_v43 }
 0x154   :  { %1361 = vmatpush1.bf16.msra.mxu0 %v9040_v30  ;;  %1402 = vmatpush1.bf16.msra.mxu1 %v9041_v29  ;;  %v9058_v30 = vld [vmem:[#allocation2 + $0x24] ss:$16 sps:$4 sm:$0xff]   ;;  %v9059_v29 = vld [vmem:[#allocation2 + $0x2c] ss:$16 sps:$4 sm:$0xff]  }
 0x155   :  { %1362 = vmatprep.subr.bf16.mxu0 %v9042_v0  ;;  %1403 = vmatprep.subr.bf16.mxu1 %v9043_v45  ;;  %v9494_v0 = vld [vmem:[%s10984_s1 + $0x2] sm:$0x3] }
 0x156   :  { %v9060_v45 = vld [vmem:[#allocation2 + $0x20] ss:$16 sps:$4 sm:$0xff]  }
 0x158   :  { %1363 = vmatpush1.bf16.msra.mxu0 %v9044_v48  ;;  %1404 = vmatpush1.bf16.msra.mxu1 %v9045_v23  ;;  %v9061_v48 = vld [vmem:[#allocation2 + $0x28] ss:$16 sps:$4 sm:$0xff]   ;;  %v9062_v23 = vld [vmem:[#allocation2 + $0x4] ss:$16 sps:$4 sm:$0xff]  }
 0x159   :  { %1364 = vmatprep.subr.bf16.mxu0 %v9046_v38  ;;  %1405 = vmatprep.subr.bf16.mxu1 %v9047_v33  ;;  %v9063_v38 = vld [vmem:[#allocation2 + $0xc] ss:$16 sps:$4 sm:$0xff]   ;;  %v9498_v33 = vmul.f32 %v9485_v36, %v9494_v0  ;;  %v9506_v36 = vpop.f32.mrf.mxu1 }
 0x15c   :  { %1365 = vmatpush1.bf16.msra.mxu0 %v9048_v42  ;;  %1406 = vmatpush1.bf16.msra.mxu1 %v9049_v25  ;;  %v851_v42 = vpop.f32.mrf.mxu0 }
 0x15d   :  { %1366 = vmatprep.subr.bf16.mxu0 %v9050_v28  ;;  %1407 = vmatprep.subr.bf16.mxu1 %v9051_v35  ;;  %v9064_v28 = vld [vmem:[#allocation2] ss:$16 sps:$4 sm:$0xff]   ;;  %v9065_v35 = vld [vmem:[#allocation2 + $0x8] ss:$16 sps:$4 sm:$0xff]  }
 0x15e   :  { %v9500_v25 = vpop.f32.mrf.mxu0 }
 0x160   :  { %1367 = vmatpush1.bf16.msra.mxu0 %v9052_v34  ;;  %1408 = vmatpush1.bf16.msra.mxu1 %v9053_v46  ;;  %v1165_v34 = vpack.c.bf16 %v9498_v33, %v9498_v33  ;;  %v855_v46 = vpop.f32.mrf.mxu0 }
 0x161   :  { %1368 = vmatprep.subr.bf16.mxu0 %v9054_v24  ;;  %1409 = vmatprep.subr.bf16.mxu1 %v9055_v26  ;;  %v894_v26 = vpop.f32.mrf.mxu1 }
 0x162   :  { %v856_v24 = vpop.f32.mrf.mxu0 }
 0x164   :  { %1369 = vmatpush1.bf16.msra.mxu0 %v9056_v39  ;;  %1410 = vmatpush1.bf16.msra.mxu1 %v9057_v41 }
 0x165   :  { %1370 = vmatprep.subr.bf16.mxu0 %v9058_v30  ;;  %1411 = vmatprep.subr.bf16.mxu1 %v9059_v29 }
 0x168   :  { %1371 = vmatpush1.bf16.msra.mxu0 %v9060_v45  ;;  %1412 = vmatpush1.bf16.msra.mxu1 %v9061_v48 }
 0x169   :  { %1372 = vmatprep.subr.bf16.mxu0 %v9062_v23  ;;  %1413 = vmatprep.subr.bf16.mxu1 %v9063_v38 }
 0x16c   :  { %1373 = vmatpush1.bf16.msra.mxu0 %v9064_v28  ;;  %1414 = vmatpush1.bf16.msra.mxu1 %v9065_v35 }
 0x16d   :  { %1707 = vmatprep.subr.bf16.mxu0 %v9253_v50  ;;  %1748 = vmatprep.subr.bf16.mxu1 %v9262_v54  ;;  %v896_v50 = vpop.f32.mrf.mxu1 }
 0x16f   :  { %1391 = vmatmul.mubr.bf16.vlgmr.msra.gmra.mxu0 %v1165_v34  ;;  %1432 = vmatmul.mubr.bf16.vlgmr.msra.gmra.mxu1 %v1165_v34  ;;  %v897_v54 = vpop.f32.mrf.mxu1 }
 0x170   :  { %1708 = vmatpush1.bf16.msra.mxu0 %v9251_v49  ;;  %1749 = vmatpush1.bf16.msra.mxu1 %v9257_v52  ;;  %v272_v49 = vld [vmem:[%s10990_s7] sm:$0xf] }
 0x171   :  { %1709 = vmatprep.subr.bf16.mxu0 %v9255_v51  ;;  %1750 = vmatprep.subr.bf16.mxu1 %v9275_v57  ;;  %v11212_v51 = vsub.s32 0, %v9447_v40 }
 0x172   :  { %1739 = vmatprep.mubr.bf16.mxu0 %v11211_v43  ;;  %1780 = vmatprep.mubr.bf16.mxu1 %v11211_v43 }
 0x173   :  { %v9547_v52 = vrot.slane %v272_v49, %v11212_v51 }
 0x174   :  { %1710 = vmatpush1.bf16.msra.mxu0 %v9260_v53  ;;  %1751 = vmatpush1.bf16.msra.mxu1 %v9277_v58 }
 0x175   :  { %1711 = vmatprep.subr.bf16.mxu0 %v9264_v55  ;;  %1752 = vmatprep.subr.bf16.mxu1 %v9285_v61 }
 0x178   :  { %1712 = vmatpush1.bf16.msra.mxu0 %v9270_v56  ;;  %1753 = vmatpush1.bf16.msra.mxu1 %v9288_v62 }
 0x179   :  { %1713 = vmatprep.subr.bf16.mxu0 %v9281_v59  ;;  %1754 = vmatprep.subr.bf16.mxu1 %v9297_v2  ;;  %v11213_v2 = vsub.s32 1, %v9447_v40 }
 0x17c   :  { %1714 = vmatpush1.bf16.msra.mxu0 %v9283_v60  ;;  %1755 = vmatpush1.bf16.msra.mxu1 %v9300_v3  ;;  %v9552_v3 = vrot.slane %v272_v49, %v11213_v2  ;;  %v11221_v2 = vld [vmem:[#allocation14_spill] sm:$0xff] }
 0x17d   :  { %1715 = vmatprep.subr.bf16.mxu0 %v9293_v63  ;;  %1756 = vmatprep.subr.bf16.mxu1 %v9309_v6 }
 0x180   :  { %1716 = vmatpush1.bf16.msra.mxu0 %v9295_v1  ;;  %1757 = vmatpush1.bf16.msra.mxu1 %v9312_v7 }
 0x181   :  { %1717 = vmatprep.subr.bf16.mxu0 %v9305_v4  ;;  %1758 = vmatprep.subr.bf16.mxu1 %v9321_v10 }
 0x184   :  { %1718 = vmatpush1.bf16.msra.mxu0 %v9307_v5  ;;  %1759 = vmatpush1.bf16.msra.mxu1 %v9324_v11 }
 0x185   :  { %1719 = vmatprep.subr.bf16.mxu0 %v9317_v8  ;;  %1760 = vmatprep.subr.bf16.mxu1 %v9333_v14  ;;  %v11215_v14 = vsub.s32 2, %v9447_v40 }
 0x188   :  { %1720 = vmatpush1.bf16.msra.mxu0 %v9319_v9  ;;  %1761 = vmatpush1.bf16.msra.mxu1 %v9336_v15  ;;  %v11214_v9 = vsub.s32 3, %v9447_v40  ;;  %v9562_v15 = vrot.slane %v272_v49, %v11215_v14  ;;  %v11230_v14 = vld [vmem:[#allocation23_spill] sm:$0xff] }
 0x189   :  { %1721 = vmatprep.subr.bf16.mxu0 %v9329_v12  ;;  %1762 = vmatprep.subr.bf16.mxu1 %v9341_v16 }
 0x18a   :  { %v9558_v10 = vrot.slane %v272_v49, %v11214_v9  ;;  %v11226_v9 = vld [vmem:[#allocation19_spill] sm:$0xff] }
 0x18c   :  { %1722 = vmatpush1.bf16.msra.mxu0 %v9331_v13  ;;  %1763 = vmatpush1.bf16.msra.mxu1 %v9344_v17 }
 0x18d   :  { %1952 = vmatprep.subr.bf16.mxu0 %v9349_v18  ;;  %1993 = vmatprep.subr.bf16.mxu1 %v9351_v19 }
 0x20f   :  { %v1093_v53 = vpop.f32.mrf.mxu0  ;;  %v1134_v55 = vpop.f32.mrf.mxu1 }
 0x210   :  { %v1094_v56 = vadd.f32 %v1093_v53, %v851_v42  ;;  %v1135_v16 = vadd.f32 %v1134_v55, %v9506_v36 }
 0x211   :  { %v1095_v57 = vpop.f32.mrf.mxu0  ;;  %v1136_v58 = vpop.f32.mrf.mxu1 }
 0x212   :  { %v1141_v59 = vadd.f32 %v1094_v56, %v9547_v52  ;;  %v1096_v4 = vadd.f32 %v1095_v57, %v9500_v25  ;;  %v1137_v11 = vadd.f32 %v1136_v58, %v894_v26  ;;  %v1143_v23 = vadd.f32 %v1135_v16, %v9562_v15  ;;  %v11231_v16 = vld [vmem:[#allocation24_spill] sm:$0xff] }
 0x213   :  { %v1097_v60 = vpop.f32.mrf.mxu0  ;;  %v1138_v61 = vpop.f32.mrf.mxu1 }
 0x214   :  { %v7563_v62 = vmul.f32 -1.442695, %v1141_v59  ;;  %v1142_v5 = vadd.f32 %v1096_v4, %v9552_v3  ;;  %v1144_v41 = vadd.f32 %v1137_v11, %v9558_v10  ;;  %v11216_v59 = vld [vmem:[#allocation9_spill] sm:$0xff]  ;;  %v11222_v4 = vld [vmem:[#allocation15_spill] sm:$0xff]  ;;  %v11227_v11 = vld [vmem:[#allocation20_spill] sm:$0xff] }
 0x215   :  { %v1098_v63 = vpop.f32.mrf.mxu0  ;;  %v1139_v1 = vpop.f32.mrf.mxu1 }
 0x216   :  { %8884 = vpow2.f32 %v7563_v62  ;;  %v7564_v6 = vmul.f32 -1.442695, %v1142_v5  ;;  %v11217_v62 = vld [vmem:[#allocation10_spill] sm:$0xff]  ;;  %v11218_v63 = vld [vmem:[#allocation11_spill] sm:$0xff]  ;;  %v11220_v1 = vld [vmem:[#allocation13_spill] sm:$0xff] }
 0x218   :  { %8886 = vpow2.f32 %v7564_v6  ;;  %v11223_v6 = vld [vmem:[#allocation16_spill] sm:$0xff] }
 0x223   :  { %v8885_v7 = vpop.eup %8884 }
 0x224   :  { %v1151_v8 = vadd.f32 1.0, %v8885_v7  ;;  %v11224_v7 = vld [vmem:[#allocation17_spill] sm:$0xff] }
 0x225   :  { %v8887_v39 = vpop.eup %8886 }
 0x226   :  { %8888 = vrcp.f32 %v1151_v8  ;;  %v1152_v28 = vadd.f32 1.0, %v8887_v39  ;;  %v11225_v8 = vld [vmem:[#allocation18_spill] sm:$0xff]  ;;  %v11234_v39 = vld [vmem:[#allocation27_spill] sm:$0xff] }
 0x22f   :  { %v1392_v12 = vpop.f32.mrf.mxu0  ;;  %v1433_v13 = vpop.f32.mrf.mxu1 }
 0x230   :  { %v1444_v17 = vrot.slane %v1392_v12, 6  ;;  %v1446_v58 = vrot.slane %v1433_v13, 6  ;;  %v11228_v12 = vld [vmem:[#allocation21_spill] sm:$0xff]  ;;  %v11229_v13 = vld [vmem:[#allocation22_spill] sm:$0xff] }
 0x231   :  { %v1394_v18 = vpop.f32.mrf.mxu0  ;;  %v1435_v19 = vpop.f32.mrf.mxu1 }
 0x232   :  { %v1452_v30 = vadd.f32 %v1444_v17, %v9472_v27  ;;  %v1445_v34 = vrot.slane %v1394_v18, 6  ;;  %v1447_v56 = vrot.slane %v1435_v19, 6  ;;  %v11232_v17 = vld [vmem:[#allocation25_spill] sm:$0xff]  ;;  %v11233_v19 = vld [vmem:[#allocation26_spill] sm:$0xff] }
 0x233   :  { %v8889_v29 = vpop.eup %8888  ;;  %v1396_v45 = vpop.f32.mrf.mxu0 }
 0x234   :  { %v1437_v48 = vpop.f32.mrf.mxu1  ;;  %v1157_v38 = vmul.f32 %v8889_v29, %v1144_v41  ;;  %v7597_v42 = vmul.f32 -1.442695, %v1452_v30  ;;  %v1453_v46 = vadd.f32 %v1445_v34, %v9475_v31  ;;  %v11235_v41 = vld [vmem:[#allocation28_spill] sm:$0xff]  ;;  %v11236_v30 = vld [vmem:[#allocation29_spill] sm:$0xff] }
 0x235   :  { %v1397_v40 = vpop.f32.mrf.mxu0  ;;  %v11237_v48 = vld [vmem:[#allocation30_spill] sm:$0xff] }
 0x236   :  { %v1438_v25 = vpop.f32.mrf.mxu1  ;;  %v1158_v35 = vadd.f32 %v1157_v38, %v1143_v23  ;;  %8890 = vpow2.f32 %v7597_v42  ;;  %v7598_v50 = vmul.f32 -1.442695, %v1453_v46  ;;  %v11238_v23 = vld [vmem:[#allocation31_spill] sm:$0xff]  ;;  %v11239_v38 = vld [vmem:[#allocation32_spill] sm:$0xff]  ;;  %v11240_v42 = vld [vmem:[#allocation33_spill] sm:$0xff] }
 0x237   :  { %v9611_v40 = vld [vmem:[#allocation2 + $0xe4] ss:$16 sps:$4 sm:$0xff]   ;;  %v9613_v25 = vld [vmem:[#allocation2 + $0xec] ss:$16 sps:$4 sm:$0xff]   ;;  %11265 = vst [vmem:[#allocation31_spill] sm:$0xff] %v9777_v32 }
 0x238   :  { %8892 = vtanh.f32 %v1158_v35  ;;  %v11241_v46 = vld [vmem:[#allocation34_spill] sm:$0xff] }
 0x239   :  { %8894 = vrcp.f32 %v1152_v28 }
 0x243   :  { %v8891_v24 = vpop.eup %8890 }
 0x244   :  { %v1462_v36 = vadd.f32 1.0, %v8891_v24  ;;  %v11242_v24 = vld [vmem:[#allocation35_spill] sm:$0xff] }
 0x245   :  { %v8893_v26 = vpop.eup %8892 }
 0x246   :  { %8896 = vrcp.f32 %v1462_v36  ;;  %v1160_v54 = vsub.f32 %v9241_v47, %v8893_v26  ;;  %v8895_v49 = vpop.eup %8894  ;;  %v1455_v47 = vadd.f32 %v1447_v56, %v9478_v37  ;;  %v9631_v56 = vld [vmem:[#allocation2 + $0xc8] ss:$16 sps:$4 sm:$0xff]  }
 0x247   :  { %8898 = vpow2.f32 %v7598_v50  ;;  %v9621_v50 = vld [vmem:[#allocation2 + $0xe8] ss:$16 sps:$4 sm:$0xff]  }
 0x248   :  { %v1161_v51 = vmul.f32 %v8895_v49, %v1160_v54  ;;  %v9623_v49 = vld [vmem:[#allocation2 + $0xc4] ss:$16 sps:$4 sm:$0xff]  }
 0x24a   :  { %v1162_v53 = vadd.f32 %v8893_v26, %v1161_v51  ;;  %v9619_v26 = vld [vmem:[#allocation2 + $0xe0] ss:$16 sps:$4 sm:$0xff]   ;;  %v9625_v51 = vld [vmem:[#allocation2 + $0xcc] ss:$16 sps:$4 sm:$0xff]  }
 0x24c   :  { %1163 = vst [vmem:[%s10991_s8] sm:$0x3] %v1162_v53  ;;  %v9574_v55 = vmul.f32 %v1162_v53, %v9494_v0  ;;  %v1454_v0 = vadd.f32 %v1446_v58, %v9480_v44  ;;  %v9629_v53 = vld [vmem:[#allocation2 + $0xc0] ss:$16 sps:$4 sm:$0xff]   ;;  %v9637_v58 = vld [vmem:[#allocation2 + $0xac] ss:$16 sps:$4 sm:$0xff]  }
 0x24e   :  { %v1514_v57 = vpack.c.bf16 %v9574_v55, %v9574_v55 }
 0x250   :  { %1740 = vmatmul.mubr.bf16.vlgmr.msra.gmra.mxu0 %v1514_v57  ;;  %1781 = vmatmul.mubr.bf16.vlgmr.msra.gmra.mxu1 %v1514_v57  ;;  %v9635_v57 = vld [vmem:[#allocation2 + $0xa4] ss:$16 sps:$4 sm:$0xff]  }
 0x251   :  { %1953 = vmatpush1.bf16.msra.mxu0 %v9353_v20  ;;  %1994 = vmatpush1.bf16.msra.mxu1 %v9355_v21  ;;  %v11219_v21 = vld [vmem:[#allocation12_spill] sm:$0xff] }
 0x252   :  { %1954 = vmatprep.subr.bf16.mxu0 %v9362_v22  ;;  %1995 = vmatprep.subr.bf16.mxu1 %v11216_v59  ;;  %v9645_v59 = vld [vmem:[#allocation2 + $0xa8] ss:$16 sps:$4 sm:$0xff]  }
 0x253   :  { %v8897_v60 = vpop.eup %8896  ;;  %1984 = vmatprep.mubr.bf16.mxu0 %v11211_v43  ;;  %2025 = vmatprep.mubr.bf16.mxu1 %v11211_v43 }
 0x254   :  { %v1468_v61 = vmul.f32 %v8897_v60, %v1455_v47  ;;  %v8899_v22 = vpop.eup %8898  ;;  %v9643_v47 = vld [vmem:[#allocation2 + $0xa0] ss:$16 sps:$4 sm:$0xff]   ;;  %v9649_v60 = vld [vmem:[#allocation2 + $0x84] ss:$16 sps:$4 sm:$0xff]  }
 0x255   :  { %1955 = vmatpush1.bf16.msra.mxu0 %v11217_v62  ;;  %1996 = vmatpush1.bf16.msra.mxu1 %v11218_v63  ;;  %v1463_v5 = vadd.f32 1.0, %v8899_v22  ;;  %v9657_v62 = vld [vmem:[#allocation2 + $0x88] ss:$16 sps:$4 sm:$0xff]   ;;  %v9661_v63 = vld [vmem:[#allocation2 + $0x64] ss:$16 sps:$4 sm:$0xff]  }
 0x256   :  { %v1469_v20 = vadd.f32 %v1468_v61, %v1454_v0  ;;  %1956 = vmatprep.subr.bf16.mxu0 %v11219_v21  ;;  %1997 = vmatprep.subr.bf16.mxu1 %v11220_v1  ;;  %v9651_v0 = vld [vmem:[#allocation2 + $0x8c] ss:$16 sps:$4 sm:$0xff]   ;;  %v9655_v61 = vld [vmem:[#allocation2 + $0x80] ss:$16 sps:$4 sm:$0xff]   ;;  %v9669_v1 = vld [vmem:[#allocation2 + $0x68] ss:$16 sps:$4 sm:$0xff]  }
 0x257   :  { %v9667_v21 = vld [vmem:[#allocation2 + $0x60] ss:$16 sps:$4 sm:$0xff]   ;;  %v9673_v22 = vld [vmem:[#allocation2 + $0x44] ss:$16 sps:$4 sm:$0xff]  }
 0x258   :  { %8900 = vtanh.f32 %v1469_v20  ;;  %v9663_v20 = vld [vmem:[#allocation2 + $0x6c] ss:$16 sps:$4 sm:$0xff]  }
 0x259   :  { %1957 = vmatpush1.bf16.msra.mxu0 %v11221_v2  ;;  %1998 = vmatpush1.bf16.msra.mxu1 %v11222_v4  ;;  %8902 = vrcp.f32 %v1463_v5  ;;  %v9675_v2 = vld [vmem:[#allocation2 + $0x4c] ss:$16 sps:$4 sm:$0xff]   ;;  %v9680_v4 = vld [vmem:[%s10984_s1 + $0x4] sm:$0x3]  ;;  %v9684_v5 = vld [vmem:[#allocation2 + $0x40] ss:$16 sps:$4 sm:$0xff]  }
 0x25a   :  { %1958 = vmatprep.subr.bf16.mxu0 %v11223_v6  ;;  %1999 = vmatprep.subr.bf16.mxu1 %v11224_v7  ;;  %v9686_v6 = vld [vmem:[#allocation2 + $0x48] ss:$16 sps:$4 sm:$0xff]   ;;  %v9690_v7 = vld [vmem:[#allocation2 + $0x24] ss:$16 sps:$4 sm:$0xff]  }
 0x25d   :  { %1959 = vmatpush1.bf16.msra.mxu0 %v11225_v8  ;;  %2000 = vmatpush1.bf16.msra.mxu1 %v11226_v9  ;;  %v9692_v8 = vld [vmem:[#allocation2 + $0x2c] ss:$16 sps:$4 sm:$0xff]   ;;  %v2059_v9 = vrot.slane %v9680_v4, 6 }
 0x25e   :  { %1960 = vmatprep.subr.bf16.mxu0 %v11227_v11  ;;  %2001 = vmatprep.subr.bf16.mxu1 %v11228_v12  ;;  %v9697_v11 = vld [vmem:[#allocation2 + $0x20] ss:$16 sps:$4 sm:$0xff]   ;;  %v9699_v12 = vld [vmem:[#allocation2 + $0x28] ss:$16 sps:$4 sm:$0xff]  }
 0x261   :  { %1961 = vmatpush1.bf16.msra.mxu0 %v11229_v13  ;;  %2002 = vmatpush1.bf16.msra.mxu1 %v11230_v14  ;;  %v9703_v13 = vld [vmem:[#allocation2 + $0x4] ss:$16 sps:$4 sm:$0xff]   ;;  %v9705_v14 = vld [vmem:[#allocation2 + $0xc] ss:$16 sps:$4 sm:$0xff]  }
 0x262   :  { %1962 = vmatprep.subr.bf16.mxu0 %v11231_v16  ;;  %2003 = vmatprep.subr.bf16.mxu1 %v11232_v17  ;;  %11243 = vst [vmem:[#allocation9_spill] sm:$0xff] %v9705_v14  ;;  %v9711_v17 = vld [vmem:[#allocation2] ss:$16 sps:$4 sm:$0xff]  }
 0x263   :  { %11244 = vst [vmem:[#allocation10_spill] sm:$0xff] %v9711_v17 }
 0x265   :  { %v8901_v18 = vpop.eup %8900  ;;  %1963 = vmatpush1.bf16.msra.mxu0 %v11233_v19  ;;  %2004 = vmatpush1.bf16.msra.mxu1 %v11234_v39 }
 0x266   :  { %1964 = vmatprep.subr.bf16.mxu0 %v11235_v41  ;;  %2005 = vmatprep.subr.bf16.mxu1 %v11236_v30  ;;  %v1472_v29 = vrot.slane %v8901_v18, 2  ;;  %v8903_v35 = vpop.eup %8902  ;;  %v9723_v41 = vld [vmem:[#allocation6 + $0xe4] ss:$16 sps:$4 sm:$0xff]   ;;  %v9725_v30 = vld [vmem:[#allocation6 + $0xec] ss:$16 sps:$4 sm:$0xff]  }
 0x267   :  { %11246 = vst [vmem:[#allocation12_spill] sm:$0xff] %v9723_v41  ;;  %11247 = vst [vmem:[#allocation13_spill] sm:$0xff] %v9725_v30 }
 0x268   :  { %v1474_v45 = vsub.f32 %v9498_v33, %v1472_v29  ;;  %v9727_v29 = vld [vmem:[#allocation6 + $0xe0] ss:$16 sps:$4 sm:$0xff]  }
 0x269   :  { %1965 = vmatpush1.bf16.msra.mxu0 %v11237_v48  ;;  %2006 = vmatpush1.bf16.msra.mxu1 %v11238_v23  ;;  %11248 = vst [vmem:[#allocation14_spill] sm:$0xff] %v9727_v29  ;;  %v9735_v48 = vld [vmem:[#allocation6 + $0xc4] ss:$16 sps:$4 sm:$0xff]   ;;  %v9737_v23 = vld [vmem:[#allocation6 + $0xcc] ss:$16 sps:$4 sm:$0xff]  }
 0x26a   :  { %1966 = vmatprep.subr.bf16.mxu0 %v11239_v38  ;;  %2007 = vmatprep.subr.bf16.mxu1 %v11240_v42  ;;  %v1476_v28 = vrot.slane %v1474_v45, 6  ;;  %v9729_v45 = vld [vmem:[#allocation6 + $0xe8] ss:$16 sps:$4 sm:$0xff]   ;;  %11250 = vst [vmem:[#allocation16_spill] sm:$0xff] %v9735_v48  ;;  %11251 = vst [vmem:[#allocation17_spill] sm:$0xff] %v9737_v23 }
 0x26b   :  { %11249 = vst [vmem:[#allocation15_spill] sm:$0xff] %v9729_v45  ;;  %v9739_v38 = vld [vmem:[#allocation6 + $0xc0] ss:$16 sps:$4 sm:$0xff]   ;;  %v9741_v42 = vld [vmem:[#allocation6 + $0xc8] ss:$16 sps:$4 sm:$0xff]  }
 0x26c   :  { %v1478_v34 = vmul.f32 %v8903_v35, %v1476_v28  ;;  %11252 = vst [vmem:[#allocation18_spill] sm:$0xff] %v9739_v38  ;;  %11253 = vst [vmem:[#allocation19_spill] sm:$0xff] %v9741_v42  ;;  %v9747_v28 = vld [vmem:[#allocation6 + $0xa4] ss:$16 sps:$4 sm:$0xff]   ;;  %v9749_v35 = vld [vmem:[#allocation6 + $0xac] ss:$16 sps:$4 sm:$0xff]  }
 0x26d   :  { %1967 = vmatpush1.bf16.msra.mxu0 %v11241_v46  ;;  %2008 = vmatpush1.bf16.msra.mxu1 %v11242_v24  ;;  %11254 = vst [vmem:[#allocation20_spill] sm:$0xff] %v9747_v28  ;;  %11255 = vst [vmem:[#allocation21_spill] sm:$0xff] %v9749_v35  ;;  %v9753_v46 = vld [vmem:[#allocation6 + $0xa8] ss:$16 sps:$4 sm:$0xff]   ;;  %v9759_v24 = vld [vmem:[#allocation6 + $0x84] ss:$16 sps:$4 sm:$0xff]  }
 0x26e   :  { %2258 = vmatprep.subr.bf16.mxu0 %v9611_v40  ;;  %2299 = vmatprep.subr.bf16.mxu1 %v9613_v25  ;;  %v1479_v33 = vadd.f32 %v8901_v18, %v1478_v34  ;;  %v9713_v18 = vld [vmem:[#allocation2 + $0x8] ss:$16 sps:$4 sm:$0xff]   ;;  %v9751_v34 = vld [vmem:[#allocation6 + $0xa0] ss:$16 sps:$4 sm:$0xff]   ;;  %11257 = vst [vmem:[#allocation23_spill] sm:$0xff] %v9753_v46  ;;  %11258 = vst [vmem:[#allocation24_spill] sm:$0xff] %v9759_v24 }
 0x26f   :  { %11245 = vst [vmem:[#allocation11_spill] sm:$0xff] %v9713_v18  ;;  %11256 = vst [vmem:[#allocation22_spill] sm:$0xff] %v9751_v34 }
 0x270   :  { %v1481_v36 = vpack.c.bf16 %v1479_v33, %v1479_v33  ;;  %v9707_v16 = vmul.f32 %v2059_v9, %v1479_v33  ;;  %v9761_v33 = vld [vmem:[#allocation6 + $0x8c] ss:$16 sps:$4 sm:$0xff]   ;;  %v9771_v9 = vld [vmem:[#allocation6 + $0x64] ss:$16 sps:$4 sm:$0xff]  }
 0x271   :  { %11259 = vst [vmem:[#allocation25_spill] sm:$0xff] %v9761_v33  ;;  %11262 = vst [vmem:[#allocation28_spill] sm:$0xff] %v9771_v9 }
 0x272   :  { %v1790_v54 = vrot.slane %v1481_v36, 1  ;;  %v2062_v19 = vpack.c.bf16 %v9707_v16, %v9707_v16  ;;  %v9763_v36 = vld [vmem:[#allocation6 + $0x80] ss:$16 sps:$4 sm:$0xff]  }
 0x273   :  { %11260 = vst [vmem:[#allocation26_spill] sm:$0xff] %v9763_v36 }
 0x274   :  { %1985 = vmatmul.mubr.bf16.vlgmr.msra.gmra.mxu0 %v1790_v54  ;;  %2026 = vmatmul.mubr.bf16.vlgmr.msra.gmra.mxu1 %v1790_v54  ;;  %v2096_v39 = vrot.slane %v2062_v19, 1  ;;  %v9765_v54 = vld [vmem:[#allocation6 + $0x88] ss:$16 sps:$4 sm:$0xff]   ;;  %v9773_v19 = vld [vmem:[#allocation6 + $0x6c] ss:$16 sps:$4 sm:$0xff]  }
 0x275   :  { %2259 = vmatpush1.bf16.msra.mxu0 %v9619_v26  ;;  %2300 = vmatpush1.bf16.msra.mxu1 %v9621_v50  ;;  %11261 = vst [vmem:[#allocation27_spill] sm:$0xff] %v9765_v54  ;;  %11263 = vst [vmem:[#allocation29_spill] sm:$0xff] %v9773_v19 }
 0x276   :  { %2260 = vmatprep.subr.bf16.mxu0 %v9623_v49  ;;  %2301 = vmatprep.subr.bf16.mxu1 %v9625_v51 }
 0x277   :  { %2290 = vmatprep.mubr.bf16.mxu0 %v11211_v43  ;;  %2331 = vmatprep.mubr.bf16.mxu1 %v11211_v43 }
 0x279   :  { %2261 = vmatpush1.bf16.msra.mxu0 %v9629_v53  ;;  %2302 = vmatpush1.bf16.msra.mxu1 %v9631_v56 }
 0x27a   :  { %2262 = vmatprep.subr.bf16.mxu0 %v9635_v57  ;;  %2303 = vmatprep.subr.bf16.mxu1 %v9637_v58 }
 0x27d   :  { %2263 = vmatpush1.bf16.msra.mxu0 %v9643_v47  ;;  %2304 = vmatpush1.bf16.msra.mxu1 %v9645_v59 }
 0x27e   :  { %2264 = vmatprep.subr.bf16.mxu0 %v9649_v60  ;;  %2305 = vmatprep.subr.bf16.mxu1 %v9651_v0 }
 0x281   :  { %2265 = vmatpush1.bf16.msra.mxu0 %v9655_v61  ;;  %2306 = vmatpush1.bf16.msra.mxu1 %v9657_v62 }
 0x282   :  { %2266 = vmatprep.subr.bf16.mxu0 %v9661_v63  ;;  %2307 = vmatprep.subr.bf16.mxu1 %v9663_v20 }
 0x285   :  { %2267 = vmatpush1.bf16.msra.mxu0 %v9667_v21  ;;  %2308 = vmatpush1.bf16.msra.mxu1 %v9669_v1 }
 0x286   :  { %2268 = vmatprep.subr.bf16.mxu0 %v9673_v22  ;;  %2309 = vmatprep.subr.bf16.mxu1 %v9675_v2 }
 0x289   :  { %2269 = vmatpush1.bf16.msra.mxu0 %v9684_v5  ;;  %2310 = vmatpush1.bf16.msra.mxu1 %v9686_v6 }
 0x28a   :  { %2270 = vmatprep.subr.bf16.mxu0 %v9690_v7  ;;  %2311 = vmatprep.subr.bf16.mxu1 %v9692_v8 }
 0x28d   :  { %2271 = vmatpush1.bf16.msra.mxu0 %v9697_v11  ;;  %2312 = vmatpush1.bf16.msra.mxu1 %v9699_v12 }
 0x28e   :  { %2272 = vmatprep.subr.bf16.mxu0 %v9703_v13  ;;  %2313 = vmatprep.subr.bf16.mxu1 %v9705_v14 }
 0x291   :  { %2273 = vmatpush1.bf16.msra.mxu0 %v9711_v17  ;;  %2314 = vmatpush1.bf16.msra.mxu1 %v9713_v18 }
 0x292   :  { %2607 = vmatprep.subr.bf16.mxu0 %v9723_v41  ;;  %2648 = vmatprep.subr.bf16.mxu1 %v9725_v30 }
 0x294   :  { %2291 = vmatmul.mubr.bf16.vlgmr.msra.gmra.mxu0 %v2096_v39  ;;  %2332 = vmatmul.mubr.bf16.vlgmr.msra.gmra.mxu1 %v2096_v39  ;;  %v9775_v39 = vld [vmem:[#allocation6 + $0x60] ss:$16 sps:$4 sm:$0xff]  }
 0x295   :  { %2639 = vmatprep.mubr.bf16.mxu0 %v11211_v43  ;;  %2680 = vmatprep.mubr.bf16.mxu1 %v11211_v43  ;;  %11264 = vst [vmem:[#allocation30_spill] sm:$0xff] %v9775_v39 }
 0x296   :  { %2608 = vmatpush1.bf16.msra.mxu0 %v9727_v29  ;;  %2649 = vmatpush1.bf16.msra.mxu1 %v9729_v45 }
 0x297   :  { %2609 = vmatprep.subr.bf16.mxu0 %v9735_v48  ;;  %2650 = vmatprep.subr.bf16.mxu1 %v9737_v23 }
 0x29a   :  { %2610 = vmatpush1.bf16.msra.mxu0 %v9739_v38  ;;  %2651 = vmatpush1.bf16.msra.mxu1 %v9741_v42 }
 0x29b   :  { %2611 = vmatprep.subr.bf16.mxu0 %v9747_v28  ;;  %2652 = vmatprep.subr.bf16.mxu1 %v9749_v35 }
 0x29e   :  { %2612 = vmatpush1.bf16.msra.mxu0 %v9751_v34  ;;  %2653 = vmatpush1.bf16.msra.mxu1 %v9753_v46 }
 0x29f   :  { %2613 = vmatprep.subr.bf16.mxu0 %v9759_v24  ;;  %2654 = vmatprep.subr.bf16.mxu1 %v9761_v33  ;;  %v9783_v33 = vld [vmem:[#allocation6 + $0x44] ss:$16 sps:$4 sm:$0xff]   ;;  %v9789_v24 = vld [vmem:[#allocation6 + $0x48] ss:$16 sps:$4 sm:$0xff]  }
 0x2a0   :  { %11266 = vst [vmem:[#allocation32_spill] sm:$0xff] %v9783_v33  ;;  %11269 = vst [vmem:[#allocation35_spill] sm:$0xff] %v9789_v24 }
 0x2a2   :  { %2614 = vmatpush1.bf16.msra.mxu0 %v9763_v36  ;;  %2655 = vmatpush1.bf16.msra.mxu1 %v9765_v54  ;;  %v9785_v36 = vld [vmem:[#allocation6 + $0x4c] ss:$16 sps:$4 sm:$0xff]   ;;  %v9787_v54 = vld [vmem:[#allocation6 + $0x40] ss:$16 sps:$4 sm:$0xff]  }
 0x2a3   :  { %2615 = vmatprep.subr.bf16.mxu0 %v9771_v9  ;;  %2656 = vmatprep.subr.bf16.mxu1 %v9773_v19  ;;  %11267 = vst [vmem:[#allocation33_spill] sm:$0xff] %v9785_v36  ;;  %11268 = vst [vmem:[#allocation34_spill] sm:$0xff] %v9787_v54  ;;  %v9795_v19 = vld [vmem:[#allocation6 + $0x24] ss:$16 sps:$4 sm:$0xff]   ;;  %v9801_v9 = vld [vmem:[#allocation6 + $0x28] ss:$16 sps:$4 sm:$0xff]  }
 0x2a4   :  { %11270 = vst [vmem:[#allocation40_spill] sm:$0xff] %v9795_v19  ;;  %11273 = vst [vmem:[#allocation43_spill] sm:$0xff] %v9801_v9 }
 0x2a6   :  { %2616 = vmatpush1.bf16.msra.mxu0 %v9775_v39  ;;  %2657 = vmatpush1.bf16.msra.mxu1 %v9777_v32  ;;  %v9797_v39 = vld [vmem:[#allocation6 + $0x2c] ss:$16 sps:$4 sm:$0xff]   ;;  %v9799_v32 = vld [vmem:[#allocation6 + $0x20] ss:$16 sps:$4 sm:$0xff]  }
 0x2a7   :  { %2617 = vmatprep.subr.bf16.mxu0 %v9783_v33  ;;  %2658 = vmatprep.subr.bf16.mxu1 %v9785_v36  ;;  %11271 = vst [vmem:[#allocation41_spill] sm:$0xff] %v9797_v39  ;;  %11272 = vst [vmem:[#allocation42_spill] sm:$0xff] %v9799_v32  ;;  %v9807_v36 = vld [vmem:[#allocation6 + $0x4] ss:$16 sps:$4 sm:$0xff]   ;;  %v9813_v33 = vld [vmem:[#allocation6 + $0x8] ss:$16 sps:$4 sm:$0xff]  }
 0x2a8   :  { %11274 = vst [vmem:[#allocation44_spill] sm:$0xff] %v9807_v36  ;;  %11277 = vst [vmem:[#allocation47_spill] sm:$0xff] %v9813_v33 }
 0x2aa   :  { %2618 = vmatpush1.bf16.msra.mxu0 %v9787_v54  ;;  %2659 = vmatpush1.bf16.msra.mxu1 %v9789_v24  ;;  %v9809_v54 = vld [vmem:[#allocation6 + $0xc] ss:$16 sps:$4 sm:$0xff]   ;;  %v9811_v24 = vld [vmem:[#allocation6] ss:$16 sps:$4 sm:$0xff]  }
 0x2ab   :  { %2619 = vmatprep.subr.bf16.mxu0 %v9795_v19  ;;  %2660 = vmatprep.subr.bf16.mxu1 %v9797_v39  ;;  %11275 = vst [vmem:[#allocation45_spill] sm:$0xff] %v9809_v54  ;;  %11276 = vst [vmem:[#allocation46_spill] sm:$0xff] %v9811_v24  ;;  %v9819_v39 = vld [vmem:[#allocation4 + $0xe4] ss:$16 sps:$4 sm:$0xff]  }
 0x2ac   :  { %11278 = vst [vmem:[#allocation48_spill] sm:$0xff] %v9819_v39 }
 0x2ae   :  { %2620 = vmatpush1.bf16.msra.mxu0 %v9799_v32  ;;  %2661 = vmatpush1.bf16.msra.mxu1 %v9801_v9  ;;  %v9821_v32 = vld [vmem:[#allocation4 + $0xec] ss:$16 sps:$4 sm:$0xff]  }
 0x2af   :  { %2621 = vmatprep.subr.bf16.mxu0 %v9807_v36  ;;  %2662 = vmatprep.subr.bf16.mxu1 %v9809_v54  ;;  %11279 = vst [vmem:[#allocation49_spill] sm:$0xff] %v9821_v32 }
 0x2b2   :  { %2622 = vmatpush1.bf16.msra.mxu0 %v9811_v24  ;;  %2663 = vmatpush1.bf16.msra.mxu1 %v9813_v33 }
 0x2b3   :  { %2852 = vmatprep.subr.bf16.mxu0 %v9819_v39  ;;  %2893 = vmatprep.subr.bf16.mxu1 %v9821_v32 }
 0x310   :  { %v1741_v9 = vpop.f32.mrf.mxu0  ;;  %v1782_v19 = vpop.f32.mrf.mxu1 }
 0x312   :  { %v1743_v46 = vpop.f32.mrf.mxu0  ;;  %v1784_v34 = vpop.f32.mrf.mxu1 }
 0x314   :  { %v1745_v35 = vpop.f32.mrf.mxu0  ;;  %v1786_v36 = vpop.f32.mrf.mxu1 }
 0x316   :  { %v1746_v28 = vpop.f32.mrf.mxu0  ;;  %v1787_v54 = vpop.f32.mrf.mxu1 }
 0x334   :  { %v1986_v42 = vpop.f32.mrf.mxu0  ;;  %v2027_v24 = vpop.f32.mrf.mxu1 }
 0x335   :  { %v1987_v38 = vadd.f32 %v1986_v42, %v1741_v9  ;;  %v2028_v17 = vadd.f32 %v2027_v24, %v1782_v19 }
 0x336   :  { %v1988_v33 = vpop.f32.mrf.mxu0  ;;  %v2029_v23 = vpop.f32.mrf.mxu1 }
 0x337   :  { %v2034_v48 = vadd.f32 %v1987_v38, %v9547_v52  ;;  %v1989_v41 = vadd.f32 %v1988_v33, %v1743_v46  ;;  %v2030_v54 = vadd.f32 %v2029_v23, %v1784_v34 }
 0x338   :  { %v1990_v45 = vpop.f32.mrf.mxu0  ;;  %v2031_v29 = vpop.f32.mrf.mxu1 }
 0x339   :  { %v7663_v39 = vmul.f32 -1.442695, %v2034_v48  ;;  %v2035_v18 = vadd.f32 %v1989_v41, %v9552_v3 }
 0x33a   :  { %v1991_v30 = vpop.f32.mrf.mxu0  ;;  %v2032_v32 = vpop.f32.mrf.mxu1 }
 0x33b   :  { %8904 = vpow2.f32 %v7663_v39  ;;  %v7664_v35 = vmul.f32 -1.442695, %v2035_v18  ;;  %v2037_v30 = vadd.f32 %v2030_v54, %v9558_v10  ;;  %v2036_v18 = vadd.f32 %v2028_v17, %v9562_v15 }
 0x33d   :  { %8906 = vpow2.f32 %v7664_v35 }
 0x348   :  { %v8905_v36 = vpop.eup %8904 }
 0x349   :  { %v2044_v28 = vadd.f32 1.0, %v8905_v36 }
 0x34a   :  { %v8907_v29 = vpop.eup %8906 }
 0x34b   :  { %8908 = vrcp.f32 %v2044_v28  ;;  %v2045_v34 = vadd.f32 1.0, %v8907_v29 }
 0x354   :  { %v2292_v42 = vpop.f32.mrf.mxu0  ;;  %v2333_v9 = vpop.f32.mrf.mxu1 }
 0x355   :  { %v2344_v14 = vrot.slane %v2292_v42, 4 }
 0x356   :  { %v2294_v38 = vpop.f32.mrf.mxu0  ;;  %v2335_v45 = vpop.f32.mrf.mxu1 }
 0x357   :  { %v2352_v32 = vadd.f32 %v2344_v14, %v9472_v27  ;;  %v2345_v24 = vrot.slane %v2294_v38, 4  ;;  %v9838_v38 = vld [vmem:[#allocation4 + $0xe0] ss:$16 sps:$4 sm:$0xff]  }
 0x358   :  { %v8909_v48 = vpop.eup %8908  ;;  %v2296_v46 = vpop.f32.mrf.mxu0 }
 0x359   :  { %v2337_v41 = vpop.f32.mrf.mxu1  ;;  %v2050_v33 = vmul.f32 %v8909_v48, %v2037_v30  ;;  %v7698_v39 = vmul.f32 -1.442695, %v2352_v32  ;;  %v2353_v19 = vadd.f32 %v2345_v24, %v9475_v31  ;;  %v9840_v48 = vld [vmem:[#allocation4 + $0xe8] ss:$16 sps:$4 sm:$0xff]  }
 0x35a   :  { %v2297_v35 = vpop.f32.mrf.mxu0  ;;  %v2347_v41 = vrot.slane %v2335_v45, 4 }
 0x35b   :  { %v2338_v23 = vpop.f32.mrf.mxu1  ;;  %v2051_v36 = vadd.f32 %v2050_v33, %v2036_v18  ;;  %8910 = vpow2.f32 %v7698_v39  ;;  %v7699_v42 = vmul.f32 -1.442695, %v2353_v19  ;;  %v9846_v33 = vld [vmem:[#allocation4 + $0xcc] ss:$16 sps:$4 sm:$0xff]   ;;  %v2346_v39 = vrot.slane %v2333_v9, 4 }
 0x35c   :  { %v9852_v35 = vld [vmem:[#allocation4 + $0xc8] ss:$16 sps:$4 sm:$0xff]   ;;  %v2355_v45 = vadd.f32 %v2347_v41, %v9478_v37  ;;  %v9857_v23 = vld [vmem:[#allocation4 + $0xa4] ss:$16 sps:$4 sm:$0xff]   ;;  %v9866_v19 = vld [vmem:[#allocation4 + $0xa0] ss:$16 sps:$4 sm:$0xff]  }
 0x35d   :  { %8912 = vtanh.f32 %v2051_v36  ;;  %v2354_v36 = vadd.f32 %v2346_v39, %v9480_v44  ;;  %v9884_v41 = vld [vmem:[#allocation4 + $0x64] ss:$16 sps:$4 sm:$0xff]   ;;  %v9890_v39 = vld [vmem:[#allocation4 + $0x60] ss:$16 sps:$4 sm:$0xff]  }
 0x35e   :  { %8914 = vrcp.f32 %v2045_v34  ;;  %v9859_v34 = vld [vmem:[#allocation4 + $0xac] ss:$16 sps:$4 sm:$0xff]   ;;  %11282 = vst [vmem:[#allocation52_spill] sm:$0xff] %v9884_v41  ;;  %11284 = vst [vmem:[#allocation54_spill] sm:$0xff] %v9890_v39 }
 0x368   :  { %v8911_v28 = vpop.eup %8910 }
 0x369   :  { %v2362_v54 = vadd.f32 1.0, %v8911_v28  ;;  %v9868_v28 = vld [vmem:[#allocation4 + $0xa8] ss:$16 sps:$4 sm:$0xff]  }
 0x36a   :  { %v8913_v14 = vpop.eup %8912 }
 0x36b   :  { %8916 = vrcp.f32 %v2362_v54  ;;  %v2053_v46 = vsub.f32 %v9574_v55, %v8913_v14  ;;  %v8915_v17 = vpop.eup %8914  ;;  %v9844_v55 = vld [vmem:[#allocation4 + $0xc4] ss:$16 sps:$4 sm:$0xff]  }
 0x36c   :  { %8918 = vpow2.f32 %v7699_v42  ;;  %v9874_v42 = vld [vmem:[#allocation4 + $0x8c] ss:$16 sps:$4 sm:$0xff]  }
 0x36d   :  { %v2054_v30 = vmul.f32 %v8915_v17, %v2053_v46  ;;  %v9878_v17 = vld [vmem:[#allocation4 + $0x80] ss:$16 sps:$4 sm:$0xff]  }
 0x36e   :  { %11280 = vst [vmem:[#allocation50_spill] sm:$0xff] %v9878_v17 }
 0x36f   :  { %v2055_v32 = vadd.f32 %v8913_v14, %v2054_v30  ;;  %v9872_v14 = vld [vmem:[#allocation4 + $0x84] ss:$16 sps:$4 sm:$0xff]   ;;  %v9880_v30 = vld [vmem:[#allocation4 + $0x88] ss:$16 sps:$4 sm:$0xff]  }
 0x370   :  { %11281 = vst [vmem:[#allocation51_spill] sm:$0xff] %v9880_v30 }
 0x371   :  { %7665 = vst [vmem:[%s10991_s8 + $0x2] sm:$0x3] %v2055_v32  ;;  %v9836_v29 = vmul.f32 %v2055_v32, %v9680_v4  ;;  %v9850_v4 = vld [vmem:[#allocation4 + $0xc0] ss:$16 sps:$4 sm:$0xff]  }
 0x373   :  { %v2414_v18 = vpack.c.bf16 %v9836_v29, %v9836_v29 }
 0x375   :  { %2640 = vmatmul.mubr.bf16.vlgmr.msra.gmra.mxu0 %v2414_v18  ;;  %2681 = vmatmul.mubr.bf16.vlgmr.msra.gmra.mxu1 %v2414_v18  ;;  %v9886_v18 = vld [vmem:[#allocation4 + $0x6c] ss:$16 sps:$4 sm:$0xff]  }
 0x376   :  { %2853 = vmatpush1.bf16.msra.mxu0 %v9838_v38  ;;  %2894 = vmatpush1.bf16.msra.mxu1 %v9840_v48  ;;  %11283 = vst [vmem:[#allocation53_spill] sm:$0xff] %v9886_v18 }
 0x377   :  { %2854 = vmatprep.subr.bf16.mxu0 %v9844_v55  ;;  %2895 = vmatprep.subr.bf16.mxu1 %v9846_v33 }
 0x378   :  { %v8917_v9 = vpop.eup %8916  ;;  %2884 = vmatprep.mubr.bf16.mxu0 %v11211_v43  ;;  %2925 = vmatprep.mubr.bf16.mxu1 %v11211_v43 }
 0x379   :  { %v2368_v24 = vmul.f32 %v8917_v9, %v2355_v45  ;;  %v8919_v46 = vpop.eup %8918  ;;  %v9892_v45 = vld [vmem:[#allocation4 + $0x68] ss:$16 sps:$4 sm:$0xff]   ;;  %v9896_v9 = vld [vmem:[#allocation4 + $0x44] ss:$16 sps:$4 sm:$0xff]  }
 0x37a   :  { %2855 = vmatpush1.bf16.msra.mxu0 %v9850_v4  ;;  %2896 = vmatpush1.bf16.msra.mxu1 %v9852_v35  ;;  %v2363_v32 = vadd.f32 1.0, %v8919_v46  ;;  %11285 = vst [vmem:[#allocation55_spill] sm:$0xff] %v9892_v45  ;;  %11286 = vst [vmem:[#allocation56_spill] sm:$0xff] %v9896_v9  ;;  %v9908_v46 = vld [vmem:[#allocation4 + $0x24] ss:$16 sps:$4 sm:$0xff]  }
 0x37b   :  { %v2369_v54 = vadd.f32 %v2368_v24, %v2354_v36  ;;  %2856 = vmatprep.subr.bf16.mxu0 %v9857_v23  ;;  %2897 = vmatprep.subr.bf16.mxu1 %v9859_v34  ;;  %v9898_v36 = vld [vmem:[#allocation4 + $0x4c] ss:$16 sps:$4 sm:$0xff]   ;;  %v9902_v24 = vld [vmem:[#allocation4 + $0x40] ss:$16 sps:$4 sm:$0xff]   ;;  %11290 = vst [vmem:[#allocation60_spill] sm:$0xff] %v9908_v46 }
 0x37c   :  { %11287 = vst [vmem:[#allocation57_spill] sm:$0xff] %v9898_v36  ;;  %11288 = vst [vmem:[#allocation58_spill] sm:$0xff] %v9902_v24 }
 0x37d   :  { %8920 = vtanh.f32 %v2369_v54  ;;  %v9904_v54 = vld [vmem:[#allocation4 + $0x48] ss:$16 sps:$4 sm:$0xff]  }
 0x37e   :  { %2857 = vmatpush1.bf16.msra.mxu0 %v9866_v19  ;;  %2898 = vmatpush1.bf16.msra.mxu1 %v9868_v28  ;;  %8922 = vrcp.f32 %v2363_v32  ;;  %11289 = vst [vmem:[#allocation59_spill] sm:$0xff] %v9904_v54  ;;  %v9910_v32 = vld [vmem:[#allocation4 + $0x2c] ss:$16 sps:$4 sm:$0xff]  }
 0x37f   :  { %2858 = vmatprep.subr.bf16.mxu0 %v9872_v14  ;;  %2899 = vmatprep.subr.bf16.mxu1 %v9874_v42  ;;  %11291 = vst [vmem:[#allocation61_spill] sm:$0xff] %v9910_v32 }
 0x382   :  { %2859 = vmatpush1.bf16.msra.mxu0 %v9878_v17  ;;  %2900 = vmatpush1.bf16.msra.mxu1 %v9880_v30 }
 0x383   :  { %2860 = vmatprep.subr.bf16.mxu0 %v9884_v41  ;;  %2901 = vmatprep.subr.bf16.mxu1 %v9886_v18 }
 0x386   :  { %2861 = vmatpush1.bf16.msra.mxu0 %v9890_v39  ;;  %2902 = vmatpush1.bf16.msra.mxu1 %v9892_v45  ;;  %v9914_v39 = vld [vmem:[#allocation4 + $0x20] ss:$16 sps:$4 sm:$0xff]   ;;  %v9916_v45 = vld [vmem:[#allocation4 + $0x28] ss:$16 sps:$4 sm:$0xff]  }
 0x387   :  { %2862 = vmatprep.subr.bf16.mxu0 %v9896_v9  ;;  %2903 = vmatprep.subr.bf16.mxu1 %v9898_v36  ;;  %11292 = vst [vmem:[#allocation62_spill] sm:$0xff] %v9916_v45  ;;  %v9920_v9 = vld [vmem:[#allocation4 + $0x4] ss:$16 sps:$4 sm:$0xff]   ;;  %v9922_v36 = vld [vmem:[#allocation4 + $0xc] ss:$16 sps:$4 sm:$0xff]  }
 0x38a   :  { %v8921_v18 = vpop.eup %8920  ;;  %2863 = vmatpush1.bf16.msra.mxu0 %v9902_v24  ;;  %2904 = vmatpush1.bf16.msra.mxu1 %v9904_v54  ;;  %v9927_v54 = vld [vmem:[#allocation4] ss:$16 sps:$4 sm:$0xff]   ;;  %v9929_v24 = vld [vmem:[#allocation4 + $0x8] ss:$16 sps:$4 sm:$0xff]  }
 0x38b   :  { %2864 = vmatprep.subr.bf16.mxu0 %v9908_v46  ;;  %2905 = vmatprep.subr.bf16.mxu1 %v9910_v32  ;;  %v2372_v41 = vrot.slane %v8921_v18, 2  ;;  %v8923_v46 = vpop.eup %8922 }
 0x38d   :  { %v2374_v30 = vsub.f32 %v9707_v16, %v2372_v41 }
 0x38e   :  { %2865 = vmatpush1.bf16.msra.mxu0 %v9914_v39  ;;  %2906 = vmatpush1.bf16.msra.mxu1 %v9916_v45 }
 0x38f   :  { %2866 = vmatprep.subr.bf16.mxu0 %v9920_v9  ;;  %2907 = vmatprep.subr.bf16.mxu1 %v9922_v36  ;;  %v2376_v32 = vrot.slane %v2374_v30, 6  ;;  %v11318_v30 = vld [vmem:[#allocation34_spill] sm:$0xff] }
 0x391   :  { %v2378_v17 = vmul.f32 %v8923_v46, %v2376_v32  ;;  %v11321_v46 = vld [vmem:[#allocation41_spill] sm:$0xff]  ;;  %v11322_v32 = vld [vmem:[#allocation42_spill] sm:$0xff] }
 0x392   :  { %2867 = vmatpush1.bf16.msra.mxu0 %v9927_v54  ;;  %2908 = vmatpush1.bf16.msra.mxu1 %v9929_v24 }
 0x393   :  { %3158 = vmatprep.subr.bf16.mxu0 %v9611_v40  ;;  %3199 = vmatprep.subr.bf16.mxu1 %v9613_v25  ;;  %v2379_v16 = vadd.f32 %v8921_v18, %v2378_v17  ;;  %v9958_v40 = vld [vmem:[%s10984_s1 + $0x6] sm:$0x3]  ;;  %v11319_v18 = vld [vmem:[#allocation35_spill] sm:$0xff] }
 0x394   :  { %v2959_v25 = vrot.slane %v9958_v40, 4  ;;  %v11317_v17 = vld [vmem:[#allocation33_spill] sm:$0xff] }
 0x395   :  { %v2381_v41 = vpack.c.bf16 %v2379_v16, %v2379_v16 }
 0x397   :  { %v2690_v45 = vrot.slane %v2381_v41, 2  ;;  %v11324_v41 = vld [vmem:[#allocation44_spill] sm:$0xff] }
 0x399   :  { %2885 = vmatmul.mubr.bf16.vlgmr.msra.gmra.mxu0 %v2690_v45  ;;  %2926 = vmatmul.mubr.bf16.vlgmr.msra.gmra.mxu1 %v2690_v45  ;;  %v11320_v45 = vld [vmem:[#allocation40_spill] sm:$0xff] }
 0x39a   :  { %3159 = vmatpush1.bf16.msra.mxu0 %v9619_v26  ;;  %3200 = vmatpush1.bf16.msra.mxu1 %v9621_v50  ;;  %v9969_v26 = vmul.f32 %v2959_v25, %v2379_v16  ;;  %v11293_v50 = vld [vmem:[#allocation9_spill] sm:$0xff]  ;;  %v11323_v16 = vld [vmem:[#allocation43_spill] sm:$0xff] }
 0x39b   :  { %3160 = vmatprep.subr.bf16.mxu0 %v9623_v49  ;;  %3201 = vmatprep.subr.bf16.mxu1 %v9625_v51  ;;  %v11294_v51 = vld [vmem:[#allocation10_spill] sm:$0xff]  ;;  %v11325_v25 = vld [vmem:[#allocation45_spill] sm:$0xff] }
 0x39c   :  { %3190 = vmatprep.mubr.bf16.mxu0 %v11211_v43  ;;  %3231 = vmatprep.mubr.bf16.mxu1 %v11211_v43  ;;  %v2962_v49 = vpack.c.bf16 %v9969_v26, %v9969_v26 }
 0x39e   :  { %3161 = vmatpush1.bf16.msra.mxu0 %v9629_v53  ;;  %3202 = vmatpush1.bf16.msra.mxu1 %v9631_v56  ;;  %v11295_v53 = vld [vmem:[#allocation11_spill] sm:$0xff]  ;;  %v2996_v56 = vrot.slane %v2962_v49, 2 }
 0x39f   :  { %3162 = vmatprep.subr.bf16.mxu0 %v9635_v57  ;;  %3203 = vmatprep.subr.bf16.mxu1 %v9637_v58  ;;  %v11296_v57 = vld [vmem:[#allocation12_spill] sm:$0xff]  ;;  %v11297_v58 = vld [vmem:[#allocation13_spill] sm:$0xff]  ;;  %v11327_v49 = vld [vmem:[#allocation47_spill] sm:$0xff] }
 0x3a2   :  { %3163 = vmatpush1.bf16.msra.mxu0 %v9643_v47  ;;  %3204 = vmatpush1.bf16.msra.mxu1 %v9645_v59  ;;  %v11298_v47 = vld [vmem:[#allocation14_spill] sm:$0xff]  ;;  %v11299_v59 = vld [vmem:[#allocation15_spill] sm:$0xff] }
 0x3a3   :  { %3164 = vmatprep.subr.bf16.mxu0 %v9649_v60  ;;  %3205 = vmatprep.subr.bf16.mxu1 %v9651_v0  ;;  %v11300_v60 = vld [vmem:[#allocation16_spill] sm:$0xff]  ;;  %v11301_v0 = vld [vmem:[#allocation17_spill] sm:$0xff] }
 0x3a6   :  { %3165 = vmatpush1.bf16.msra.mxu0 %v9655_v61  ;;  %3206 = vmatpush1.bf16.msra.mxu1 %v9657_v62  ;;  %v11302_v61 = vld [vmem:[#allocation18_spill] sm:$0xff]  ;;  %v11303_v62 = vld [vmem:[#allocation19_spill] sm:$0xff] }
 0x3a7   :  { %3166 = vmatprep.subr.bf16.mxu0 %v9661_v63  ;;  %3207 = vmatprep.subr.bf16.mxu1 %v9663_v20  ;;  %v11304_v63 = vld [vmem:[#allocation20_spill] sm:$0xff]  ;;  %v11305_v20 = vld [vmem:[#allocation21_spill] sm:$0xff] }
 0x3aa   :  { %3167 = vmatpush1.bf16.msra.mxu0 %v9667_v21  ;;  %3208 = vmatpush1.bf16.msra.mxu1 %v9669_v1  ;;  %v11306_v21 = vld [vmem:[#allocation22_spill] sm:$0xff]  ;;  %v11307_v1 = vld [vmem:[#allocation23_spill] sm:$0xff] }
 0x3ab   :  { %3168 = vmatprep.subr.bf16.mxu0 %v9673_v22  ;;  %3209 = vmatprep.subr.bf16.mxu1 %v9675_v2  ;;  %v11308_v22 = vld [vmem:[#allocation24_spill] sm:$0xff]  ;;  %v11309_v2 = vld [vmem:[#allocation25_spill] sm:$0xff] }
 0x3ae   :  { %3169 = vmatpush1.bf16.msra.mxu0 %v9684_v5  ;;  %3210 = vmatpush1.bf16.msra.mxu1 %v9686_v6  ;;  %v11310_v5 = vld [vmem:[#allocation26_spill] sm:$0xff]  ;;  %v11311_v6 = vld [vmem:[#allocation27_spill] sm:$0xff] }
 0x3af   :  { %3170 = vmatprep.subr.bf16.mxu0 %v9690_v7  ;;  %3211 = vmatprep.subr.bf16.mxu1 %v9692_v8  ;;  %v11312_v7 = vld [vmem:[#allocation28_spill] sm:$0xff]  ;;  %v11313_v8 = vld [vmem:[#allocation29_spill] sm:$0xff] }
 0x3b2   :  { %3171 = vmatpush1.bf16.msra.mxu0 %v9697_v11  ;;  %3212 = vmatpush1.bf16.msra.mxu1 %v9699_v12  ;;  %v11314_v11 = vld [vmem:[#allocation30_spill] sm:$0xff]  ;;  %v11315_v12 = vld [vmem:[#allocation31_spill] sm:$0xff] }
 0x3b3   :  { %3172 = vmatprep.subr.bf16.mxu0 %v9703_v13  ;;  %3213 = vmatprep.subr.bf16.mxu1 %v11293_v50  ;;  %v11316_v13 = vld [vmem:[#allocation32_spill] sm:$0xff]  ;;  %v11326_v50 = vld [vmem:[#allocation46_spill] sm:$0xff] }
 0x3b6   :  { %3173 = vmatpush1.bf16.msra.mxu0 %v11294_v51  ;;  %3214 = vmatpush1.bf16.msra.mxu1 %v11295_v53  ;;  %v11328_v51 = vld [vmem:[#allocation48_spill] sm:$0xff]  ;;  %v11329_v53 = vld [vmem:[#allocation49_spill] sm:$0xff] }
 0x3b7   :  { %3507 = vmatprep.subr.bf16.mxu0 %v11296_v57  ;;  %3548 = vmatprep.subr.bf16.mxu1 %v11297_v58 }
 0x3b9   :  { %3191 = vmatmul.mubr.bf16.vlgmr.msra.gmra.mxu0 %v2996_v56  ;;  %3232 = vmatmul.mubr.bf16.vlgmr.msra.gmra.mxu1 %v2996_v56 }
 0x3ba   :  { %3508 = vmatpush1.bf16.msra.mxu0 %v11298_v47  ;;  %3549 = vmatpush1.bf16.msra.mxu1 %v11299_v59 }
 0x3bb   :  { %3509 = vmatprep.subr.bf16.mxu0 %v11300_v60  ;;  %3550 = vmatprep.subr.bf16.mxu1 %v11301_v0 }
 0x3bc   :  { %3539 = vmatprep.mubr.bf16.mxu0 %v11211_v43  ;;  %3580 = vmatprep.mubr.bf16.mxu1 %v11211_v43 }
 0x3be   :  { %3510 = vmatpush1.bf16.msra.mxu0 %v11302_v61  ;;  %3551 = vmatpush1.bf16.msra.mxu1 %v11303_v62 }
 0x3bf   :  { %3511 = vmatprep.subr.bf16.mxu0 %v11304_v63  ;;  %3552 = vmatprep.subr.bf16.mxu1 %v11305_v20 }
 0x3c2   :  { %3512 = vmatpush1.bf16.msra.mxu0 %v11306_v21  ;;  %3553 = vmatpush1.bf16.msra.mxu1 %v11307_v1 }
 0x3c3   :  { %3513 = vmatprep.subr.bf16.mxu0 %v11308_v22  ;;  %3554 = vmatprep.subr.bf16.mxu1 %v11309_v2 }
 0x3c6   :  { %3514 = vmatpush1.bf16.msra.mxu0 %v11310_v5  ;;  %3555 = vmatpush1.bf16.msra.mxu1 %v11311_v6 }
 0x3c7   :  { %3515 = vmatprep.subr.bf16.mxu0 %v11312_v7  ;;  %3556 = vmatprep.subr.bf16.mxu1 %v11313_v8 }
 0x3ca   :  { %3516 = vmatpush1.bf16.msra.mxu0 %v11314_v11  ;;  %3557 = vmatpush1.bf16.msra.mxu1 %v11315_v12 }
 0x3cb   :  { %3517 = vmatprep.subr.bf16.mxu0 %v11316_v13  ;;  %3558 = vmatprep.subr.bf16.mxu1 %v11317_v17 }
 0x3ce   :  { %3518 = vmatpush1.bf16.msra.mxu0 %v11318_v30  ;;  %3559 = vmatpush1.bf16.msra.mxu1 %v11319_v18 }
 0x3cf   :  { %3519 = vmatprep.subr.bf16.mxu0 %v11320_v45  ;;  %3560 = vmatprep.subr.bf16.mxu1 %v11321_v46 }
 0x3d2   :  { %3520 = vmatpush1.bf16.msra.mxu0 %v11322_v32  ;;  %3561 = vmatpush1.bf16.msra.mxu1 %v11323_v16 }
 0x3d3   :  { %3521 = vmatprep.subr.bf16.mxu0 %v11324_v41  ;;  %3562 = vmatprep.subr.bf16.mxu1 %v11325_v25 }
 0x3d6   :  { %3522 = vmatpush1.bf16.msra.mxu0 %v11326_v50  ;;  %3563 = vmatpush1.bf16.msra.mxu1 %v11327_v49 }
 0x3d7   :  { %3752 = vmatprep.subr.bf16.mxu0 %v11328_v51  ;;  %3793 = vmatprep.subr.bf16.mxu1 %v11329_v53 }
 0x435   :  { %v2641_v56 = vpop.f32.mrf.mxu0  ;;  %v2682_v57 = vpop.f32.mrf.mxu1 }
 0x437   :  { %v2643_v58 = vpop.f32.mrf.mxu0  ;;  %v2684_v47 = vpop.f32.mrf.mxu1 }
 0x439   :  { %v2645_v59 = vpop.f32.mrf.mxu0  ;;  %v2686_v60 = vpop.f32.mrf.mxu1 }
 0x43b   :  { %v2646_v0 = vpop.f32.mrf.mxu0  ;;  %v2687_v61 = vpop.f32.mrf.mxu1 }
 0x459   :  { %v2886_v62 = vpop.f32.mrf.mxu0  ;;  %v2927_v63 = vpop.f32.mrf.mxu1 }
 0x45a   :  { %v2887_v20 = vadd.f32 %v2886_v62, %v2641_v56  ;;  %v2928_v32 = vadd.f32 %v2927_v63, %v2682_v57 }
 0x45b   :  { %v2888_v21 = vpop.f32.mrf.mxu0  ;;  %v2929_v1 = vpop.f32.mrf.mxu1 }
 0x45c   :  { %v2934_v22 = vadd.f32 %v2887_v20, %v9547_v52  ;;  %v2889_v11 = vadd.f32 %v2888_v21, %v2643_v58  ;;  %v2930_v18 = vadd.f32 %v2929_v1, %v2684_v47  ;;  %v2936_v59 = vadd.f32 %v2928_v32, %v9562_v15  ;;  %v11342_v32 = vld [vmem:[#allocation62_spill] sm:$0xff] }
 0x45d   :  { %v2890_v2 = vpop.f32.mrf.mxu0  ;;  %v2931_v5 = vpop.f32.mrf.mxu1 }
 0x45e   :  { %v7764_v6 = vmul.f32 -1.442695, %v2934_v22  ;;  %v2935_v12 = vadd.f32 %v2889_v11, %v9552_v3  ;;  %v2937_v49 = vadd.f32 %v2930_v18, %v9558_v10  ;;  %v11341_v18 = vld [vmem:[#allocation61_spill] sm:$0xff] }
 0x45f   :  { %v2891_v7 = vpop.f32.mrf.mxu0  ;;  %v2932_v8 = vpop.f32.mrf.mxu1 }
 0x460   :  { %8924 = vpow2.f32 %v7764_v6  ;;  %v7765_v13 = vmul.f32 -1.442695, %v2935_v12 }
 0x462   :  { %8926 = vpow2.f32 %v7765_v13 }
 0x46d   :  { %v8925_v17 = vpop.eup %8924 }
 0x46e   :  { %v2944_v30 = vadd.f32 1.0, %v8925_v17 }
 0x46f   :  { %v8927_v50 = vpop.eup %8926 }
 0x470   :  { %8928 = vrcp.f32 %v2944_v30  ;;  %v2945_v62 = vadd.f32 1.0, %v8927_v50  ;;  %v11340_v30 = vld [vmem:[#allocation60_spill] sm:$0xff] }
 0x479   :  { %v3192_v45 = vpop.f32.mrf.mxu0  ;;  %v3233_v46 = vpop.f32.mrf.mxu1 }
 0x47a   :  { %v3244_v16 = vrot.slane %v3192_v45, 2  ;;  %v3246_v12 = vrot.slane %v3233_v46, 2 }
 0x47b   :  { %v3194_v41 = vpop.f32.mrf.mxu0  ;;  %v3235_v25 = vpop.f32.mrf.mxu1 }
 0x47c   :  { %v3252_v51 = vadd.f32 %v3244_v16, %v9472_v27  ;;  %v3245_v57 = vrot.slane %v3194_v41, 2  ;;  %v3247_v11 = vrot.slane %v3235_v25, 2  ;;  %v10063_v16 = vld [vmem:[#allocation2 + $0xe4] ss:$16 sps:$4 sm:$0xff]   ;;  %v10065_v41 = vld [vmem:[#allocation2 + $0xec] ss:$16 sps:$4 sm:$0xff]  }
 0x47d   :  { %v8929_v53 = vpop.eup %8928  ;;  %v3196_v56 = vpop.f32.mrf.mxu0 }
 0x47e   :  { %v3237_v58 = vpop.f32.mrf.mxu1  ;;  %v2950_v60 = vmul.f32 %v8929_v53, %v2937_v49  ;;  %v7799_v0 = vmul.f32 -1.442695, %v3252_v51  ;;  %v3253_v63 = vadd.f32 %v3245_v57, %v9475_v31  ;;  %v10075_v53 = vld [vmem:[#allocation2 + $0xc4] ss:$16 sps:$4 sm:$0xff]   ;;  %v10077_v56 = vld [vmem:[#allocation2 + $0xcc] ss:$16 sps:$4 sm:$0xff]  }
 0x47f   :  { %v3197_v61 = vpop.f32.mrf.mxu0  ;;  %v10087_v58 = vld [vmem:[#allocation2 + $0xa4] ss:$16 sps:$4 sm:$0xff]  }
 0x480   :  { %v3238_v47 = vpop.f32.mrf.mxu1  ;;  %v2951_v20 = vadd.f32 %v2950_v60, %v2936_v59  ;;  %8930 = vpow2.f32 %v7799_v0  ;;  %v7800_v22 = vmul.f32 -1.442695, %v3253_v63  ;;  %v10089_v59 = vld [vmem:[#allocation2 + $0xac] ss:$16 sps:$4 sm:$0xff]   ;;  %v10095_v60 = vld [vmem:[#allocation2 + $0xa0] ss:$16 sps:$4 sm:$0xff]  }
 0x481   :  { %v10097_v0 = vld [vmem:[#allocation2 + $0xa8] ss:$16 sps:$4 sm:$0xff]   ;;  %v10101_v61 = vld [vmem:[#allocation2 + $0x84] ss:$16 sps:$4 sm:$0xff]   ;;  %v10103_v47 = vld [vmem:[#allocation2 + $0x8c] ss:$16 sps:$4 sm:$0xff]  }
 0x482   :  { %8932 = vtanh.f32 %v2951_v20  ;;  %v10109_v20 = vld [vmem:[#allocation2 + $0x88] ss:$16 sps:$4 sm:$0xff]   ;;  %v10113_v57 = vld [vmem:[#allocation2 + $0x64] ss:$16 sps:$4 sm:$0xff]   ;;  %v10115_v63 = vld [vmem:[#allocation2 + $0x6c] ss:$16 sps:$4 sm:$0xff]  }
 0x483   :  { %8934 = vrcp.f32 %v2945_v62  ;;  %v10107_v62 = vld [vmem:[#allocation2 + $0x80] ss:$16 sps:$4 sm:$0xff]  }
 0x48d   :  { %v8931_v21 = vpop.eup %8930 }
 0x48e   :  { %v3262_v1 = vadd.f32 1.0, %v8931_v21  ;;  %v10119_v21 = vld [vmem:[#allocation2 + $0x60] ss:$16 sps:$4 sm:$0xff]  }
 0x48f   :  { %v8933_v27 = vpop.eup %8932 }
 0x490   :  { %8936 = vrcp.f32 %v3262_v1  ;;  %v2953_v2 = vsub.f32 %v9836_v29, %v8933_v27  ;;  %v8935_v5 = vpop.eup %8934  ;;  %v3255_v29 = vadd.f32 %v3247_v11, %v9478_v37  ;;  %v10121_v1 = vld [vmem:[#allocation2 + $0x68] ss:$16 sps:$4 sm:$0xff]   ;;  %v10144_v11 = vld [vmem:[#allocation2 + $0x2c] ss:$16 sps:$4 sm:$0xff]  }
 0x491   :  { %8938 = vpow2.f32 %v7800_v22  ;;  %v10127_v22 = vld [vmem:[#allocation2 + $0x4c] ss:$16 sps:$4 sm:$0xff]  }
 0x492   :  { %v2954_v6 = vmul.f32 %v8935_v5, %v2953_v2  ;;  %v10132_v2 = vld [vmem:[%s10984_s1 + $0x8] sm:$0x3]  ;;  %v10136_v5 = vld [vmem:[#allocation2 + $0x40] ss:$16 sps:$4 sm:$0xff]  }
 0x494   :  { %v2955_v7 = vadd.f32 %v8933_v27, %v2954_v6  ;;  %v10125_v27 = vld [vmem:[#allocation2 + $0x44] ss:$16 sps:$4 sm:$0xff]   ;;  %v10138_v6 = vld [vmem:[#allocation2 + $0x48] ss:$16 sps:$4 sm:$0xff]  }
 0x496   :  { %7766 = vst [vmem:[%s10991_s8 + $0x4] sm:$0x3] %v2955_v7  ;;  %v10026_v8 = vmul.f32 %v2955_v7, %v9958_v40  ;;  %v3254_v40 = vadd.f32 %v3246_v12, %v9480_v44  ;;  %v11330_v44 = vld [vmem:[#allocation50_spill] sm:$0xff]  ;;  %v10142_v7 = vld [vmem:[#allocation2 + $0x24] ss:$16 sps:$4 sm:$0xff]  }
 0x497   :  { %v10149_v12 = vld [vmem:[#allocation2 + $0x20] ss:$16 sps:$4 sm:$0xff]  }
 0x498   :  { %v3314_v31 = vpack.c.bf16 %v10026_v8, %v10026_v8 }
 0x49a   :  { %3540 = vmatmul.mubr.bf16.vlgmr.msra.gmra.mxu0 %v3314_v31  ;;  %3581 = vmatmul.mubr.bf16.vlgmr.msra.gmra.mxu1 %v3314_v31  ;;  %v3859_v31 = vrot.slane %v10132_v2, 2 }
 0x49b   :  { %3753 = vmatpush1.bf16.msra.mxu0 %v9838_v38  ;;  %3794 = vmatpush1.bf16.msra.mxu1 %v9840_v48 }
 0x49c   :  { %3754 = vmatprep.subr.bf16.mxu0 %v9844_v55  ;;  %3795 = vmatprep.subr.bf16.mxu1 %v9846_v33  ;;  %v11331_v55 = vld [vmem:[#allocation51_spill] sm:$0xff]  ;;  %v11332_v33 = vld [vmem:[#allocation52_spill] sm:$0xff] }
 0x49d   :  { %v8937_v13 = vpop.eup %8936  ;;  %3784 = vmatprep.mubr.bf16.mxu0 %v11211_v43  ;;  %3825 = vmatprep.mubr.bf16.mxu1 %v11211_v43 }
 0x49e   :  { %v3268_v17 = vmul.f32 %v8937_v13, %v3255_v29  ;;  %v8939_v37 = vpop.eup %8938  ;;  %v10151_v29 = vld [vmem:[#allocation2 + $0x28] ss:$16 sps:$4 sm:$0xff]   ;;  %v10155_v13 = vld [vmem:[#allocation2 + $0x4] ss:$16 sps:$4 sm:$0xff]  }
 0x49f   :  { %3755 = vmatpush1.bf16.msra.mxu0 %v9850_v4  ;;  %3796 = vmatpush1.bf16.msra.mxu1 %v9852_v35  ;;  %v3263_v48 = vadd.f32 1.0, %v8939_v37  ;;  %v11333_v4 = vld [vmem:[#allocation53_spill] sm:$0xff]  ;;  %v11334_v35 = vld [vmem:[#allocation54_spill] sm:$0xff] }
 0x4a0   :  { %v3269_v38 = vadd.f32 %v3268_v17, %v3254_v40  ;;  %3756 = vmatprep.subr.bf16.mxu0 %v9857_v23  ;;  %3797 = vmatprep.subr.bf16.mxu1 %v9859_v34  ;;  %v11335_v23 = vld [vmem:[#allocation55_spill] sm:$0xff]  ;;  %v11336_v34 = vld [vmem:[#allocation56_spill] sm:$0xff] }
 0x4a1   :  { %v10157_v40 = vld [vmem:[#allocation2 + $0xc] ss:$16 sps:$4 sm:$0xff]   ;;  %v10165_v37 = vld [vmem:[#allocation2 + $0x8] ss:$16 sps:$4 sm:$0xff]  }
 0x4a2   :  { %8940 = vtanh.f32 %v3269_v38  ;;  %v10163_v38 = vld [vmem:[#allocation2] ss:$16 sps:$4 sm:$0xff]  }
 0x4a3   :  { %3757 = vmatpush1.bf16.msra.mxu0 %v9866_v19  ;;  %3798 = vmatpush1.bf16.msra.mxu1 %v9868_v28  ;;  %8942 = vrcp.f32 %v3263_v48  ;;  %v11337_v19 = vld [vmem:[#allocation57_spill] sm:$0xff] }
 0x4a4   :  { %3758 = vmatprep.subr.bf16.mxu0 %v9872_v14  ;;  %3799 = vmatprep.subr.bf16.mxu1 %v9874_v42  ;;  %v11338_v14 = vld [vmem:[#allocation58_spill] sm:$0xff]  ;;  %v11339_v42 = vld [vmem:[#allocation59_spill] sm:$0xff] }
 0x4a7   :  { %3759 = vmatpush1.bf16.msra.mxu0 %v11330_v44  ;;  %3800 = vmatpush1.bf16.msra.mxu1 %v11331_v55  ;;  %v10175_v55 = vld [vmem:[#allocation6 + $0xe4] ss:$16 sps:$4 sm:$0xff]  }
 0x4a8   :  { %3760 = vmatprep.subr.bf16.mxu0 %v11332_v33  ;;  %3801 = vmatprep.subr.bf16.mxu1 %v11333_v4  ;;  %v10177_v33 = vld [vmem:[#allocation6 + $0xec] ss:$16 sps:$4 sm:$0xff]   ;;  %v10179_v4 = vld [vmem:[#allocation6 + $0xe0] ss:$16 sps:$4 sm:$0xff]  }
 0x4a9   :  { %11343 = vst [vmem:[#allocation9_spill] sm:$0xff] %v10177_v33  ;;  %11344 = vst [vmem:[#allocation10_spill] sm:$0xff] %v10179_v4 }
 0x4ab   :  { %3761 = vmatpush1.bf16.msra.mxu0 %v11334_v35  ;;  %3802 = vmatpush1.bf16.msra.mxu1 %v11335_v23  ;;  %v10181_v35 = vld [vmem:[#allocation6 + $0xe8] ss:$16 sps:$4 sm:$0xff]   ;;  %v10187_v23 = vld [vmem:[#allocation6 + $0xc4] ss:$16 sps:$4 sm:$0xff]  }
 0x4ac   :  { %3762 = vmatprep.subr.bf16.mxu0 %v11336_v34  ;;  %3803 = vmatprep.subr.bf16.mxu1 %v11337_v19  ;;  %11345 = vst [vmem:[#allocation11_spill] sm:$0xff] %v10181_v35  ;;  %11346 = vst [vmem:[#allocation12_spill] sm:$0xff] %v10187_v23  ;;  %v10189_v34 = vld [vmem:[#allocation6 + $0xcc] ss:$16 sps:$4 sm:$0xff]   ;;  %v10191_v19 = vld [vmem:[#allocation6 + $0xc0] ss:$16 sps:$4 sm:$0xff]  }
 0x4ad   :  { %11347 = vst [vmem:[#allocation13_spill] sm:$0xff] %v10189_v34  ;;  %11348 = vst [vmem:[#allocation14_spill] sm:$0xff] %v10191_v19 }
 0x4af   :  { %v8941_v28 = vpop.eup %8940  ;;  %3763 = vmatpush1.bf16.msra.mxu0 %v11338_v14  ;;  %3804 = vmatpush1.bf16.msra.mxu1 %v11339_v42  ;;  %v10199_v14 = vld [vmem:[#allocation6 + $0xa4] ss:$16 sps:$4 sm:$0xff]   ;;  %v10201_v42 = vld [vmem:[#allocation6 + $0xac] ss:$16 sps:$4 sm:$0xff]  }
 0x4b0   :  { %3764 = vmatprep.subr.bf16.mxu0 %v11340_v30  ;;  %3805 = vmatprep.subr.bf16.mxu1 %v11341_v18  ;;  %v3272_v45 = vrot.slane %v8941_v28, 2  ;;  %v8943_v50 = vpop.eup %8942  ;;  %11350 = vst [vmem:[#allocation16_spill] sm:$0xff] %v10199_v14  ;;  %11351 = vst [vmem:[#allocation17_spill] sm:$0xff] %v10201_v42  ;;  %v10203_v30 = vld [vmem:[#allocation6 + $0xa0] ss:$16 sps:$4 sm:$0xff]  }
 0x4b1   :  { %11352 = vst [vmem:[#allocation18_spill] sm:$0xff] %v10203_v30  ;;  %v10205_v18 = vld [vmem:[#allocation6 + $0xa8] ss:$16 sps:$4 sm:$0xff]  }
 0x4b2   :  { %v3274_v46 = vsub.f32 %v9969_v26, %v3272_v45  ;;  %11353 = vst [vmem:[#allocation19_spill] sm:$0xff] %v10205_v18  ;;  %v10211_v45 = vld [vmem:[#allocation6 + $0x84] ss:$16 sps:$4 sm:$0xff]  }
 0x4b3   :  { %3765 = vmatpush1.bf16.msra.mxu0 %v9914_v39  ;;  %3806 = vmatpush1.bf16.msra.mxu1 %v11342_v32  ;;  %11354 = vst [vmem:[#allocation20_spill] sm:$0xff] %v10211_v45  ;;  %v10215_v32 = vld [vmem:[#allocation6 + $0x80] ss:$16 sps:$4 sm:$0xff]  }
 0x4b4   :  { %3766 = vmatprep.subr.bf16.mxu0 %v9920_v9  ;;  %3807 = vmatprep.subr.bf16.mxu1 %v9922_v36  ;;  %v3276_v25 = vrot.slane %v3274_v46, 6  ;;  %v10071_v9 = vld [vmem:[#allocation2 + $0xe0] ss:$16 sps:$4 sm:$0xff]   ;;  %v10073_v36 = vld [vmem:[#allocation2 + $0xe8] ss:$16 sps:$4 sm:$0xff]   ;;  %11356 = vst [vmem:[#allocation22_spill] sm:$0xff] %v10215_v32 }
 0x4b5   :  { %v10213_v46 = vld [vmem:[#allocation6 + $0x8c] ss:$16 sps:$4 sm:$0xff]  }
 0x4b6   :  { %v3278_v49 = vmul.f32 %v8943_v50, %v3276_v25  ;;  %11355 = vst [vmem:[#allocation21_spill] sm:$0xff] %v10213_v46  ;;  %v10217_v25 = vld [vmem:[#allocation6 + $0x88] ss:$16 sps:$4 sm:$0xff]   ;;  %v10223_v50 = vld [vmem:[#allocation6 + $0x64] ss:$16 sps:$4 sm:$0xff]  }
 0x4b7   :  { %3767 = vmatpush1.bf16.msra.mxu0 %v9927_v54  ;;  %3808 = vmatpush1.bf16.msra.mxu1 %v9929_v24  ;;  %v10081_v24 = vld [vmem:[#allocation2 + $0xc0] ss:$16 sps:$4 sm:$0xff]   ;;  %v10083_v54 = vld [vmem:[#allocation2 + $0xc8] ss:$16 sps:$4 sm:$0xff]   ;;  %11357 = vst [vmem:[#allocation23_spill] sm:$0xff] %v10217_v25  ;;  %11358 = vst [vmem:[#allocation24_spill] sm:$0xff] %v10223_v50 }
 0x4b8   :  { %4058 = vmatprep.subr.bf16.mxu0 %v10063_v16  ;;  %4099 = vmatprep.subr.bf16.mxu1 %v10065_v41  ;;  %v3279_v39 = vadd.f32 %v8941_v28, %v3278_v49  ;;  %v10193_v28 = vld [vmem:[#allocation6 + $0xc8] ss:$16 sps:$4 sm:$0xff]   ;;  %v10225_v49 = vld [vmem:[#allocation6 + $0x6c] ss:$16 sps:$4 sm:$0xff]  }
 0x4b9   :  { %11349 = vst [vmem:[#allocation15_spill] sm:$0xff] %v10193_v28  ;;  %11359 = vst [vmem:[#allocation25_spill] sm:$0xff] %v10225_v49 }
 0x4ba   :  { %v3281_v26 = vpack.c.bf16 %v3279_v39, %v3279_v39  ;;  %v10159_v17 = vmul.f32 %v3859_v31, %v3279_v39  ;;  %v10227_v39 = vld [vmem:[#allocation6 + $0x60] ss:$16 sps:$4 sm:$0xff]   ;;  %v10237_v31 = vld [vmem:[#allocation6 + $0x4c] ss:$16 sps:$4 sm:$0xff]  }
 0x4bb   :  { %11360 = vst [vmem:[#allocation26_spill] sm:$0xff] %v10227_v39  ;;  %11363 = vst [vmem:[#allocation29_spill] sm:$0xff] %v10237_v31 }
 0x4bc   :  { %v3590_v51 = vrot.slane %v3281_v26, 3  ;;  %v3862_v48 = vpack.c.bf16 %v10159_v17, %v10159_v17  ;;  %v10229_v26 = vld [vmem:[#allocation6 + $0x68] ss:$16 sps:$4 sm:$0xff]  }
 0x4bd   :  { %11361 = vst [vmem:[#allocation27_spill] sm:$0xff] %v10229_v26 }
 0x4be   :  { %3785 = vmatmul.mubr.bf16.vlgmr.msra.gmra.mxu0 %v3590_v51  ;;  %3826 = vmatmul.mubr.bf16.vlgmr.msra.gmra.mxu1 %v3590_v51  ;;  %v3896_v44 = vrot.slane %v3862_v48, 3  ;;  %v10235_v51 = vld [vmem:[#allocation6 + $0x44] ss:$16 sps:$4 sm:$0xff]   ;;  %v10239_v48 = vld [vmem:[#allocation6 + $0x40] ss:$16 sps:$4 sm:$0xff]  }
 0x4bf   :  { %4059 = vmatpush1.bf16.msra.mxu0 %v10071_v9  ;;  %4100 = vmatpush1.bf16.msra.mxu1 %v10073_v36  ;;  %11362 = vst [vmem:[#allocation28_spill] sm:$0xff] %v10235_v51  ;;  %11364 = vst [vmem:[#allocation30_spill] sm:$0xff] %v10239_v48 }
 0x4c0   :  { %4060 = vmatprep.subr.bf16.mxu0 %v10075_v53  ;;  %4101 = vmatprep.subr.bf16.mxu1 %v10077_v56 }
 0x4c1   :  { %4090 = vmatprep.mubr.bf16.mxu0 %v11211_v43  ;;  %4131 = vmatprep.mubr.bf16.mxu1 %v11211_v43 }
 0x4c3   :  { %4061 = vmatpush1.bf16.msra.mxu0 %v10081_v24  ;;  %4102 = vmatpush1.bf16.msra.mxu1 %v10083_v54 }
 0x4c4   :  { %4062 = vmatprep.subr.bf16.mxu0 %v10087_v58  ;;  %4103 = vmatprep.subr.bf16.mxu1 %v10089_v59 }
 0x4c7   :  { %4063 = vmatpush1.bf16.msra.mxu0 %v10095_v60  ;;  %4104 = vmatpush1.bf16.msra.mxu1 %v10097_v0 }
 0x4c8   :  { %4064 = vmatprep.subr.bf16.mxu0 %v10101_v61  ;;  %4105 = vmatprep.subr.bf16.mxu1 %v10103_v47 }
 0x4cb   :  { %4065 = vmatpush1.bf16.msra.mxu0 %v10107_v62  ;;  %4106 = vmatpush1.bf16.msra.mxu1 %v10109_v20 }
 0x4cc   :  { %4066 = vmatprep.subr.bf16.mxu0 %v10113_v57  ;;  %4107 = vmatprep.subr.bf16.mxu1 %v10115_v63 }
 0x4cf   :  { %4067 = vmatpush1.bf16.msra.mxu0 %v10119_v21  ;;  %4108 = vmatpush1.bf16.msra.mxu1 %v10121_v1 }
 0x4d0   :  { %4068 = vmatprep.subr.bf16.mxu0 %v10125_v27  ;;  %4109 = vmatprep.subr.bf16.mxu1 %v10127_v22 }
 0x4d3   :  { %4069 = vmatpush1.bf16.msra.mxu0 %v10136_v5  ;;  %4110 = vmatpush1.bf16.msra.mxu1 %v10138_v6 }
 0x4d4   :  { %4070 = vmatprep.subr.bf16.mxu0 %v10142_v7  ;;  %4111 = vmatprep.subr.bf16.mxu1 %v10144_v11 }
 0x4d7   :  { %4071 = vmatpush1.bf16.msra.mxu0 %v10149_v12  ;;  %4112 = vmatpush1.bf16.msra.mxu1 %v10151_v29 }
 0x4d8   :  { %4072 = vmatprep.subr.bf16.mxu0 %v10155_v13  ;;  %4113 = vmatprep.subr.bf16.mxu1 %v10157_v40 }
 0x4db   :  { %4073 = vmatpush1.bf16.msra.mxu0 %v10163_v38  ;;  %4114 = vmatpush1.bf16.msra.mxu1 %v10165_v37 }
 0x4dc   :  { %4395 = vmatprep.subr.bf16.mxu0 %v10175_v55  ;;  %4436 = vmatprep.subr.bf16.mxu1 %v10177_v33  ;;  %v11376_v33 = vld [vmem:[#allocation36_spill] sm:$0xff] }
 0x4de   :  { %4091 = vmatmul.mubr.bf16.vlgmr.msra.gmra.mxu0 %v3896_v44  ;;  %4132 = vmatmul.mubr.bf16.vlgmr.msra.gmra.mxu1 %v3896_v44  ;;  %v10241_v44 = vld [vmem:[#allocation6 + $0x48] ss:$16 sps:$4 sm:$0xff]  }
 0x4df   :  { %4427 = vmatprep.mubr.bf16.mxu0 %v11211_v43  ;;  %4468 = vmatprep.mubr.bf16.mxu1 %v11211_v43  ;;  %11365 = vst [vmem:[#allocation31_spill] sm:$0xff] %v10241_v44 }
 0x4e0   :  { %4396 = vmatpush1.bf16.msra.mxu0 %v10179_v4  ;;  %4437 = vmatpush1.bf16.msra.mxu1 %v10181_v35 }
 0x4e1   :  { %4397 = vmatprep.subr.bf16.mxu0 %v10187_v23  ;;  %4438 = vmatprep.subr.bf16.mxu1 %v10189_v34 }
 0x4e4   :  { %4398 = vmatpush1.bf16.msra.mxu0 %v10191_v19  ;;  %4439 = vmatpush1.bf16.msra.mxu1 %v10193_v28 }
 0x4e5   :  { %4399 = vmatprep.subr.bf16.mxu0 %v10199_v14  ;;  %4440 = vmatprep.subr.bf16.mxu1 %v10201_v42 }
 0x4e8   :  { %4400 = vmatpush1.bf16.msra.mxu0 %v10203_v30  ;;  %4441 = vmatpush1.bf16.msra.mxu1 %v10205_v18 }
 0x4e9   :  { %4401 = vmatprep.subr.bf16.mxu0 %v10211_v45  ;;  %4442 = vmatprep.subr.bf16.mxu1 %v10213_v46 }
 0x4ec   :  { %4402 = vmatpush1.bf16.msra.mxu0 %v10215_v32  ;;  %4443 = vmatpush1.bf16.msra.mxu1 %v10217_v25 }
 0x4ed   :  { %4403 = vmatprep.subr.bf16.mxu0 %v10223_v50  ;;  %4444 = vmatprep.subr.bf16.mxu1 %v10225_v49  ;;  %v10247_v49 = vld [vmem:[#allocation6 + $0x24] ss:$16 sps:$4 sm:$0xff]   ;;  %v10253_v50 = vld [vmem:[#allocation6 + $0x28] ss:$16 sps:$4 sm:$0xff]  }
 0x4ee   :  { %11366 = vst [vmem:[#allocation32_spill] sm:$0xff] %v10247_v49  ;;  %11369 = vst [vmem:[#allocation35_spill] sm:$0xff] %v10253_v50 }
 0x4f0   :  { %4404 = vmatpush1.bf16.msra.mxu0 %v10227_v39  ;;  %4445 = vmatpush1.bf16.msra.mxu1 %v10229_v26  ;;  %v10249_v39 = vld [vmem:[#allocation6 + $0x2c] ss:$16 sps:$4 sm:$0xff]   ;;  %v10251_v26 = vld [vmem:[#allocation6 + $0x20] ss:$16 sps:$4 sm:$0xff]  }
 0x4f1   :  { %4405 = vmatprep.subr.bf16.mxu0 %v10235_v51  ;;  %4446 = vmatprep.subr.bf16.mxu1 %v10237_v31  ;;  %11367 = vst [vmem:[#allocation33_spill] sm:$0xff] %v10249_v39  ;;  %11368 = vst [vmem:[#allocation34_spill] sm:$0xff] %v10251_v26  ;;  %v10259_v31 = vld [vmem:[#allocation6 + $0x4] ss:$16 sps:$4 sm:$0xff]   ;;  %v10265_v51 = vld [vmem:[#allocation6 + $0x8] ss:$16 sps:$4 sm:$0xff]  }
 0x4f2   :  { %11370 = vst [vmem:[#allocation40_spill] sm:$0xff] %v10259_v31  ;;  %11373 = vst [vmem:[#allocation43_spill] sm:$0xff] %v10265_v51 }
 0x4f4   :  { %4406 = vmatpush1.bf16.msra.mxu0 %v10239_v48  ;;  %4447 = vmatpush1.bf16.msra.mxu1 %v10241_v44  ;;  %v10261_v48 = vld [vmem:[#allocation6 + $0xc] ss:$16 sps:$4 sm:$0xff]   ;;  %v10263_v44 = vld [vmem:[#allocation6] ss:$16 sps:$4 sm:$0xff]  }
 0x4f5   :  { %4407 = vmatprep.subr.bf16.mxu0 %v10247_v49  ;;  %4448 = vmatprep.subr.bf16.mxu1 %v10249_v39  ;;  %11371 = vst [vmem:[#allocation41_spill] sm:$0xff] %v10261_v48  ;;  %11372 = vst [vmem:[#allocation42_spill] sm:$0xff] %v10263_v44  ;;  %v10271_v39 = vld [vmem:[#allocation4 + $0xe4] ss:$16 sps:$4 sm:$0xff]  }
 0x4f6   :  { %11374 = vst [vmem:[#allocation44_spill] sm:$0xff] %v10271_v39 }
 0x4f8   :  { %4408 = vmatpush1.bf16.msra.mxu0 %v10251_v26  ;;  %4449 = vmatpush1.bf16.msra.mxu1 %v10253_v50  ;;  %v10273_v26 = vld [vmem:[#allocation4 + $0xec] ss:$16 sps:$4 sm:$0xff]  }
 0x4f9   :  { %4409 = vmatprep.subr.bf16.mxu0 %v10259_v31  ;;  %4450 = vmatprep.subr.bf16.mxu1 %v10261_v48  ;;  %11375 = vst [vmem:[#allocation45_spill] sm:$0xff] %v10273_v26 }
 0x4fc   :  { %4410 = vmatpush1.bf16.msra.mxu0 %v10263_v44  ;;  %4451 = vmatpush1.bf16.msra.mxu1 %v10265_v51 }
 0x4fd   :  { %4637 = vmatprep.subr.bf16.mxu0 %v10271_v39  ;;  %4678 = vmatprep.subr.bf16.mxu1 %v10273_v26 }
 0x55a   :  { %v3541_v50 = vpop.f32.mrf.mxu0  ;;  %v3582_v49 = vpop.f32.mrf.mxu1 }
 0x55c   :  { %v3543_v25 = vpop.f32.mrf.mxu0  ;;  %v3584_v32 = vpop.f32.mrf.mxu1 }
 0x55e   :  { %v3545_v46 = vpop.f32.mrf.mxu0  ;;  %v3586_v31 = vpop.f32.mrf.mxu1 }
 0x560   :  { %v3546_v45 = vpop.f32.mrf.mxu0  ;;  %v3587_v48 = vpop.f32.mrf.mxu1 }
 0x57e   :  { %v3786_v18 = vpop.f32.mrf.mxu0  ;;  %v3827_v44 = vpop.f32.mrf.mxu1 }
 0x57f   :  { %v3787_v30 = vadd.f32 %v3786_v18, %v3541_v50  ;;  %v3828_v4 = vadd.f32 %v3827_v44, %v3582_v49  ;;  %v11377_v49 = vld [vmem:[#allocation38_spill] sm:$0xff] }
 0x580   :  { %v3788_v51 = vpop.f32.mrf.mxu0  ;;  %v3829_v42 = vpop.f32.mrf.mxu1 }
 0x581   :  { %v3834_v14 = vadd.f32 %v3787_v30, %v9547_v52  ;;  %v3789_v23 = vadd.f32 %v3788_v51, %v3543_v25  ;;  %v3830_v48 = vadd.f32 %v3829_v42, %v3584_v32 }
 0x582   :  { %v3790_v28 = vpop.f32.mrf.mxu0  ;;  %v3831_v19 = vpop.f32.mrf.mxu1 }
 0x583   :  { %v7865_v39 = vmul.f32 -1.442695, %v3834_v14  ;;  %v3835_v35 = vadd.f32 %v3789_v23, %v9552_v3 }
 0x584   :  { %v3791_v34 = vpop.f32.mrf.mxu0  ;;  %v3832_v26 = vpop.f32.mrf.mxu1 }
 0x585   :  { %8944 = vpow2.f32 %v7865_v39  ;;  %v7866_v46 = vmul.f32 -1.442695, %v3835_v35  ;;  %v3837_v34 = vadd.f32 %v3830_v48, %v9558_v10  ;;  %v3836_v35 = vadd.f32 %v3828_v4, %v9562_v15 }
 0x587   :  { %8946 = vpow2.f32 %v7866_v46 }
 0x592   :  { %v8945_v31 = vpop.eup %8944 }
 0x593   :  { %v3844_v45 = vadd.f32 1.0, %v8945_v31 }
 0x594   :  { %v8947_v14 = vpop.eup %8946 }
 0x595   :  { %8948 = vrcp.f32 %v3844_v45  ;;  %v3845_v32 = vadd.f32 1.0, %v8947_v14 }
 0x59e   :  { %v4092_v18 = vpop.f32.mrf.mxu0  ;;  %v4133_v50 = vpop.f32.mrf.mxu1 }
 0x59f   :  { %v4140_v30 = vadd.f32 %v4092_v18, %v11376_v33 }
 0x5a0   :  { %v4094_v28 = vpop.f32.mrf.mxu0  ;;  %v4135_v19 = vpop.f32.mrf.mxu1 }
 0x5a1   :  { %v7900_v39 = vmul.f32 -1.442695, %v4140_v30  ;;  %v4141_v44 = vadd.f32 %v4094_v28, %v11377_v49  ;;  %v10292_v28 = vld [vmem:[#allocation4 + $0xe8] ss:$16 sps:$4 sm:$0xff]  }
 0x5a2   :  { %v8949_v25 = vpop.eup %8948  ;;  %v4096_v26 = vpop.f32.mrf.mxu0 }
 0x5a3   :  { %v4137_v23 = vpop.f32.mrf.mxu1  ;;  %v3850_v51 = vmul.f32 %v8949_v25, %v3837_v34  ;;  %8950 = vpow2.f32 %v7900_v39  ;;  %v7901_v48 = vmul.f32 -1.442695, %v4141_v44  ;;  %v10290_v39 = vld [vmem:[#allocation4 + $0xe0] ss:$16 sps:$4 sm:$0xff]  }
 0x5a4   :  { %v4097_v46 = vpop.f32.mrf.mxu0 }
 0x5a5   :  { %v4138_v42 = vpop.f32.mrf.mxu1  ;;  %v3851_v31 = vadd.f32 %v3850_v51, %v3836_v35  ;;  %v10296_v35 = vld [vmem:[#allocation4 + $0xc4] ss:$16 sps:$4 sm:$0xff]  }
 0x5a6   :  { %v11378_v51 = vld [vmem:[#allocation39_spill] sm:$0xff] }
 0x5a7   :  { %8952 = vtanh.f32 %v3851_v31  ;;  %v4143_v46 = vadd.f32 %v4135_v19, %v11378_v51  ;;  %v11379_v31 = vld [vmem:[#allocation37_spill] sm:$0xff]  ;;  %v10312_v19 = vld [vmem:[#allocation4 + $0xac] ss:$16 sps:$4 sm:$0xff]  }
 0x5a8   :  { %8954 = vrcp.f32 %v3845_v32  ;;  %v10305_v32 = vld [vmem:[#allocation4 + $0xc8] ss:$16 sps:$4 sm:$0xff]   ;;  %v4142_v44 = vadd.f32 %v4133_v50, %v11379_v31  ;;  %11380 = vst [vmem:[#allocation46_spill] sm:$0xff] %v10312_v19  ;;  %v10318_v50 = vld [vmem:[#allocation4 + $0xa0] ss:$16 sps:$4 sm:$0xff]  }
 0x5a9   :  { %11381 = vst [vmem:[#allocation47_spill] sm:$0xff] %v10318_v50 }
 0x5b0   :  { %v8951_v45 = vpop.eup %8950 }
 0x5b1   :  { %v4150_v18 = vadd.f32 1.0, %v8951_v45 }
 0x5b3   :  { %8956 = vrcp.f32 %v4150_v18  ;;  %v10310_v18 = vld [vmem:[#allocation4 + $0xa4] ss:$16 sps:$4 sm:$0xff]  }
 0x5b4   :  { %v8953_v30 = vpop.eup %8952  ;;  %8958 = vpow2.f32 %v7901_v48 }
 0x5b5   :  { %v3853_v26 = vsub.f32 %v10026_v8, %v8953_v30  ;;  %v8955_v23 = vpop.eup %8954  ;;  %v10298_v8 = vld [vmem:[#allocation4 + $0xcc] ss:$16 sps:$4 sm:$0xff]  }
 0x5b7   :  { %v3854_v4 = vmul.f32 %v8955_v23, %v3853_v26  ;;  %v10320_v26 = vld [vmem:[#allocation4 + $0xa8] ss:$16 sps:$4 sm:$0xff]   ;;  %v10324_v23 = vld [vmem:[#allocation4 + $0x84] ss:$16 sps:$4 sm:$0xff]  }
 0x5b8   :  { %11382 = vst [vmem:[#allocation48_spill] sm:$0xff] %v10320_v26  ;;  %11383 = vst [vmem:[#allocation49_spill] sm:$0xff] %v10324_v23 }
 0x5b9   :  { %v3855_v34 = vadd.f32 %v8953_v30, %v3854_v4  ;;  %v10326_v4 = vld [vmem:[#allocation4 + $0x8c] ss:$16 sps:$4 sm:$0xff]  }
 0x5ba   :  { %11384 = vst [vmem:[#allocation50_spill] sm:$0xff] %v10326_v4 }
 0x5bb   :  { %7867 = vst [vmem:[%s10991_s8 + $0x6] sm:$0x3] %v3855_v34  ;;  %v10288_v14 = vmul.f32 %v3855_v34, %v10132_v2  ;;  %v10303_v2 = vld [vmem:[#allocation4 + $0xc0] ss:$16 sps:$4 sm:$0xff]  }
 0x5bd   :  { %v4202_v25 = vpack.c.bf16 %v10288_v14, %v10288_v14 }
 0x5bf   :  { %4428 = vmatmul.mubr.bf16.vlgmr.msra.gmra.mxu0 %v4202_v25  ;;  %4469 = vmatmul.mubr.bf16.vlgmr.msra.gmra.mxu1 %v4202_v25  ;;  %v10330_v25 = vld [vmem:[#allocation4 + $0x80] ss:$16 sps:$4 sm:$0xff]  }
 0x5c0   :  { %v8957_v42 = vpop.eup %8956  ;;  %4638 = vmatpush1.bf16.msra.mxu0 %v10290_v39  ;;  %4679 = vmatpush1.bf16.msra.mxu1 %v10292_v28  ;;  %11385 = vst [vmem:[#allocation51_spill] sm:$0xff] %v10330_v25 }
 0x5c1   :  { %v4156_v45 = vmul.f32 %v8957_v42, %v4143_v46  ;;  %4639 = vmatprep.subr.bf16.mxu0 %v10296_v35  ;;  %4680 = vmatprep.subr.bf16.mxu1 %v10298_v8  ;;  %v8959_v30 = vpop.eup %8958  ;;  %v10332_v46 = vld [vmem:[#allocation4 + $0x88] ss:$16 sps:$4 sm:$0xff]   ;;  %v10336_v42 = vld [vmem:[#allocation4 + $0x64] ss:$16 sps:$4 sm:$0xff]  }
 0x5c2   :  { %4669 = vmatprep.mubr.bf16.mxu0 %v11211_v43  ;;  %4710 = vmatprep.mubr.bf16.mxu1 %v11211_v43  ;;  %v4151_v34 = vadd.f32 1.0, %v8959_v30  ;;  %11386 = vst [vmem:[#allocation52_spill] sm:$0xff] %v10332_v46  ;;  %11387 = vst [vmem:[#allocation53_spill] sm:$0xff] %v10336_v42  ;;  %v10348_v30 = vld [vmem:[#allocation4 + $0x44] ss:$16 sps:$4 sm:$0xff]  }
 0x5c3   :  { %v4157_v48 = vadd.f32 %v4156_v45, %v4142_v44  ;;  %v10338_v44 = vld [vmem:[#allocation4 + $0x6c] ss:$16 sps:$4 sm:$0xff]   ;;  %v10342_v45 = vld [vmem:[#allocation4 + $0x60] ss:$16 sps:$4 sm:$0xff]   ;;  %11391 = vst [vmem:[#allocation57_spill] sm:$0xff] %v10348_v30 }
 0x5c4   :  { %4640 = vmatpush1.bf16.msra.mxu0 %v10303_v2  ;;  %4681 = vmatpush1.bf16.msra.mxu1 %v10305_v32  ;;  %11388 = vst [vmem:[#allocation54_spill] sm:$0xff] %v10338_v44  ;;  %11389 = vst [vmem:[#allocation55_spill] sm:$0xff] %v10342_v45 }
 0x5c5   :  { %8960 = vtanh.f32 %v4157_v48  ;;  %4641 = vmatprep.subr.bf16.mxu0 %v10310_v18  ;;  %4682 = vmatprep.subr.bf16.mxu1 %v10312_v19  ;;  %v10344_v48 = vld [vmem:[#allocation4 + $0x68] ss:$16 sps:$4 sm:$0xff]  }
 0x5c6   :  { %8962 = vrcp.f32 %v4151_v34  ;;  %11390 = vst [vmem:[#allocation56_spill] sm:$0xff] %v10344_v48  ;;  %v10354_v34 = vld [vmem:[#allocation4 + $0x40] ss:$16 sps:$4 sm:$0xff]  }
 0x5c7   :  { %11393 = vst [vmem:[#allocation59_spill] sm:$0xff] %v10354_v34 }
 0x5c8   :  { %4642 = vmatpush1.bf16.msra.mxu0 %v10318_v50  ;;  %4683 = vmatpush1.bf16.msra.mxu1 %v10320_v26 }
 0x5c9   :  { %4643 = vmatprep.subr.bf16.mxu0 %v10324_v23  ;;  %4684 = vmatprep.subr.bf16.mxu1 %v10326_v4  ;;  %v10350_v4 = vld [vmem:[#allocation4 + $0x4c] ss:$16 sps:$4 sm:$0xff]  }
 0x5ca   :  { %11392 = vst [vmem:[#allocation58_spill] sm:$0xff] %v10350_v4 }
 0x5cc   :  { %4644 = vmatpush1.bf16.msra.mxu0 %v10330_v25  ;;  %4685 = vmatpush1.bf16.msra.mxu1 %v10332_v46  ;;  %v10356_v25 = vld [vmem:[#allocation4 + $0x48] ss:$16 sps:$4 sm:$0xff]   ;;  %v10360_v46 = vld [vmem:[#allocation4 + $0x24] ss:$16 sps:$4 sm:$0xff]  }
 0x5cd   :  { %4645 = vmatprep.subr.bf16.mxu0 %v10336_v42  ;;  %4686 = vmatprep.subr.bf16.mxu1 %v10338_v44  ;;  %11394 = vst [vmem:[#allocation60_spill] sm:$0xff] %v10356_v25  ;;  %11395 = vst [vmem:[#allocation61_spill] sm:$0xff] %v10360_v46  ;;  %v10362_v42 = vld [vmem:[#allocation4 + $0x2c] ss:$16 sps:$4 sm:$0xff]  }
 0x5ce   :  { %11396 = vst [vmem:[#allocation62_spill] sm:$0xff] %v10362_v42 }
 0x5d0   :  { %4646 = vmatpush1.bf16.msra.mxu0 %v10342_v45  ;;  %4687 = vmatpush1.bf16.msra.mxu1 %v10344_v48  ;;  %v10366_v45 = vld [vmem:[#allocation4 + $0x20] ss:$16 sps:$4 sm:$0xff]   ;;  %v10368_v48 = vld [vmem:[#allocation4 + $0x28] ss:$16 sps:$4 sm:$0xff]  }
 0x5d1   :  { %4647 = vmatprep.subr.bf16.mxu0 %v10348_v30  ;;  %4688 = vmatprep.subr.bf16.mxu1 %v10350_v4  ;;  %v10372_v30 = vld [vmem:[#allocation4 + $0x4] ss:$16 sps:$4 sm:$0xff]   ;;  %v10374_v4 = vld [vmem:[#allocation4 + $0xc] ss:$16 sps:$4 sm:$0xff]  }
 0x5d2   :  { %v8961_v44 = vpop.eup %8960 }
 0x5d3   :  { %v4160_v23 = vrot.slane %v8961_v44, 2  ;;  %v8963_v19 = vpop.eup %8962 }
 0x5d4   :  { %4648 = vmatpush1.bf16.msra.mxu0 %v10354_v34  ;;  %4689 = vmatpush1.bf16.msra.mxu1 %v10356_v25  ;;  %v10379_v25 = vld [vmem:[#allocation4] ss:$16 sps:$4 sm:$0xff]   ;;  %v10381_v34 = vld [vmem:[#allocation4 + $0x8] ss:$16 sps:$4 sm:$0xff]  }
 0x5d5   :  { %4649 = vmatprep.subr.bf16.mxu0 %v10360_v46  ;;  %4690 = vmatprep.subr.bf16.mxu1 %v10362_v42  ;;  %v4162_v26 = vsub.f32 %v10159_v17, %v4160_v23 }
 0x5d7   :  { %v4164_v50 = vrot.slane %v4162_v26, 6  ;;  %v11429_v26 = vld [vmem:[#allocation45_spill] sm:$0xff] }
 0x5d8   :  { %4650 = vmatpush1.bf16.msra.mxu0 %v10366_v45  ;;  %4691 = vmatpush1.bf16.msra.mxu1 %v10368_v48 }
 0x5d9   :  { %4651 = vmatprep.subr.bf16.mxu0 %v10372_v30  ;;  %4692 = vmatprep.subr.bf16.mxu1 %v10374_v4  ;;  %v4166_v42 = vmul.f32 %v8963_v19, %v4164_v50  ;;  %v11427_v19 = vld [vmem:[#allocation43_spill] sm:$0xff]  ;;  %v11428_v50 = vld [vmem:[#allocation44_spill] sm:$0xff] }
 0x5db   :  { %v4167_v46 = vadd.f32 %v8961_v44, %v4166_v42 }
 0x5dc   :  { %4652 = vmatpush1.bf16.msra.mxu0 %v10379_v25  ;;  %4693 = vmatpush1.bf16.msra.mxu1 %v10381_v34 }
 0x5dd   :  { %v4169_v17 = vpack.c.bf16 %v4167_v46, %v4167_v46  ;;  %4937 = vmatprep.subr.bf16.mxu0 %v10063_v16  ;;  %4978 = vmatprep.subr.bf16.mxu1 %v10065_v41  ;;  %v10418_v16 = vld [vmem:[%s10984_s1 + $0xa] sm:$0x3] }
 0x5de   :  { %v10425_v41 = vmul.f32 %v4167_v46, %v10418_v16 }
 0x5df   :  { %4670 = vmatmul.mubr.bf16.vlgmr.msra.gmra.mxu0 %v4169_v17  ;;  %4711 = vmatmul.mubr.bf16.vlgmr.msra.gmra.mxu1 %v4169_v17 }
 0x5e0   :  { %4938 = vmatpush1.bf16.msra.mxu0 %v10071_v9  ;;  %4979 = vmatpush1.bf16.msra.mxu1 %v10073_v36  ;;  %v4744_v9 = vpack.c.bf16 %v10425_v41, %v10425_v41  ;;  %v11397_v36 = vld [vmem:[#allocation9_spill] sm:$0xff] }
 0x5e1   :  { %4939 = vmatprep.subr.bf16.mxu0 %v10075_v53  ;;  %4980 = vmatprep.subr.bf16.mxu1 %v10077_v56  ;;  %v11398_v53 = vld [vmem:[#allocation10_spill] sm:$0xff]  ;;  %v11399_v56 = vld [vmem:[#allocation11_spill] sm:$0xff] }
 0x5e2   :  { %4969 = vmatprep.mubr.bf16.mxu0 %v11211_v43  ;;  %5010 = vmatprep.mubr.bf16.mxu1 %v11211_v43 }
 0x5e4   :  { %4940 = vmatpush1.bf16.msra.mxu0 %v10081_v24  ;;  %4981 = vmatpush1.bf16.msra.mxu1 %v10083_v54  ;;  %v11400_v24 = vld [vmem:[#allocation12_spill] sm:$0xff]  ;;  %v11401_v54 = vld [vmem:[#allocation13_spill] sm:$0xff] }
 0x5e5   :  { %4941 = vmatprep.subr.bf16.mxu0 %v10087_v58  ;;  %4982 = vmatprep.subr.bf16.mxu1 %v10089_v59  ;;  %v11402_v58 = vld [vmem:[#allocation14_spill] sm:$0xff]  ;;  %v11403_v59 = vld [vmem:[#allocation15_spill] sm:$0xff] }
 0x5e8   :  { %4942 = vmatpush1.bf16.msra.mxu0 %v10095_v60  ;;  %4983 = vmatpush1.bf16.msra.mxu1 %v10097_v0  ;;  %v11404_v60 = vld [vmem:[#allocation16_spill] sm:$0xff]  ;;  %v11405_v0 = vld [vmem:[#allocation17_spill] sm:$0xff] }
 0x5e9   :  { %4943 = vmatprep.subr.bf16.mxu0 %v10101_v61  ;;  %4984 = vmatprep.subr.bf16.mxu1 %v10103_v47  ;;  %v11406_v61 = vld [vmem:[#allocation18_spill] sm:$0xff]  ;;  %v11407_v47 = vld [vmem:[#allocation19_spill] sm:$0xff] }
 0x5ec   :  { %4944 = vmatpush1.bf16.msra.mxu0 %v10107_v62  ;;  %4985 = vmatpush1.bf16.msra.mxu1 %v10109_v20  ;;  %v11408_v62 = vld [vmem:[#allocation20_spill] sm:$0xff]  ;;  %v11409_v20 = vld [vmem:[#allocation21_spill] sm:$0xff] }
 0x5ed   :  { %4945 = vmatprep.subr.bf16.mxu0 %v10113_v57  ;;  %4986 = vmatprep.subr.bf16.mxu1 %v10115_v63  ;;  %v11410_v57 = vld [vmem:[#allocation22_spill] sm:$0xff]  ;;  %v11411_v63 = vld [vmem:[#allocation23_spill] sm:$0xff] }
 0x5f0   :  { %4946 = vmatpush1.bf16.msra.mxu0 %v10119_v21  ;;  %4987 = vmatpush1.bf16.msra.mxu1 %v10121_v1  ;;  %v11412_v21 = vld [vmem:[#allocation24_spill] sm:$0xff]  ;;  %v11413_v1 = vld [vmem:[#allocation25_spill] sm:$0xff] }
 0x5f1   :  { %4947 = vmatprep.subr.bf16.mxu0 %v10125_v27  ;;  %4988 = vmatprep.subr.bf16.mxu1 %v10127_v22  ;;  %v11414_v27 = vld [vmem:[#allocation26_spill] sm:$0xff]  ;;  %v11415_v22 = vld [vmem:[#allocation27_spill] sm:$0xff] }
 0x5f4   :  { %4948 = vmatpush1.bf16.msra.mxu0 %v10136_v5  ;;  %4989 = vmatpush1.bf16.msra.mxu1 %v10138_v6  ;;  %v11416_v5 = vld [vmem:[#allocation28_spill] sm:$0xff]  ;;  %v11417_v6 = vld [vmem:[#allocation29_spill] sm:$0xff] }
 0x5f5   :  { %4949 = vmatprep.subr.bf16.mxu0 %v10142_v7  ;;  %4990 = vmatprep.subr.bf16.mxu1 %v10144_v11  ;;  %v11418_v7 = vld [vmem:[#allocation30_spill] sm:$0xff]  ;;  %v11419_v11 = vld [vmem:[#allocation31_spill] sm:$0xff] }
 0x5f8   :  { %4950 = vmatpush1.bf16.msra.mxu0 %v10149_v12  ;;  %4991 = vmatpush1.bf16.msra.mxu1 %v10151_v29  ;;  %v11420_v12 = vld [vmem:[#allocation32_spill] sm:$0xff]  ;;  %v11421_v29 = vld [vmem:[#allocation33_spill] sm:$0xff] }
 0x5f9   :  { %4951 = vmatprep.subr.bf16.mxu0 %v10155_v13  ;;  %4992 = vmatprep.subr.bf16.mxu1 %v10157_v40  ;;  %v11422_v13 = vld [vmem:[#allocation34_spill] sm:$0xff]  ;;  %v11423_v40 = vld [vmem:[#allocation35_spill] sm:$0xff] }
 0x5fc   :  { %4952 = vmatpush1.bf16.msra.mxu0 %v10163_v38  ;;  %4993 = vmatpush1.bf16.msra.mxu1 %v10165_v37  ;;  %v11424_v38 = vld [vmem:[#allocation40_spill] sm:$0xff]  ;;  %v11425_v37 = vld [vmem:[#allocation41_spill] sm:$0xff] }
 0x5fd   :  { %5286 = vmatprep.subr.bf16.mxu0 %v10175_v55  ;;  %5327 = vmatprep.subr.bf16.mxu1 %v11397_v36  ;;  %v11426_v55 = vld [vmem:[#allocation42_spill] sm:$0xff] }
 0x5ff   :  { %4970 = vmatmul.mubr.bf16.vlgmr.msra.gmra.mxu0 %v4744_v9  ;;  %5011 = vmatmul.mubr.bf16.vlgmr.msra.gmra.mxu1 %v4744_v9 }
 0x600   :  { %5287 = vmatpush1.bf16.msra.mxu0 %v11398_v53  ;;  %5328 = vmatpush1.bf16.msra.mxu1 %v11399_v56 }
 0x601   :  { %5288 = vmatprep.subr.bf16.mxu0 %v11400_v24  ;;  %5329 = vmatprep.subr.bf16.mxu1 %v11401_v54 }
 0x602   :  { %5318 = vmatprep.mubr.bf16.mxu0 %v11211_v43  ;;  %5359 = vmatprep.mubr.bf16.mxu1 %v11211_v43 }
 0x604   :  { %5289 = vmatpush1.bf16.msra.mxu0 %v11402_v58  ;;  %5330 = vmatpush1.bf16.msra.mxu1 %v11403_v59 }
 0x605   :  { %5290 = vmatprep.subr.bf16.mxu0 %v11404_v60  ;;  %5331 = vmatprep.subr.bf16.mxu1 %v11405_v0 }
 0x608   :  { %5291 = vmatpush1.bf16.msra.mxu0 %v11406_v61  ;;  %5332 = vmatpush1.bf16.msra.mxu1 %v11407_v47 }
 0x609   :  { %5292 = vmatprep.subr.bf16.mxu0 %v11408_v62  ;;  %5333 = vmatprep.subr.bf16.mxu1 %v11409_v20 }
 0x60c   :  { %5293 = vmatpush1.bf16.msra.mxu0 %v11410_v57  ;;  %5334 = vmatpush1.bf16.msra.mxu1 %v11411_v63 }
 0x60d   :  { %5294 = vmatprep.subr.bf16.mxu0 %v11412_v21  ;;  %5335 = vmatprep.subr.bf16.mxu1 %v11413_v1 }
 0x610   :  { %5295 = vmatpush1.bf16.msra.mxu0 %v11414_v27  ;;  %5336 = vmatpush1.bf16.msra.mxu1 %v11415_v22 }
 0x611   :  { %5296 = vmatprep.subr.bf16.mxu0 %v11416_v5  ;;  %5337 = vmatprep.subr.bf16.mxu1 %v11417_v6 }
 0x614   :  { %5297 = vmatpush1.bf16.msra.mxu0 %v11418_v7  ;;  %5338 = vmatpush1.bf16.msra.mxu1 %v11419_v11 }
 0x615   :  { %5298 = vmatprep.subr.bf16.mxu0 %v11420_v12  ;;  %5339 = vmatprep.subr.bf16.mxu1 %v11421_v29 }
 0x618   :  { %5299 = vmatpush1.bf16.msra.mxu0 %v11422_v13  ;;  %5340 = vmatpush1.bf16.msra.mxu1 %v11423_v40 }
 0x619   :  { %5300 = vmatprep.subr.bf16.mxu0 %v11424_v38  ;;  %5341 = vmatprep.subr.bf16.mxu1 %v11425_v37 }
 0x61c   :  { %5301 = vmatpush1.bf16.msra.mxu0 %v11426_v55  ;;  %5342 = vmatpush1.bf16.msra.mxu1 %v11427_v19 }
 0x61d   :  { %5531 = vmatprep.subr.bf16.mxu0 %v11428_v50  ;;  %5572 = vmatprep.subr.bf16.mxu1 %v11429_v26 }
 0x67f   :  { %v4429_v23 = vpop.f32.mrf.mxu0  ;;  %v4470_v46 = vpop.f32.mrf.mxu1 }
 0x681   :  { %v4431_v42 = vpop.f32.mrf.mxu0  ;;  %v4472_v44 = vpop.f32.mrf.mxu1 }
 0x683   :  { %v4433_v17 = vpop.f32.mrf.mxu0  ;;  %v4474_v9 = vpop.f32.mrf.mxu1 }
 0x685   :  { %v4434_v36 = vpop.f32.mrf.mxu0  ;;  %v4475_v53 = vpop.f32.mrf.mxu1 }
 0x69f   :  { %v4671_v56 = vpop.f32.mrf.mxu0  ;;  %v4712_v24 = vpop.f32.mrf.mxu1 }
 0x6a0   :  { %v4672_v54 = vadd.f32 %v4671_v56, %v4429_v23  ;;  %v4713_v7 = vadd.f32 %v4712_v24, %v4470_v46 }
 0x6a1   :  { %v4673_v58 = vpop.f32.mrf.mxu0  ;;  %v4714_v59 = vpop.f32.mrf.mxu1 }
 0x6a2   :  { %v4719_v60 = vadd.f32 %v4672_v54, %v9547_v52  ;;  %v4674_v57 = vadd.f32 %v4673_v58, %v4431_v42  ;;  %v4715_v22 = vadd.f32 %v4714_v59, %v4472_v44  ;;  %v4721_v50 = vadd.f32 %v4713_v7, %v9562_v15  ;;  %v11440_v7 = vld [vmem:[#allocation56_spill] sm:$0xff] }
 0x6a3   :  { %v4675_v0 = vpop.f32.mrf.mxu0  ;;  %v4716_v61 = vpop.f32.mrf.mxu1 }
 0x6a4   :  { %v7966_v47 = vmul.f32 -1.442695, %v4719_v60  ;;  %v4720_v63 = vadd.f32 %v4674_v57, %v9552_v3  ;;  %v4722_v40 = vadd.f32 %v4715_v22, %v9558_v10  ;;  %v11434_v22 = vld [vmem:[#allocation50_spill] sm:$0xff] }
 0x6a5   :  { %v4676_v62 = vpop.f32.mrf.mxu0  ;;  %v4717_v20 = vpop.f32.mrf.mxu1 }
 0x6a6   :  { %8964 = vpow2.f32 %v7966_v47  ;;  %v7967_v21 = vmul.f32 -1.442695, %v4720_v63 }
 0x6a8   :  { %8966 = vpow2.f32 %v7967_v21  ;;  %v11432_v21 = vld [vmem:[#allocation48_spill] sm:$0xff] }
 0x6b3   :  { %v8965_v1 = vpop.eup %8964 }
 0x6b4   :  { %v4729_v27 = vadd.f32 1.0, %v8965_v1 }
 0x6b5   :  { %v8967_v13 = vpop.eup %8966 }
 0x6b6   :  { %8968 = vrcp.f32 %v4729_v27  ;;  %v4730_v17 = vadd.f32 1.0, %v8967_v13  ;;  %v11433_v27 = vld [vmem:[#allocation49_spill] sm:$0xff]  ;;  %v11443_v13 = vld [vmem:[#allocation59_spill] sm:$0xff] }
 0x6bf   :  { %v4971_v5 = vpop.f32.mrf.mxu0  ;;  %v5012_v6 = vpop.f32.mrf.mxu1 }
 0x6c0   :  { %v5023_v11 = vrot.slane %v4971_v5, 6  ;;  %v5025_v20 = vrot.slane %v5012_v6, 6  ;;  %v11435_v5 = vld [vmem:[#allocation51_spill] sm:$0xff] }
 0x6c1   :  { %v4973_v12 = vpop.f32.mrf.mxu0  ;;  %v5014_v29 = vpop.f32.mrf.mxu1  ;;  %v11439_v6 = vld [vmem:[#allocation55_spill] sm:$0xff] }
 0x6c2   :  { %v5031_v38 = vadd.f32 %v5023_v11, %v11376_v33  ;;  %v5024_v46 = vrot.slane %v4973_v12, 6  ;;  %v5026_v47 = vrot.slane %v5014_v29, 6  ;;  %v11441_v11 = vld [vmem:[#allocation57_spill] sm:$0xff]  ;;  %v11442_v12 = vld [vmem:[#allocation58_spill] sm:$0xff] }
 0x6c3   :  { %v8969_v37 = vpop.eup %8968  ;;  %v4975_v55 = vpop.f32.mrf.mxu0 }
 0x6c4   :  { %v5016_v19 = vpop.f32.mrf.mxu1  ;;  %v4735_v26 = vmul.f32 %v8969_v37, %v4722_v40  ;;  %v8001_v23 = vmul.f32 -1.442695, %v5031_v38  ;;  %v5032_v36 = vadd.f32 %v5024_v46, %v11377_v49  ;;  %v11444_v40 = vld [vmem:[#allocation60_spill] sm:$0xff]  ;;  %v11445_v38 = vld [vmem:[#allocation61_spill] sm:$0xff]  ;;  %v11446_v37 = vld [vmem:[#allocation62_spill] sm:$0xff] }
 0x6c5   :  { %v4976_v42 = vpop.f32.mrf.mxu0  ;;  %v10539_v46 = vld [vmem:[#allocation2 + $0xa4] ss:$16 sps:$4 sm:$0xff]  }
 0x6c6   :  { %v5017_v44 = vpop.f32.mrf.mxu1  ;;  %v4736_v9 = vadd.f32 %v4735_v26, %v4721_v50  ;;  %8970 = vpow2.f32 %v8001_v23  ;;  %v8002_v54 = vmul.f32 -1.442695, %v5032_v36  ;;  %v10515_v50 = vld [vmem:[#allocation2 + $0xe4] ss:$16 sps:$4 sm:$0xff]   ;;  %v10517_v26 = vld [vmem:[#allocation2 + $0xec] ss:$16 sps:$4 sm:$0xff]  }
 0x6c7   :  { %v10541_v36 = vld [vmem:[#allocation2 + $0xac] ss:$16 sps:$4 sm:$0xff]  }
 0x6c8   :  { %8972 = vtanh.f32 %v4736_v9  ;;  %v10529_v9 = vld [vmem:[#allocation2 + $0xcc] ss:$16 sps:$4 sm:$0xff]  }
 0x6c9   :  { %8974 = vrcp.f32 %v4730_v17  ;;  %v10527_v17 = vld [vmem:[#allocation2 + $0xc4] ss:$16 sps:$4 sm:$0xff]  }
 0x6d3   :  { %v8971_v53 = vpop.eup %8970 }
 0x6d4   :  { %v5041_v56 = vadd.f32 1.0, %v8971_v53  ;;  %v10547_v53 = vld [vmem:[#allocation2 + $0xa0] ss:$16 sps:$4 sm:$0xff]  }
 0x6d5   :  { %v8973_v24 = vpop.eup %8972 }
 0x6d6   :  { %8976 = vrcp.f32 %v5041_v56  ;;  %v4738_v58 = vsub.f32 %v10288_v14, %v8973_v24  ;;  %v8975_v59 = vpop.eup %8974  ;;  %v5034_v14 = vadd.f32 %v5026_v47, %v11378_v51  ;;  %v10549_v56 = vld [vmem:[#allocation2 + $0xa8] ss:$16 sps:$4 sm:$0xff]   ;;  %v10571_v47 = vld [vmem:[#allocation2 + $0x60] ss:$16 sps:$4 sm:$0xff]  }
 0x6d7   :  { %8978 = vpow2.f32 %v8002_v54  ;;  %v10555_v54 = vld [vmem:[#allocation2 + $0x8c] ss:$16 sps:$4 sm:$0xff]  }
 0x6d8   :  { %v4739_v60 = vmul.f32 %v8975_v59, %v4738_v58  ;;  %v10559_v58 = vld [vmem:[#allocation2 + $0x80] ss:$16 sps:$4 sm:$0xff]   ;;  %v10561_v59 = vld [vmem:[#allocation2 + $0x88] ss:$16 sps:$4 sm:$0xff]  }
 0x6da   :  { %v4740_v0 = vadd.f32 %v8973_v24, %v4739_v60  ;;  %v10553_v24 = vld [vmem:[#allocation2 + $0x84] ss:$16 sps:$4 sm:$0xff]  }
 0x6db   :  { %v10565_v60 = vld [vmem:[#allocation2 + $0x64] ss:$16 sps:$4 sm:$0xff]  }
 0x6dc   :  { %7968 = vst [vmem:[%s10991_s8 + $0x8] sm:$0x3] %v4740_v0  ;;  %v10478_v61 = vmul.f32 %v4740_v0, %v10418_v16  ;;  %v5033_v16 = vadd.f32 %v5025_v20, %v11379_v31  ;;  %v10567_v0 = vld [vmem:[#allocation2 + $0x6c] ss:$16 sps:$4 sm:$0xff]   ;;  %v10577_v20 = vld [vmem:[#allocation2 + $0x44] ss:$16 sps:$4 sm:$0xff]  }
 0x6de   :  { %v5093_v62 = vpack.c.bf16 %v10478_v61, %v10478_v61 }
 0x6e0   :  { %5319 = vmatmul.mubr.bf16.vlgmr.msra.gmra.mxu0 %v5093_v62  ;;  %5360 = vmatmul.mubr.bf16.vlgmr.msra.gmra.mxu1 %v5093_v62  ;;  %v10573_v62 = vld [vmem:[#allocation2 + $0x68] ss:$16 sps:$4 sm:$0xff]  }
 0x6e1   :  { %5532 = vmatpush1.bf16.msra.mxu0 %v10290_v39  ;;  %5573 = vmatpush1.bf16.msra.mxu1 %v10292_v28  ;;  %v11430_v28 = vld [vmem:[#allocation46_spill] sm:$0xff] }
 0x6e2   :  { %5533 = vmatprep.subr.bf16.mxu0 %v10296_v35  ;;  %5574 = vmatprep.subr.bf16.mxu1 %v10298_v8  ;;  %v11431_v8 = vld [vmem:[#allocation47_spill] sm:$0xff] }
 0x6e3   :  { %v8977_v57 = vpop.eup %8976  ;;  %5563 = vmatprep.mubr.bf16.mxu0 %v11211_v43  ;;  %5604 = vmatprep.mubr.bf16.mxu1 %v11211_v43 }
 0x6e4   :  { %v5047_v63 = vmul.f32 %v8977_v57, %v5034_v14  ;;  %v8979_v35 = vpop.eup %8978  ;;  %v10579_v14 = vld [vmem:[#allocation2 + $0x4c] ss:$16 sps:$4 sm:$0xff]  }
 0x6e5   :  { %5534 = vmatpush1.bf16.msra.mxu0 %v10303_v2  ;;  %5575 = vmatpush1.bf16.msra.mxu1 %v10305_v32  ;;  %v5042_v1 = vadd.f32 1.0, %v8979_v35  ;;  %v11436_v2 = vld [vmem:[#allocation52_spill] sm:$0xff]  ;;  %v11437_v32 = vld [vmem:[#allocation53_spill] sm:$0xff]  ;;  %v10584_v57 = vld [vmem:[%s10984_s1 + $0xc] sm:$0x3] }
 0x6e6   :  { %v5048_v39 = vadd.f32 %v5047_v63, %v5033_v16  ;;  %5535 = vmatprep.subr.bf16.mxu0 %v10310_v18  ;;  %5576 = vmatprep.subr.bf16.mxu1 %v11430_v28  ;;  %v11438_v18 = vld [vmem:[#allocation54_spill] sm:$0xff]  ;;  %v10588_v16 = vld [vmem:[#allocation2 + $0x40] ss:$16 sps:$4 sm:$0xff]   ;;  %v5638_v35 = vrot.slane %v10584_v57, 6 }
 0x6e7   :  { %v10590_v63 = vld [vmem:[#allocation2 + $0x48] ss:$16 sps:$4 sm:$0xff]   ;;  %v10596_v28 = vld [vmem:[#allocation2 + $0x2c] ss:$16 sps:$4 sm:$0xff]  }
 0x6e8   :  { %8980 = vtanh.f32 %v5048_v39  ;;  %v10594_v39 = vld [vmem:[#allocation2 + $0x24] ss:$16 sps:$4 sm:$0xff]  }
 0x6e9   :  { %5536 = vmatpush1.bf16.msra.mxu0 %v11431_v8  ;;  %5577 = vmatpush1.bf16.msra.mxu1 %v11432_v21  ;;  %8982 = vrcp.f32 %v5042_v1  ;;  %v10601_v8 = vld [vmem:[#allocation2 + $0x20] ss:$16 sps:$4 sm:$0xff]   ;;  %v10603_v21 = vld [vmem:[#allocation2 + $0x28] ss:$16 sps:$4 sm:$0xff]   ;;  %v10607_v1 = vld [vmem:[#allocation2 + $0x4] ss:$16 sps:$4 sm:$0xff]  }
 0x6ea   :  { %5537 = vmatprep.subr.bf16.mxu0 %v11433_v27  ;;  %5578 = vmatprep.subr.bf16.mxu1 %v11434_v22  ;;  %v10609_v27 = vld [vmem:[#allocation2 + $0xc] ss:$16 sps:$4 sm:$0xff]  }
 0x6eb   :  { %11447 = vst [vmem:[#allocation36_spill] sm:$0xff] %v10609_v27 }
 0x6ed   :  { %5538 = vmatpush1.bf16.msra.mxu0 %v11435_v5  ;;  %5579 = vmatpush1.bf16.msra.mxu1 %v11436_v2  ;;  %v10615_v5 = vld [vmem:[#allocation2] ss:$16 sps:$4 sm:$0xff]   ;;  %v10617_v2 = vld [vmem:[#allocation2 + $0x8] ss:$16 sps:$4 sm:$0xff]  }
 0x6ee   :  { %5539 = vmatprep.subr.bf16.mxu0 %v11437_v32  ;;  %5580 = vmatprep.subr.bf16.mxu1 %v11438_v18  ;;  %11448 = vst [vmem:[#allocation38_spill] sm:$0xff] %v10615_v5  ;;  %11449 = vst [vmem:[#allocation39_spill] sm:$0xff] %v10617_v2 }
 0x6f1   :  { %5540 = vmatpush1.bf16.msra.mxu0 %v11439_v6  ;;  %5581 = vmatpush1.bf16.msra.mxu1 %v11440_v7  ;;  %v10627_v6 = vld [vmem:[#allocation6 + $0xe4] ss:$16 sps:$4 sm:$0xff]   ;;  %v10629_v7 = vld [vmem:[#allocation6 + $0xec] ss:$16 sps:$4 sm:$0xff]  }
 0x6f2   :  { %5541 = vmatprep.subr.bf16.mxu0 %v11441_v11  ;;  %5582 = vmatprep.subr.bf16.mxu1 %v11442_v12  ;;  %11450 = vst [vmem:[#allocation37_spill] sm:$0xff] %v10627_v6  ;;  %11451 = vst [vmem:[#allocation9_spill] sm:$0xff] %v10629_v7  ;;  %v10631_v11 = vld [vmem:[#allocation6 + $0xe0] ss:$16 sps:$4 sm:$0xff]   ;;  %v10633_v12 = vld [vmem:[#allocation6 + $0xe8] ss:$16 sps:$4 sm:$0xff]  }
 0x6f3   :  { %11452 = vst [vmem:[#allocation10_spill] sm:$0xff] %v10631_v11  ;;  %11453 = vst [vmem:[#allocation11_spill] sm:$0xff] %v10633_v12 }
 0x6f5   :  { %v8981_v29 = vpop.eup %8980  ;;  %5542 = vmatpush1.bf16.msra.mxu0 %v11443_v13  ;;  %5583 = vmatpush1.bf16.msra.mxu1 %v11444_v40  ;;  %v10641_v13 = vld [vmem:[#allocation6 + $0xcc] ss:$16 sps:$4 sm:$0xff]   ;;  %v10643_v40 = vld [vmem:[#allocation6 + $0xc0] ss:$16 sps:$4 sm:$0xff]  }
 0x6f6   :  { %5543 = vmatprep.subr.bf16.mxu0 %v11445_v38  ;;  %5584 = vmatprep.subr.bf16.mxu1 %v11446_v37  ;;  %v5051_v55 = vrot.slane %v8981_v29, 2  ;;  %v8983_v42 = vpop.eup %8982  ;;  %11455 = vst [vmem:[#allocation13_spill] sm:$0xff] %v10641_v13  ;;  %11456 = vst [vmem:[#allocation14_spill] sm:$0xff] %v10643_v40  ;;  %v10645_v38 = vld [vmem:[#allocation6 + $0xc8] ss:$16 sps:$4 sm:$0xff]  }
 0x6f7   :  { %11457 = vst [vmem:[#allocation15_spill] sm:$0xff] %v10645_v38  ;;  %v10651_v37 = vld [vmem:[#allocation6 + $0xa4] ss:$16 sps:$4 sm:$0xff]  }
 0x6f8   :  { %v5053_v19 = vsub.f32 %v10425_v41, %v5051_v55  ;;  %11458 = vst [vmem:[#allocation16_spill] sm:$0xff] %v10651_v37  ;;  %v10653_v55 = vld [vmem:[#allocation6 + $0xac] ss:$16 sps:$4 sm:$0xff]  }
 0x6f9   :  { %5544 = vmatpush1.bf16.msra.mxu0 %v10366_v45  ;;  %5585 = vmatpush1.bf16.msra.mxu1 %v10368_v48  ;;  %11459 = vst [vmem:[#allocation17_spill] sm:$0xff] %v10653_v55 }
 0x6fa   :  { %5545 = vmatprep.subr.bf16.mxu0 %v10372_v30  ;;  %5586 = vmatprep.subr.bf16.mxu1 %v10374_v4  ;;  %v5055_v23 = vrot.slane %v5053_v19, 6  ;;  %v10523_v30 = vld [vmem:[#allocation2 + $0xe0] ss:$16 sps:$4 sm:$0xff]   ;;  %v10525_v4 = vld [vmem:[#allocation2 + $0xe8] ss:$16 sps:$4 sm:$0xff]  }
 0x6fb   :  { %v10655_v19 = vld [vmem:[#allocation6 + $0xa0] ss:$16 sps:$4 sm:$0xff]  }
 0x6fc   :  { %v5057_v44 = vmul.f32 %v8983_v42, %v5055_v23  ;;  %11460 = vst [vmem:[#allocation18_spill] sm:$0xff] %v10655_v19  ;;  %v10657_v23 = vld [vmem:[#allocation6 + $0xa8] ss:$16 sps:$4 sm:$0xff]   ;;  %v10663_v42 = vld [vmem:[#allocation6 + $0x84] ss:$16 sps:$4 sm:$0xff]  }
 0x6fd   :  { %5546 = vmatpush1.bf16.msra.mxu0 %v10379_v25  ;;  %5587 = vmatpush1.bf16.msra.mxu1 %v10381_v34  ;;  %v10533_v25 = vld [vmem:[#allocation2 + $0xc0] ss:$16 sps:$4 sm:$0xff]   ;;  %v10535_v34 = vld [vmem:[#allocation2 + $0xc8] ss:$16 sps:$4 sm:$0xff]   ;;  %11461 = vst [vmem:[#allocation19_spill] sm:$0xff] %v10657_v23  ;;  %11462 = vst [vmem:[#allocation20_spill] sm:$0xff] %v10663_v42 }
 0x6fe   :  { %5837 = vmatprep.subr.bf16.mxu0 %v10515_v50  ;;  %5878 = vmatprep.subr.bf16.mxu1 %v10517_v26  ;;  %v5058_v45 = vadd.f32 %v8981_v29, %v5057_v44  ;;  %v10639_v29 = vld [vmem:[#allocation6 + $0xc4] ss:$16 sps:$4 sm:$0xff]   ;;  %v10665_v44 = vld [vmem:[#allocation6 + $0x8c] ss:$16 sps:$4 sm:$0xff]  }
 0x6ff   :  { %11454 = vst [vmem:[#allocation12_spill] sm:$0xff] %v10639_v29  ;;  %11463 = vst [vmem:[#allocation21_spill] sm:$0xff] %v10665_v44 }
 0x700   :  { %v5060_v48 = vpack.c.bf16 %v5058_v45, %v5058_v45  ;;  %v10611_v22 = vmul.f32 %v5638_v35, %v5058_v45  ;;  %v10667_v45 = vld [vmem:[#allocation6 + $0x80] ss:$16 sps:$4 sm:$0xff]   ;;  %v10677_v35 = vld [vmem:[#allocation6 + $0x6c] ss:$16 sps:$4 sm:$0xff]  }
 0x701   :  { %11464 = vst [vmem:[#allocation22_spill] sm:$0xff] %v10667_v45  ;;  %11467 = vst [vmem:[#allocation25_spill] sm:$0xff] %v10677_v35 }
 0x702   :  { %v5369_v41 = vrot.slane %v5060_v48, 1  ;;  %v5641_v32 = vpack.c.bf16 %v10611_v22, %v10611_v22  ;;  %v10669_v48 = vld [vmem:[#allocation6 + $0x88] ss:$16 sps:$4 sm:$0xff]  }
 0x703   :  { %11465 = vst [vmem:[#allocation23_spill] sm:$0xff] %v10669_v48 }
 0x704   :  { %5564 = vmatmul.mubr.bf16.vlgmr.msra.gmra.mxu0 %v5369_v41  ;;  %5605 = vmatmul.mubr.bf16.vlgmr.msra.gmra.mxu1 %v5369_v41  ;;  %v5675_v18 = vrot.slane %v5641_v32, 1  ;;  %v10675_v41 = vld [vmem:[#allocation6 + $0x64] ss:$16 sps:$4 sm:$0xff]   ;;  %v10679_v32 = vld [vmem:[#allocation6 + $0x60] ss:$16 sps:$4 sm:$0xff]  }
 0x705   :  { %5838 = vmatpush1.bf16.msra.mxu0 %v10523_v30  ;;  %5879 = vmatpush1.bf16.msra.mxu1 %v10525_v4  ;;  %11466 = vst [vmem:[#allocation24_spill] sm:$0xff] %v10675_v41  ;;  %11468 = vst [vmem:[#allocation26_spill] sm:$0xff] %v10679_v32 }
 0x706   :  { %5839 = vmatprep.subr.bf16.mxu0 %v10527_v17  ;;  %5880 = vmatprep.subr.bf16.mxu1 %v10529_v9 }
 0x707   :  { %5869 = vmatprep.mubr.bf16.mxu0 %v11211_v43  ;;  %5910 = vmatprep.mubr.bf16.mxu1 %v11211_v43 }
 0x709   :  { %5840 = vmatpush1.bf16.msra.mxu0 %v10533_v25  ;;  %5881 = vmatpush1.bf16.msra.mxu1 %v10535_v34 }
 0x70a   :  { %5841 = vmatprep.subr.bf16.mxu0 %v10539_v46  ;;  %5882 = vmatprep.subr.bf16.mxu1 %v10541_v36 }
 0x70d   :  { %5842 = vmatpush1.bf16.msra.mxu0 %v10547_v53  ;;  %5883 = vmatpush1.bf16.msra.mxu1 %v10549_v56 }
 0x70e   :  { %5843 = vmatprep.subr.bf16.mxu0 %v10553_v24  ;;  %5884 = vmatprep.subr.bf16.mxu1 %v10555_v54 }
 0x711   :  { %5844 = vmatpush1.bf16.msra.mxu0 %v10559_v58  ;;  %5885 = vmatpush1.bf16.msra.mxu1 %v10561_v59 }
 0x712   :  { %5845 = vmatprep.subr.bf16.mxu0 %v10565_v60  ;;  %5886 = vmatprep.subr.bf16.mxu1 %v10567_v0 }
 0x715   :  { %5846 = vmatpush1.bf16.msra.mxu0 %v10571_v47  ;;  %5887 = vmatpush1.bf16.msra.mxu1 %v10573_v62 }
 0x716   :  { %5847 = vmatprep.subr.bf16.mxu0 %v10577_v20  ;;  %5888 = vmatprep.subr.bf16.mxu1 %v10579_v14 }
 0x719   :  { %5848 = vmatpush1.bf16.msra.mxu0 %v10588_v16  ;;  %5889 = vmatpush1.bf16.msra.mxu1 %v10590_v63 }
 0x71a   :  { %5849 = vmatprep.subr.bf16.mxu0 %v10594_v39  ;;  %5890 = vmatprep.subr.bf16.mxu1 %v10596_v28 }
 0x71d   :  { %5850 = vmatpush1.bf16.msra.mxu0 %v10601_v8  ;;  %5891 = vmatpush1.bf16.msra.mxu1 %v10603_v21 }
 0x71e   :  { %5851 = vmatprep.subr.bf16.mxu0 %v10607_v1  ;;  %5892 = vmatprep.subr.bf16.mxu1 %v10609_v27 }
 0x721   :  { %5852 = vmatpush1.bf16.msra.mxu0 %v10615_v5  ;;  %5893 = vmatpush1.bf16.msra.mxu1 %v10617_v2 }
 0x722   :  { %6186 = vmatprep.subr.bf16.mxu0 %v10627_v6  ;;  %6227 = vmatprep.subr.bf16.mxu1 %v10629_v7 }
 0x724   :  { %5870 = vmatmul.mubr.bf16.vlgmr.msra.gmra.mxu0 %v5675_v18  ;;  %5911 = vmatmul.mubr.bf16.vlgmr.msra.gmra.mxu1 %v5675_v18  ;;  %v10681_v18 = vld [vmem:[#allocation6 + $0x68] ss:$16 sps:$4 sm:$0xff]  }
 0x725   :  { %6218 = vmatprep.mubr.bf16.mxu0 %v11211_v43  ;;  %6259 = vmatprep.mubr.bf16.mxu1 %v11211_v43  ;;  %11469 = vst [vmem:[#allocation27_spill] sm:$0xff] %v10681_v18 }
 0x726   :  { %6187 = vmatpush1.bf16.msra.mxu0 %v10631_v11  ;;  %6228 = vmatpush1.bf16.msra.mxu1 %v10633_v12 }
 0x727   :  { %6188 = vmatprep.subr.bf16.mxu0 %v10639_v29  ;;  %6229 = vmatprep.subr.bf16.mxu1 %v10641_v13 }
 0x72a   :  { %6189 = vmatpush1.bf16.msra.mxu0 %v10643_v40  ;;  %6230 = vmatpush1.bf16.msra.mxu1 %v10645_v38 }
 0x72b   :  { %6190 = vmatprep.subr.bf16.mxu0 %v10651_v37  ;;  %6231 = vmatprep.subr.bf16.mxu1 %v10653_v55 }
 0x72e   :  { %6191 = vmatpush1.bf16.msra.mxu0 %v10655_v19  ;;  %6232 = vmatpush1.bf16.msra.mxu1 %v10657_v23 }
 0x72f   :  { %6192 = vmatprep.subr.bf16.mxu0 %v10663_v42  ;;  %6233 = vmatprep.subr.bf16.mxu1 %v10665_v44  ;;  %v10687_v44 = vld [vmem:[#allocation6 + $0x44] ss:$16 sps:$4 sm:$0xff]   ;;  %v10693_v42 = vld [vmem:[#allocation6 + $0x48] ss:$16 sps:$4 sm:$0xff]  }
 0x730   :  { %11470 = vst [vmem:[#allocation28_spill] sm:$0xff] %v10687_v44  ;;  %11473 = vst [vmem:[#allocation31_spill] sm:$0xff] %v10693_v42 }
 0x732   :  { %6193 = vmatpush1.bf16.msra.mxu0 %v10667_v45  ;;  %6234 = vmatpush1.bf16.msra.mxu1 %v10669_v48  ;;  %v10689_v45 = vld [vmem:[#allocation6 + $0x4c] ss:$16 sps:$4 sm:$0xff]   ;;  %v10691_v48 = vld [vmem:[#allocation6 + $0x40] ss:$16 sps:$4 sm:$0xff]  }
 0x733   :  { %6194 = vmatprep.subr.bf16.mxu0 %v10675_v41  ;;  %6235 = vmatprep.subr.bf16.mxu1 %v10677_v35  ;;  %11471 = vst [vmem:[#allocation29_spill] sm:$0xff] %v10689_v45  ;;  %11472 = vst [vmem:[#allocation30_spill] sm:$0xff] %v10691_v48  ;;  %v10699_v35 = vld [vmem:[#allocation6 + $0x24] ss:$16 sps:$4 sm:$0xff]   ;;  %v10705_v41 = vld [vmem:[#allocation6 + $0x28] ss:$16 sps:$4 sm:$0xff]  }
 0x734   :  { %11474 = vst [vmem:[#allocation32_spill] sm:$0xff] %v10699_v35  ;;  %11477 = vst [vmem:[#allocation35_spill] sm:$0xff] %v10705_v41 }
 0x736   :  { %6195 = vmatpush1.bf16.msra.mxu0 %v10679_v32  ;;  %6236 = vmatpush1.bf16.msra.mxu1 %v10681_v18  ;;  %v10701_v32 = vld [vmem:[#allocation6 + $0x2c] ss:$16 sps:$4 sm:$0xff]   ;;  %v10703_v18 = vld [vmem:[#allocation6 + $0x20] ss:$16 sps:$4 sm:$0xff]  }
 0x737   :  { %6196 = vmatprep.subr.bf16.mxu0 %v10687_v44  ;;  %6237 = vmatprep.subr.bf16.mxu1 %v10689_v45  ;;  %11475 = vst [vmem:[#allocation33_spill] sm:$0xff] %v10701_v32  ;;  %11476 = vst [vmem:[#allocation34_spill] sm:$0xff] %v10703_v18  ;;  %v10711_v45 = vld [vmem:[#allocation6 + $0x4] ss:$16 sps:$4 sm:$0xff]   ;;  %v10717_v44 = vld [vmem:[#allocation6 + $0x8] ss:$16 sps:$4 sm:$0xff]  }
 0x738   :  { %11478 = vst [vmem:[#allocation40_spill] sm:$0xff] %v10711_v45  ;;  %11481 = vst [vmem:[#allocation43_spill] sm:$0xff] %v10717_v44 }
 0x73a   :  { %6197 = vmatpush1.bf16.msra.mxu0 %v10691_v48  ;;  %6238 = vmatpush1.bf16.msra.mxu1 %v10693_v42  ;;  %v10713_v48 = vld [vmem:[#allocation6 + $0xc] ss:$16 sps:$4 sm:$0xff]   ;;  %v10715_v42 = vld [vmem:[#allocation6] ss:$16 sps:$4 sm:$0xff]  }
 0x73b   :  { %6198 = vmatprep.subr.bf16.mxu0 %v10699_v35  ;;  %6239 = vmatprep.subr.bf16.mxu1 %v10701_v32  ;;  %11479 = vst [vmem:[#allocation41_spill] sm:$0xff] %v10713_v48  ;;  %11480 = vst [vmem:[#allocation42_spill] sm:$0xff] %v10715_v42  ;;  %v10723_v32 = vld [vmem:[#allocation4 + $0xe4] ss:$16 sps:$4 sm:$0xff]  }
 0x73c   :  { %11482 = vst [vmem:[#allocation44_spill] sm:$0xff] %v10723_v32 }
 0x73e   :  { %6199 = vmatpush1.bf16.msra.mxu0 %v10703_v18  ;;  %6240 = vmatpush1.bf16.msra.mxu1 %v10705_v41  ;;  %v10725_v18 = vld [vmem:[#allocation4 + $0xec] ss:$16 sps:$4 sm:$0xff]  }
 0x73f   :  { %6200 = vmatprep.subr.bf16.mxu0 %v10711_v45  ;;  %6241 = vmatprep.subr.bf16.mxu1 %v10713_v48  ;;  %11483 = vst [vmem:[#allocation45_spill] sm:$0xff] %v10725_v18 }
 0x742   :  { %6201 = vmatpush1.bf16.msra.mxu0 %v10715_v42  ;;  %6242 = vmatpush1.bf16.msra.mxu1 %v10717_v44 }
 0x743   :  { %6431 = vmatprep.subr.bf16.mxu0 %v10723_v32  ;;  %6472 = vmatprep.subr.bf16.mxu1 %v10725_v18 }
 0x7a0   :  { %v5320_v41 = vpop.f32.mrf.mxu0  ;;  %v5361_v35 = vpop.f32.mrf.mxu1 }
 0x7a2   :  { %v5322_v23 = vpop.f32.mrf.mxu0  ;;  %v5363_v19 = vpop.f32.mrf.mxu1 }
 0x7a4   :  { %v5324_v55 = vpop.f32.mrf.mxu0  ;;  %v5365_v45 = vpop.f32.mrf.mxu1 }
 0x7a6   :  { %v5325_v37 = vpop.f32.mrf.mxu0  ;;  %v5366_v48 = vpop.f32.mrf.mxu1 }
 0x7c4   :  { %v5565_v38 = vpop.f32.mrf.mxu0  ;;  %v5606_v42 = vpop.f32.mrf.mxu1 }
 0x7c5   :  { %v5566_v40 = vadd.f32 %v5565_v38, %v5320_v41  ;;  %v5607_v5 = vadd.f32 %v5606_v42, %v5361_v35 }
 0x7c6   :  { %v5567_v44 = vpop.f32.mrf.mxu0  ;;  %v5608_v13 = vpop.f32.mrf.mxu1 }
 0x7c7   :  { %v5613_v29 = vadd.f32 %v5566_v40, %v9547_v52  ;;  %v5568_v6 = vadd.f32 %v5567_v44, %v5322_v23  ;;  %v5609_v48 = vadd.f32 %v5608_v13, %v5363_v19 }
 0x7c8   :  { %v5569_v12 = vpop.f32.mrf.mxu0  ;;  %v5610_v11 = vpop.f32.mrf.mxu1 }
 0x7c9   :  { %v8067_v32 = vmul.f32 -1.442695, %v5613_v29  ;;  %v5614_v2 = vadd.f32 %v5568_v6, %v9552_v3 }
 0x7ca   :  { %v5570_v7 = vpop.f32.mrf.mxu0  ;;  %v5611_v18 = vpop.f32.mrf.mxu1 }
 0x7cb   :  { %8984 = vpow2.f32 %v8067_v32  ;;  %v8068_v55 = vmul.f32 -1.442695, %v5614_v2  ;;  %v5616_v7 = vadd.f32 %v5609_v48, %v9558_v10  ;;  %v5615_v2 = vadd.f32 %v5607_v5, %v9562_v15 }
 0x7cd   :  { %8986 = vpow2.f32 %v8068_v55 }
 0x7d8   :  { %v8985_v45 = vpop.eup %8984 }
 0x7d9   :  { %v5623_v37 = vadd.f32 1.0, %v8985_v45 }
 0x7da   :  { %v8987_v11 = vpop.eup %8986 }
 0x7db   :  { %8988 = vrcp.f32 %v5623_v37  ;;  %v5624_v19 = vadd.f32 1.0, %v8987_v11 }
 0x7e4   :  { %v5871_v38 = vpop.f32.mrf.mxu0  ;;  %v5912_v41 = vpop.f32.mrf.mxu1 }
 0x7e5   :  { %v5923_v27 = vrot.slane %v5871_v38, 4 }
 0x7e6   :  { %v5873_v40 = vpop.f32.mrf.mxu0  ;;  %v5914_v12 = vpop.f32.mrf.mxu1 }
 0x7e7   :  { %v5931_v29 = vadd.f32 %v5923_v27, %v11376_v33  ;;  %v5924_v42 = vrot.slane %v5873_v40, 4  ;;  %v10742_v40 = vld [vmem:[#allocation4 + $0xe0] ss:$16 sps:$4 sm:$0xff]  }
 0x7e8   :  { %v8989_v23 = vpop.eup %8988  ;;  %v5875_v44 = vpop.f32.mrf.mxu0 }
 0x7e9   :  { %v5916_v6 = vpop.f32.mrf.mxu1  ;;  %v5629_v32 = vmul.f32 %v8989_v23, %v5616_v7  ;;  %v8102_v18 = vmul.f32 -1.442695, %v5931_v29  ;;  %v5932_v35 = vadd.f32 %v5924_v42, %v11377_v49  ;;  %v10744_v23 = vld [vmem:[#allocation4 + $0xe8] ss:$16 sps:$4 sm:$0xff]  }
 0x7ea   :  { %v5876_v55 = vpop.f32.mrf.mxu0  ;;  %v5926_v6 = vrot.slane %v5914_v12, 4 }
 0x7eb   :  { %v5917_v13 = vpop.f32.mrf.mxu1  ;;  %v5630_v45 = vadd.f32 %v5629_v32, %v5615_v2  ;;  %8990 = vpow2.f32 %v8102_v18  ;;  %v8103_v38 = vmul.f32 -1.442695, %v5932_v35  ;;  %v10750_v32 = vld [vmem:[#allocation4 + $0xcc] ss:$16 sps:$4 sm:$0xff]   ;;  %v5925_v18 = vrot.slane %v5912_v41, 4 }
 0x7ec   :  { %v10756_v55 = vld [vmem:[#allocation4 + $0xc8] ss:$16 sps:$4 sm:$0xff]   ;;  %v5934_v12 = vadd.f32 %v5926_v6, %v11378_v51  ;;  %v10761_v13 = vld [vmem:[#allocation4 + $0xa4] ss:$16 sps:$4 sm:$0xff]   ;;  %v10770_v35 = vld [vmem:[#allocation4 + $0xa0] ss:$16 sps:$4 sm:$0xff]  }
 0x7ed   :  { %8992 = vtanh.f32 %v5630_v45  ;;  %v5933_v45 = vadd.f32 %v5925_v18, %v11379_v31  ;;  %v10788_v6 = vld [vmem:[#allocation4 + $0x64] ss:$16 sps:$4 sm:$0xff]   ;;  %v10794_v18 = vld [vmem:[#allocation4 + $0x60] ss:$16 sps:$4 sm:$0xff]  }
 0x7ee   :  { %8994 = vrcp.f32 %v5624_v19  ;;  %v10763_v19 = vld [vmem:[#allocation4 + $0xac] ss:$16 sps:$4 sm:$0xff]   ;;  %11486 = vst [vmem:[#allocation48_spill] sm:$0xff] %v10788_v6  ;;  %11488 = vst [vmem:[#allocation50_spill] sm:$0xff] %v10794_v18 }
 0x7f8   :  { %v8991_v37 = vpop.eup %8990 }
 0x7f9   :  { %v5941_v48 = vadd.f32 1.0, %v8991_v37  ;;  %v10772_v37 = vld [vmem:[#allocation4 + $0xa8] ss:$16 sps:$4 sm:$0xff]  }
 0x7fa   :  { %v8993_v27 = vpop.eup %8992 }
 0x7fb   :  { %8996 = vrcp.f32 %v5941_v48  ;;  %v5632_v44 = vsub.f32 %v10478_v61, %v8993_v27  ;;  %v8995_v5 = vpop.eup %8994  ;;  %v10748_v61 = vld [vmem:[#allocation4 + $0xc4] ss:$16 sps:$4 sm:$0xff]  }
 0x7fc   :  { %8998 = vpow2.f32 %v8103_v38  ;;  %v10778_v38 = vld [vmem:[#allocation4 + $0x8c] ss:$16 sps:$4 sm:$0xff]  }
 0x7fd   :  { %v5633_v7 = vmul.f32 %v8995_v5, %v5632_v44  ;;  %v10782_v5 = vld [vmem:[#allocation4 + $0x80] ss:$16 sps:$4 sm:$0xff]  }
 0x7fe   :  { %11484 = vst [vmem:[#allocation46_spill] sm:$0xff] %v10782_v5 }
 0x7ff   :  { %v5634_v29 = vadd.f32 %v8993_v27, %v5633_v7  ;;  %v10776_v27 = vld [vmem:[#allocation4 + $0x84] ss:$16 sps:$4 sm:$0xff]   ;;  %v10784_v7 = vld [vmem:[#allocation4 + $0x88] ss:$16 sps:$4 sm:$0xff]  }
 0x800   :  { %11485 = vst [vmem:[#allocation47_spill] sm:$0xff] %v10784_v7 }
 0x801   :  { %8069 = vst [vmem:[%s10991_s8 + $0xa] sm:$0x3] %v5634_v29  ;;  %v10740_v11 = vmul.f32 %v5634_v29, %v10584_v57  ;;  %v10754_v57 = vld [vmem:[#allocation4 + $0xc0] ss:$16 sps:$4 sm:$0xff]  }
 0x803   :  { %v5993_v2 = vpack.c.bf16 %v10740_v11, %v10740_v11 }
 0x805   :  { %6219 = vmatmul.mubr.bf16.vlgmr.msra.gmra.mxu0 %v5993_v2  ;;  %6260 = vmatmul.mubr.bf16.vlgmr.msra.gmra.mxu1 %v5993_v2  ;;  %v10790_v2 = vld [vmem:[#allocation4 + $0x6c] ss:$16 sps:$4 sm:$0xff]  }
 0x806   :  { %6432 = vmatpush1.bf16.msra.mxu0 %v10742_v40  ;;  %6473 = vmatpush1.bf16.msra.mxu1 %v10744_v23  ;;  %11487 = vst [vmem:[#allocation49_spill] sm:$0xff] %v10790_v2 }
 0x807   :  { %6433 = vmatprep.subr.bf16.mxu0 %v10748_v61  ;;  %6474 = vmatprep.subr.bf16.mxu1 %v10750_v32 }
 0x808   :  { %v8997_v41 = vpop.eup %8996  ;;  %6463 = vmatprep.mubr.bf16.mxu0 %v11211_v43  ;;  %6504 = vmatprep.mubr.bf16.mxu1 %v11211_v43 }
 0x809   :  { %v5947_v42 = vmul.f32 %v8997_v41, %v5934_v12  ;;  %v8999_v44 = vpop.eup %8998  ;;  %v10796_v12 = vld [vmem:[#allocation4 + $0x68] ss:$16 sps:$4 sm:$0xff]   ;;  %v10800_v41 = vld [vmem:[#allocation4 + $0x44] ss:$16 sps:$4 sm:$0xff]  }
 0x80a   :  { %6434 = vmatpush1.bf16.msra.mxu0 %v10754_v57  ;;  %6475 = vmatpush1.bf16.msra.mxu1 %v10756_v55  ;;  %v5942_v29 = vadd.f32 1.0, %v8999_v44  ;;  %11489 = vst [vmem:[#allocation51_spill] sm:$0xff] %v10796_v12  ;;  %11490 = vst [vmem:[#allocation52_spill] sm:$0xff] %v10800_v41  ;;  %v10812_v44 = vld [vmem:[#allocation4 + $0x24] ss:$16 sps:$4 sm:$0xff]  }
 0x80b   :  { %v5948_v48 = vadd.f32 %v5947_v42, %v5933_v45  ;;  %6435 = vmatprep.subr.bf16.mxu0 %v10761_v13  ;;  %6476 = vmatprep.subr.bf16.mxu1 %v10763_v19  ;;  %v10802_v45 = vld [vmem:[#allocation4 + $0x4c] ss:$16 sps:$4 sm:$0xff]   ;;  %v10806_v42 = vld [vmem:[#allocation4 + $0x40] ss:$16 sps:$4 sm:$0xff]   ;;  %11494 = vst [vmem:[#allocation56_spill] sm:$0xff] %v10812_v44 }
 0x80c   :  { %11491 = vst [vmem:[#allocation53_spill] sm:$0xff] %v10802_v45  ;;  %11492 = vst [vmem:[#allocation54_spill] sm:$0xff] %v10806_v42 }
 0x80d   :  { %9000 = vtanh.f32 %v5948_v48  ;;  %v10808_v48 = vld [vmem:[#allocation4 + $0x48] ss:$16 sps:$4 sm:$0xff]  }
 0x80e   :  { %6436 = vmatpush1.bf16.msra.mxu0 %v10770_v35  ;;  %6477 = vmatpush1.bf16.msra.mxu1 %v10772_v37  ;;  %9002 = vrcp.f32 %v5942_v29  ;;  %11493 = vst [vmem:[#allocation55_spill] sm:$0xff] %v10808_v48  ;;  %v10814_v29 = vld [vmem:[#allocation4 + $0x2c] ss:$16 sps:$4 sm:$0xff]  }
 0x80f   :  { %6437 = vmatprep.subr.bf16.mxu0 %v10776_v27  ;;  %6478 = vmatprep.subr.bf16.mxu1 %v10778_v38  ;;  %11495 = vst [vmem:[#allocation57_spill] sm:$0xff] %v10814_v29 }
 0x812   :  { %6438 = vmatpush1.bf16.msra.mxu0 %v10782_v5  ;;  %6479 = vmatpush1.bf16.msra.mxu1 %v10784_v7 }
 0x813   :  { %6439 = vmatprep.subr.bf16.mxu0 %v10788_v6  ;;  %6480 = vmatprep.subr.bf16.mxu1 %v10790_v2 }
 0x816   :  { %6440 = vmatpush1.bf16.msra.mxu0 %v10794_v18  ;;  %6481 = vmatpush1.bf16.msra.mxu1 %v10796_v12  ;;  %v10818_v18 = vld [vmem:[#allocation4 + $0x20] ss:$16 sps:$4 sm:$0xff]   ;;  %v10820_v12 = vld [vmem:[#allocation4 + $0x28] ss:$16 sps:$4 sm:$0xff]  }
 0x817   :  { %6441 = vmatprep.subr.bf16.mxu0 %v10800_v41  ;;  %6482 = vmatprep.subr.bf16.mxu1 %v10802_v45  ;;  %11496 = vst [vmem:[#allocation58_spill] sm:$0xff] %v10820_v12  ;;  %v10824_v41 = vld [vmem:[#allocation4 + $0x4] ss:$16 sps:$4 sm:$0xff]   ;;  %v10826_v45 = vld [vmem:[#allocation4 + $0xc] ss:$16 sps:$4 sm:$0xff]  }
 0x81a   :  { %v9001_v2 = vpop.eup %9000  ;;  %6442 = vmatpush1.bf16.msra.mxu0 %v10806_v42  ;;  %6483 = vmatpush1.bf16.msra.mxu1 %v10808_v48  ;;  %v10831_v48 = vld [vmem:[#allocation4] ss:$16 sps:$4 sm:$0xff]   ;;  %v10833_v42 = vld [vmem:[#allocation4 + $0x8] ss:$16 sps:$4 sm:$0xff]  }
 0x81b   :  { %6443 = vmatprep.subr.bf16.mxu0 %v10812_v44  ;;  %6484 = vmatprep.subr.bf16.mxu1 %v10814_v29  ;;  %v5951_v6 = vrot.slane %v9001_v2, 2  ;;  %v9003_v44 = vpop.eup %9002 }
 0x81d   :  { %v5953_v7 = vsub.f32 %v10611_v22, %v5951_v6 }
 0x81e   :  { %6444 = vmatpush1.bf16.msra.mxu0 %v10818_v18  ;;  %6485 = vmatpush1.bf16.msra.mxu1 %v10820_v12 }
 0x81f   :  { %6445 = vmatprep.subr.bf16.mxu0 %v10824_v41  ;;  %6486 = vmatprep.subr.bf16.mxu1 %v10826_v45  ;;  %v5955_v29 = vrot.slane %v5953_v7, 6  ;;  %v11522_v7 = vld [vmem:[#allocation30_spill] sm:$0xff] }
 0x821   :  { %v5957_v5 = vmul.f32 %v9003_v44, %v5955_v29  ;;  %v11525_v44 = vld [vmem:[#allocation33_spill] sm:$0xff]  ;;  %v11526_v29 = vld [vmem:[#allocation34_spill] sm:$0xff] }
 0x822   :  { %6446 = vmatpush1.bf16.msra.mxu0 %v10831_v48  ;;  %6487 = vmatpush1.bf16.msra.mxu1 %v10833_v42 }
 0x823   :  { %6737 = vmatprep.subr.bf16.mxu0 %v10515_v50  ;;  %6778 = vmatprep.subr.bf16.mxu1 %v10517_v26  ;;  %v5958_v22 = vadd.f32 %v9001_v2, %v5957_v5  ;;  %v10862_v50 = vld [vmem:[%s10984_s1 + $0xe] sm:$0x3]  ;;  %v11521_v5 = vld [vmem:[#allocation29_spill] sm:$0xff]  ;;  %v11523_v2 = vld [vmem:[#allocation31_spill] sm:$0xff] }
 0x824   :  { %v6538_v26 = vrot.slane %v10862_v50, 4 }
 0x825   :  { %v5960_v6 = vpack.c.bf16 %v5958_v22, %v5958_v22 }
 0x827   :  { %v6269_v12 = vrot.slane %v5960_v6, 2  ;;  %v11528_v6 = vld [vmem:[#allocation40_spill] sm:$0xff] }
 0x829   :  { %6464 = vmatmul.mubr.bf16.vlgmr.msra.gmra.mxu0 %v6269_v12  ;;  %6505 = vmatmul.mubr.bf16.vlgmr.msra.gmra.mxu1 %v6269_v12  ;;  %v11524_v12 = vld [vmem:[#allocation32_spill] sm:$0xff] }
 0x82a   :  { %6738 = vmatpush1.bf16.msra.mxu0 %v10523_v30  ;;  %6779 = vmatpush1.bf16.msra.mxu1 %v10525_v4  ;;  %v10873_v30 = vmul.f32 %v6538_v26, %v5958_v22  ;;  %v11497_v4 = vld [vmem:[#allocation36_spill] sm:$0xff]  ;;  %v11527_v22 = vld [vmem:[#allocation35_spill] sm:$0xff]  ;;  %v11529_v26 = vld [vmem:[#allocation41_spill] sm:$0xff] }
 0x82b   :  { %6739 = vmatprep.subr.bf16.mxu0 %v10527_v17  ;;  %6780 = vmatprep.subr.bf16.mxu1 %v10529_v9  ;;  %v11498_v9 = vld [vmem:[#allocation38_spill] sm:$0xff] }
 0x82c   :  { %6769 = vmatprep.mubr.bf16.mxu0 %v11211_v43  ;;  %6810 = vmatprep.mubr.bf16.mxu1 %v11211_v43  ;;  %v6541_v17 = vpack.c.bf16 %v10873_v30, %v10873_v30 }
 0x82e   :  { %6740 = vmatpush1.bf16.msra.mxu0 %v10533_v25  ;;  %6781 = vmatpush1.bf16.msra.mxu1 %v10535_v34  ;;  %v11499_v25 = vld [vmem:[#allocation39_spill] sm:$0xff]  ;;  %v6575_v34 = vrot.slane %v6541_v17, 2 }
 0x82f   :  { %6741 = vmatprep.subr.bf16.mxu0 %v10539_v46  ;;  %6782 = vmatprep.subr.bf16.mxu1 %v10541_v36  ;;  %v11500_v46 = vld [vmem:[#allocation37_spill] sm:$0xff]  ;;  %v11531_v17 = vld [vmem:[#allocation43_spill] sm:$0xff] }
 0x830   :  { %v11501_v36 = vld [vmem:[#allocation9_spill] sm:$0xff] }
 0x832   :  { %6742 = vmatpush1.bf16.msra.mxu0 %v10547_v53  ;;  %6783 = vmatpush1.bf16.msra.mxu1 %v10549_v56  ;;  %v11502_v53 = vld [vmem:[#allocation10_spill] sm:$0xff]  ;;  %v11503_v56 = vld [vmem:[#allocation11_spill] sm:$0xff] }
 0x833   :  { %6743 = vmatprep.subr.bf16.mxu0 %v10553_v24  ;;  %6784 = vmatprep.subr.bf16.mxu1 %v10555_v54  ;;  %v11504_v24 = vld [vmem:[#allocation12_spill] sm:$0xff]  ;;  %v11505_v54 = vld [vmem:[#allocation13_spill] sm:$0xff] }
 0x836   :  { %6744 = vmatpush1.bf16.msra.mxu0 %v10559_v58  ;;  %6785 = vmatpush1.bf16.msra.mxu1 %v10561_v59  ;;  %v11506_v58 = vld [vmem:[#allocation14_spill] sm:$0xff]  ;;  %v11507_v59 = vld [vmem:[#allocation15_spill] sm:$0xff] }
 0x837   :  { %6745 = vmatprep.subr.bf16.mxu0 %v10565_v60  ;;  %6786 = vmatprep.subr.bf16.mxu1 %v10567_v0  ;;  %v11508_v60 = vld [vmem:[#allocation16_spill] sm:$0xff]  ;;  %v11509_v0 = vld [vmem:[#allocation17_spill] sm:$0xff] }
 0x83a   :  { %6746 = vmatpush1.bf16.msra.mxu0 %v10571_v47  ;;  %6787 = vmatpush1.bf16.msra.mxu1 %v10573_v62  ;;  %v11510_v47 = vld [vmem:[#allocation18_spill] sm:$0xff]  ;;  %v11511_v62 = vld [vmem:[#allocation19_spill] sm:$0xff] }
 0x83b   :  { %6747 = vmatprep.subr.bf16.mxu0 %v10577_v20  ;;  %6788 = vmatprep.subr.bf16.mxu1 %v10579_v14  ;;  %v11512_v20 = vld [vmem:[#allocation20_spill] sm:$0xff]  ;;  %v11513_v14 = vld [vmem:[#allocation21_spill] sm:$0xff] }
 0x83e   :  { %6748 = vmatpush1.bf16.msra.mxu0 %v10588_v16  ;;  %6789 = vmatpush1.bf16.msra.mxu1 %v10590_v63  ;;  %v11514_v16 = vld [vmem:[#allocation22_spill] sm:$0xff]  ;;  %v11515_v63 = vld [vmem:[#allocation23_spill] sm:$0xff] }
 0x83f   :  { %6749 = vmatprep.subr.bf16.mxu0 %v10594_v39  ;;  %6790 = vmatprep.subr.bf16.mxu1 %v10596_v28  ;;  %v11516_v39 = vld [vmem:[#allocation24_spill] sm:$0xff]  ;;  %v11517_v28 = vld [vmem:[#allocation25_spill] sm:$0xff] }
 0x842   :  { %6750 = vmatpush1.bf16.msra.mxu0 %v10601_v8  ;;  %6791 = vmatpush1.bf16.msra.mxu1 %v10603_v21  ;;  %v11518_v8 = vld [vmem:[#allocation26_spill] sm:$0xff]  ;;  %v11519_v21 = vld [vmem:[#allocation27_spill] sm:$0xff] }
 0x843   :  { %6751 = vmatprep.subr.bf16.mxu0 %v10607_v1  ;;  %6792 = vmatprep.subr.bf16.mxu1 %v11497_v4  ;;  %v11520_v1 = vld [vmem:[#allocation28_spill] sm:$0xff]  ;;  %v11530_v4 = vld [vmem:[#allocation42_spill] sm:$0xff] }
 0x846   :  { %6752 = vmatpush1.bf16.msra.mxu0 %v11498_v9  ;;  %6793 = vmatpush1.bf16.msra.mxu1 %v11499_v25  ;;  %v11532_v9 = vld [vmem:[#allocation44_spill] sm:$0xff]  ;;  %v11533_v25 = vld [vmem:[#allocation45_spill] sm:$0xff] }
 0x847   :  { %7086 = vmatprep.subr.bf16.mxu0 %v11500_v46  ;;  %7127 = vmatprep.subr.bf16.mxu1 %v11501_v36 }
 0x849   :  { %6770 = vmatmul.mubr.bf16.vlgmr.msra.gmra.mxu0 %v6575_v34  ;;  %6811 = vmatmul.mubr.bf16.vlgmr.msra.gmra.mxu1 %v6575_v34 }
 0x84a   :  { %7087 = vmatpush1.bf16.msra.mxu0 %v11502_v53  ;;  %7128 = vmatpush1.bf16.msra.mxu1 %v11503_v56 }
 0x84b   :  { %7088 = vmatprep.subr.bf16.mxu0 %v11504_v24  ;;  %7129 = vmatprep.subr.bf16.mxu1 %v11505_v54 }
 0x84c   :  { %7118 = vmatprep.mubr.bf16.mxu0 %v11211_v43  ;;  %7159 = vmatprep.mubr.bf16.mxu1 %v11211_v43 }
 0x84e   :  { %7089 = vmatpush1.bf16.msra.mxu0 %v11506_v58  ;;  %7130 = vmatpush1.bf16.msra.mxu1 %v11507_v59 }
 0x84f   :  { %7090 = vmatprep.subr.bf16.mxu0 %v11508_v60  ;;  %7131 = vmatprep.subr.bf16.mxu1 %v11509_v0 }
 0x852   :  { %7091 = vmatpush1.bf16.msra.mxu0 %v11510_v47  ;;  %7132 = vmatpush1.bf16.msra.mxu1 %v11511_v62 }
 0x853   :  { %7092 = vmatprep.subr.bf16.mxu0 %v11512_v20  ;;  %7133 = vmatprep.subr.bf16.mxu1 %v11513_v14 }
 0x856   :  { %7093 = vmatpush1.bf16.msra.mxu0 %v11514_v16  ;;  %7134 = vmatpush1.bf16.msra.mxu1 %v11515_v63 }
 0x857   :  { %7094 = vmatprep.subr.bf16.mxu0 %v11516_v39  ;;  %7135 = vmatprep.subr.bf16.mxu1 %v11517_v28 }
 0x85a   :  { %7095 = vmatpush1.bf16.msra.mxu0 %v11518_v8  ;;  %7136 = vmatpush1.bf16.msra.mxu1 %v11519_v21 }
 0x85b   :  { %7096 = vmatprep.subr.bf16.mxu0 %v11520_v1  ;;  %7137 = vmatprep.subr.bf16.mxu1 %v11521_v5 }
 0x85e   :  { %7097 = vmatpush1.bf16.msra.mxu0 %v11522_v7  ;;  %7138 = vmatpush1.bf16.msra.mxu1 %v11523_v2 }
 0x85f   :  { %7098 = vmatprep.subr.bf16.mxu0 %v11524_v12  ;;  %7139 = vmatprep.subr.bf16.mxu1 %v11525_v44 }
 0x862   :  { %7099 = vmatpush1.bf16.msra.mxu0 %v11526_v29  ;;  %7140 = vmatpush1.bf16.msra.mxu1 %v11527_v22 }
 0x863   :  { %7100 = vmatprep.subr.bf16.mxu0 %v11528_v6  ;;  %7141 = vmatprep.subr.bf16.mxu1 %v11529_v26 }
 0x866   :  { %7101 = vmatpush1.bf16.msra.mxu0 %v11530_v4  ;;  %7142 = vmatpush1.bf16.msra.mxu1 %v11531_v17 }
 0x867   :  { %7331 = vmatprep.subr.bf16.mxu0 %v11532_v9  ;;  %7372 = vmatprep.subr.bf16.mxu1 %v11533_v25 }
 0x8c5   :  { %v6220_v34 = vpop.f32.mrf.mxu0  ;;  %v6261_v46 = vpop.f32.mrf.mxu1 }
 0x8c7   :  { %v6222_v36 = vpop.f32.mrf.mxu0  ;;  %v6263_v53 = vpop.f32.mrf.mxu1 }
 0x8c9   :  { %v6224_v56 = vpop.f32.mrf.mxu0  ;;  %v6265_v24 = vpop.f32.mrf.mxu1 }
 0x8cb   :  { %v6225_v54 = vpop.f32.mrf.mxu0  ;;  %v6266_v58 = vpop.f32.mrf.mxu1 }
 0x8e9   :  { %v6465_v59 = vpop.f32.mrf.mxu0  ;;  %v6506_v60 = vpop.f32.mrf.mxu1 }
 0x8ea   :  { %v6466_v0 = vadd.f32 %v6465_v59, %v6220_v34  ;;  %v6507_v29 = vadd.f32 %v6506_v60, %v6261_v46 }
 0x8eb   :  { %v6467_v47 = vpop.f32.mrf.mxu0  ;;  %v6508_v62 = vpop.f32.mrf.mxu1 }
 0x8ec   :  { %v6513_v20 = vadd.f32 %v6466_v0, %v9547_v52  ;;  %v6468_v8 = vadd.f32 %v6467_v47, %v6222_v36  ;;  %v6509_v2 = vadd.f32 %v6508_v62, %v6263_v53  ;;  %v6515_v56 = vadd.f32 %v6507_v29, %v9562_v15 }
 0x8ed   :  { %v6469_v14 = vpop.f32.mrf.mxu0  ;;  %v6510_v16 = vpop.f32.mrf.mxu1 }
 0x8ee   :  { %v8168_v63 = vmul.f32 -1.442695, %v6513_v20  ;;  %v6514_v21 = vadd.f32 %v6468_v8, %v9552_v3  ;;  %v6516_v17 = vadd.f32 %v6509_v2, %v9558_v10 }
 0x8ef   :  { %v6470_v39 = vpop.f32.mrf.mxu0  ;;  %v6511_v28 = vpop.f32.mrf.mxu1 }
 0x8f0   :  { %9004 = vpow2.f32 %v8168_v63  ;;  %v8169_v1 = vmul.f32 -1.442695, %v6514_v21 }
 0x8f2   :  { %9006 = vpow2.f32 %v8169_v1 }
 0x8fd   :  { %v9005_v5 = vpop.eup %9004 }
 0x8fe   :  { %v6523_v7 = vadd.f32 1.0, %v9005_v5 }
 0x8ff   :  { %v9007_v4 = vpop.eup %9006 }
 0x900   :  { %9008 = vrcp.f32 %v6523_v7  ;;  %v6524_v59 = vadd.f32 1.0, %v9007_v4  ;;  %v11545_v7 = vld [vmem:[#allocation57_spill] sm:$0xff] }
 0x909   :  { %v6771_v12 = vpop.f32.mrf.mxu0  ;;  %v6812_v44 = vpop.f32.mrf.mxu1 }
 0x90a   :  { %v6823_v22 = vrot.slane %v6771_v12, 2  ;;  %v6825_v21 = vrot.slane %v6812_v44, 2  ;;  %v11546_v44 = vld [vmem:[#allocation58_spill] sm:$0xff] }
 0x90b   :  { %v6773_v6 = vpop.f32.mrf.mxu0  ;;  %v6814_v26 = vpop.f32.mrf.mxu1 }
 0x90c   :  { %v6831_v9 = vadd.f32 %v6823_v22, %v11376_v33  ;;  %v6824_v46 = vrot.slane %v6773_v6, 2  ;;  %v6826_v8 = vrot.slane %v6814_v26, 2 }
 0x90d   :  { %v9009_v25 = vpop.eup %9008  ;;  %v6775_v34 = vpop.f32.mrf.mxu0 }
 0x90e   :  { %v6816_v36 = vpop.f32.mrf.mxu1  ;;  %v6529_v24 = vmul.f32 %v9009_v25, %v6516_v17  ;;  %v8203_v54 = vmul.f32 -1.442695, %v6831_v9  ;;  %v6832_v60 = vadd.f32 %v6824_v46, %v11377_v49 }
 0x90f   :  { %v6776_v58 = vpop.f32.mrf.mxu0 }
 0x910   :  { %v6817_v53 = vpop.f32.mrf.mxu1  ;;  %v6530_v0 = vadd.f32 %v6529_v24, %v6515_v56  ;;  %9010 = vpow2.f32 %v8203_v54  ;;  %v8204_v20 = vmul.f32 -1.442695, %v6832_v60 }
 0x912   :  { %9012 = vtanh.f32 %v6530_v0 }
 0x913   :  { %9014 = vrcp.f32 %v6524_v59 }
 0x91d   :  { %v9011_v47 = vpop.eup %9010 }
 0x91e   :  { %v6841_v62 = vadd.f32 1.0, %v9011_v47 }
 0x91f   :  { %v9013_v33 = vpop.eup %9012 }
 0x920   :  { %9016 = vrcp.f32 %v6841_v62  ;;  %v6532_v14 = vsub.f32 %v10740_v11, %v9013_v33  ;;  %v9015_v16 = vpop.eup %9014  ;;  %v6834_v11 = vadd.f32 %v6826_v8, %v11378_v51 }
 0x921   :  { %9018 = vpow2.f32 %v8204_v20 }
 0x922   :  { %v6533_v63 = vmul.f32 %v9015_v16, %v6532_v14 }
 0x924   :  { %v6534_v39 = vadd.f32 %v9013_v33, %v6533_v63 }
 0x926   :  { %8170 = vst [vmem:[%s10991_s8 + $0xc] sm:$0x3] %v6534_v39  ;;  %v10930_v28 = vmul.f32 %v6534_v39, %v10862_v50  ;;  %v6833_v50 = vadd.f32 %v6825_v21, %v11379_v31  ;;  %v11535_v31 = vld [vmem:[#allocation47_spill] sm:$0xff] }
 0x928   :  { %v6893_v49 = vpack.c.bf16 %v10930_v28, %v10930_v28 }
 0x92a   :  { %7119 = vmatmul.mubr.bf16.vlgmr.msra.gmra.mxu0 %v6893_v49  ;;  %7160 = vmatmul.mubr.bf16.vlgmr.msra.gmra.mxu1 %v6893_v49 }
 0x92b   :  { %7332 = vmatpush1.bf16.msra.mxu0 %v10742_v40  ;;  %7373 = vmatpush1.bf16.msra.mxu1 %v10744_v23 }
 0x92c   :  { %7333 = vmatprep.subr.bf16.mxu0 %v10748_v61  ;;  %7374 = vmatprep.subr.bf16.mxu1 %v10750_v32  ;;  %v11536_v61 = vld [vmem:[#allocation48_spill] sm:$0xff]  ;;  %v11537_v32 = vld [vmem:[#allocation49_spill] sm:$0xff] }
 0x92d   :  { %v9017_v1 = vpop.eup %9016  ;;  %7363 = vmatprep.mubr.bf16.mxu0 %v11211_v43  ;;  %7404 = vmatprep.mubr.bf16.mxu1 %v11211_v43  ;;  %v11534_v43 = vld [vmem:[#allocation46_spill] sm:$0xff] }
 0x92e   :  { %v6847_v5 = vmul.f32 %v9017_v1, %v6834_v11  ;;  %v9019_v51 = vpop.eup %9018 }
 0x92f   :  { %7334 = vmatpush1.bf16.msra.mxu0 %v10754_v57  ;;  %7375 = vmatpush1.bf16.msra.mxu1 %v10756_v55  ;;  %v6842_v23 = vadd.f32 1.0, %v9019_v51  ;;  %v11538_v57 = vld [vmem:[#allocation50_spill] sm:$0xff]  ;;  %v11539_v55 = vld [vmem:[#allocation51_spill] sm:$0xff] }
 0x930   :  { %v6848_v40 = vadd.f32 %v6847_v5, %v6833_v50  ;;  %7335 = vmatprep.subr.bf16.mxu0 %v10761_v13  ;;  %7376 = vmatprep.subr.bf16.mxu1 %v10763_v19  ;;  %v11540_v13 = vld [vmem:[#allocation52_spill] sm:$0xff]  ;;  %v11541_v19 = vld [vmem:[#allocation53_spill] sm:$0xff] }
 0x932   :  { %9020 = vtanh.f32 %v6848_v40 }
 0x933   :  { %7336 = vmatpush1.bf16.msra.mxu0 %v10770_v35  ;;  %7377 = vmatpush1.bf16.msra.mxu1 %v10772_v37  ;;  %9022 = vrcp.f32 %v6842_v23  ;;  %v11542_v37 = vld [vmem:[#allocation54_spill] sm:$0xff] }
 0x934   :  { %7337 = vmatprep.subr.bf16.mxu0 %v10776_v27  ;;  %7378 = vmatprep.subr.bf16.mxu1 %v10778_v38  ;;  %v11543_v27 = vld [vmem:[#allocation55_spill] sm:$0xff]  ;;  %v11544_v38 = vld [vmem:[#allocation56_spill] sm:$0xff] }
 0x937   :  { %7338 = vmatpush1.bf16.msra.mxu0 %v11534_v43  ;;  %7379 = vmatpush1.bf16.msra.mxu1 %v11535_v31 }
 0x938   :  { %7339 = vmatprep.subr.bf16.mxu0 %v11536_v61  ;;  %7380 = vmatprep.subr.bf16.mxu1 %v11537_v32 }
 0x93b   :  { %7340 = vmatpush1.bf16.msra.mxu0 %v11538_v57  ;;  %7381 = vmatpush1.bf16.msra.mxu1 %v11539_v55 }
 0x93c   :  { %7341 = vmatprep.subr.bf16.mxu0 %v11540_v13  ;;  %7382 = vmatprep.subr.bf16.mxu1 %v11541_v19 }
 0x93f   :  { %v9021_v35 = vpop.eup %9020  ;;  %7342 = vmatpush1.bf16.msra.mxu0 %v11542_v37  ;;  %7383 = vmatpush1.bf16.msra.mxu1 %v11543_v27 }
 0x940   :  { %7343 = vmatprep.subr.bf16.mxu0 %v11544_v38  ;;  %7384 = vmatprep.subr.bf16.mxu1 %v11545_v7  ;;  %v6851_v2 = vrot.slane %v9021_v35, 2  ;;  %v9023_v22 = vpop.eup %9022 }
 0x942   :  { %v6853_v12 = vsub.f32 %v10873_v30, %v6851_v2 }
 0x943   :  { %7344 = vmatpush1.bf16.msra.mxu0 %v10818_v18  ;;  %7385 = vmatpush1.bf16.msra.mxu1 %v11546_v44 }
 0x944   :  { %7345 = vmatprep.subr.bf16.mxu0 %v10824_v41  ;;  %7386 = vmatprep.subr.bf16.mxu1 %v10826_v45  ;;  %v6855_v29 = vrot.slane %v6853_v12, 6 }
 0x946   :  { %v6857_v6 = vmul.f32 %v9023_v22, %v6855_v29 }
 0x947   :  { %7346 = vmatpush1.bf16.msra.mxu0 %v10831_v48  ;;  %7387 = vmatpush1.bf16.msra.mxu1 %v10833_v42 }
 0x948   :  { %v6858_v26 = vadd.f32 %v9021_v35, %v6857_v6 }
 0x94a   :  { %v6860_v4 = vpack.c.bf16 %v6858_v26, %v6858_v26  ;;  %7437 = vst [vmem:[%s10992_s9 - $0x6] sm:$0xc0] %v6858_v26 }
 0x94c   :  { %v7169_v18 = vrot.slane %v6860_v4, 3 }
 0x94e   :  { %7364 = vmatmul.mubr.bf16.vlgmr.msra.gmra.mxu0 %v7169_v18  ;;  %7405 = vmatmul.mubr.bf16.vlgmr.msra.gmra.mxu1 %v7169_v18 }
 0x9ea   :  { %v7120_v30 = vpop.f32.mrf.mxu0  ;;  %v7161_v41 = vpop.f32.mrf.mxu1 }
 0x9ec   :  { %v7122_v17 = vpop.f32.mrf.mxu0  ;;  %v7163_v45 = vpop.f32.mrf.mxu1 }
 0x9ee   :  { %v7124_v9 = vpop.f32.mrf.mxu0  ;;  %v7165_v25 = vpop.f32.mrf.mxu1 }
 0x9f0   :  { %v7125_v34 = vpop.f32.mrf.mxu0  ;;  %v7166_v36 = vpop.f32.mrf.mxu1 }
 0xa0e   :  { %v7365_v48 = vpop.f32.mrf.mxu0  ;;  %v7406_v56 = vpop.f32.mrf.mxu1 }
 0xa0f   :  { %v7366_v42 = vadd.f32 %v7365_v48, %v7120_v30  ;;  %v7407_v63 = vadd.f32 %v7406_v56, %v7161_v41 }
 0xa10   :  { %v7367_v24 = vpop.f32.mrf.mxu0  ;;  %v7408_v54 = vpop.f32.mrf.mxu1 }
 0xa11   :  { %v7413_v58 = vadd.f32 %v7366_v42, %v9547_v52  ;;  %v7368_v47 = vadd.f32 %v7367_v24, %v7122_v17  ;;  %v7409_v16 = vadd.f32 %v7408_v54, %v7163_v45  ;;  %v7415_v49 = vadd.f32 %v7407_v63, %v9562_v15 }
 0xa12   :  { %v7369_v53 = vpop.f32.mrf.mxu0  ;;  %v7410_v59 = vpop.f32.mrf.mxu1 }
 0xa13   :  { %v8269_v0 = vmul.f32 -1.442695, %v7413_v58  ;;  %v7414_v62 = vadd.f32 %v7368_v47, %v9552_v3  ;;  %v7416_v8 = vadd.f32 %v7409_v16, %v9558_v10 }
 0xa14   :  { %v7370_v46 = vpop.f32.mrf.mxu0  ;;  %v7411_v60 = vpop.f32.mrf.mxu1 }
 0xa15   :  { %9024 = vpow2.f32 %v8269_v0  ;;  %v8270_v33 = vmul.f32 -1.442695, %v7414_v62 }
 0xa17   :  { %9026 = vpow2.f32 %v8270_v33 }
 0xa22   :  { %v9025_v20 = vpop.eup %9024 }
 0xa23   :  { %v7423_v14 = vadd.f32 1.0, %v9025_v20 }
 0xa24   :  { %v9027_v39 = vpop.eup %9026 }
 0xa25   :  { %9028 = vrcp.f32 %v7423_v14  ;;  %v7424_v11 = vadd.f32 1.0, %v9027_v39 }
 0xa32   :  { %v9029_v52 = vpop.eup %9028 }
 0xa33   :  { %v7429_v21 = vmul.f32 %v9029_v52, %v7416_v8 }
 0xa35   :  { %v7430_v1 = vadd.f32 %v7429_v21, %v7415_v49 }
 0xa37   :  { %9030 = vtanh.f32 %v7430_v1 }
 0xa38   :  { %9032 = vrcp.f32 %v7424_v11 }
 0xa44   :  { %v9031_v50 = vpop.eup %9030 }
 0xa45   :  { %v7432_v3 = vsub.f32 %v10930_v28, %v9031_v50  ;;  %v9033_v5 = vpop.eup %9032 }
 0xa47   :  { %v7433_v40 = vmul.f32 %v9033_v5, %v7432_v3 }
 0xa49   :  { %v7434_v51 = vadd.f32 %v9031_v50, %v7433_v40 }
 0xa4b   :  { %8271 = vst [vmem:[%s10991_s8 + $0xe] sm:$0x3] %v7434_v51  ;;  %8272 = vst [vmem:[%s10992_s9 + $0x2] sm:$0x3] %v7434_v51 }
 0xa4c   :  { %7448 = vsyncpa [#allocation3], 1 }
 0xa4d   :  { %7449 = vsyncpa [#allocation5], 1 }

</bundles_post_ra>
